<compile_context>
chip_gen: v6e
topology: v6e:2x2x1
jax: 0.10.0
libtpu: 0.0.40
codegen_flags: <defaults>
</compile_context>

<pallas_src>
import jax
import jax.numpy as jnp
import numpy as np
from jax.experimental import pallas as pl
from jax.experimental.pallas import tpu as pltpu

EPS = 1e-5          # PyTorch BatchNorm2d default
LANE = 128          # TPU lane width
_VMEM_LIMIT = 32 * 1024 * 1024   # safe on v5e/v6e and within v7x's 64 MiB/TC


def _cparams(dimension_semantics):
    return pltpu.CompilerParams(dimension_semantics=dimension_semantics,
                                vmem_limit_bytes=_VMEM_LIMIT)


def _round_up(x, m):
    return (x + m - 1) // m * m


def _pad_axis(x, axis, target):
    pad = [(0, 0)] * x.ndim
    pad[axis] = (0, target - x.shape[axis])
    return jnp.pad(x, pad)


# ----------------------------- Pallas kernels -----------------------------

def _bn_stats_kernel(x_ref, o_ref):
    """Accumulate per-channel [sum; sum_sq] over M row-tiles into a (2, C) output."""
    @pl.when(pl.program_id(0) == 0)
    def _():
        o_ref[...] = jnp.zeros_like(o_ref)

    x = x_ref[...].astype(jnp.float32)
    s = jnp.sum(x, axis=0, keepdims=True)
    ss = jnp.sum(x * x, axis=0, keepdims=True)
    o_ref[...] += jnp.concatenate([s, ss], axis=0)


def _bn_apply_relu_kernel(x_ref, sc_ref, sh_ref, o_ref):
    """y = relu(x * scale + shift), per M row-tile; scale/shift are (1, C)."""
    y = x_ref[...].astype(jnp.float32) * sc_ref[...] + sh_ref[...]
    o_ref[...] = jnp.maximum(y, 0.0).astype(o_ref.dtype)


def _matmul_kernel(a_ref, b_ref, o_ref, acc_ref):
    """Tiled matmul with f32 VMEM accumulator over the K grid axis."""
    @pl.when(pl.program_id(2) == 0)
    def _():
        acc_ref[...] = jnp.zeros_like(acc_ref)

    acc_ref[...] += jnp.dot(a_ref[...], b_ref[...], preferred_element_type=jnp.float32)

    @pl.when(pl.program_id(2) == pl.num_programs(2) - 1)
    def _():
        o_ref[...] = acc_ref[...].astype(o_ref.dtype)


def _make_conv3x3_kernel(oh, ow, tap_offsets, has_residual):
    """3x3 conv over one whole image; weights VMEM-resident; all 9 taps unrolled.

    tap_offsets[kh*3+kw] = (row_off, col_off): *static* contiguous slice offsets into
    the activation block (already phase-split for stride 2) for that tap.
    """
    def kernel(*refs):
        if has_residual:
            x_ref, w_ref, r_ref, o_ref = refs
        else:
            x_ref, w_ref, o_ref = refs
            r_ref = None

        cin = x_ref.shape[-1]
        cout = w_ref.shape[-1]
        x = x_ref[0]                                   # (rows, cols, Cin_p)

        acc = jnp.zeros((oh * ow, cout), jnp.float32)
        for t, (r0, c0) in enumerate(tap_offsets):     # fully unrolled: 9 MXU matmuls
            kh, kw = t // 3, t % 3
            a = x[r0:r0 + oh, c0:c0 + ow, :].reshape(oh * ow, cin)
            acc = acc + jnp.dot(a, w_ref[kh, kw], preferred_element_type=jnp.float32)

        out = acc.reshape(oh, ow, cout)
        if r_ref is not None:
            out = out + r_ref[0].astype(jnp.float32)   # residual fused in epilogue
        o_ref[...] = out[None].astype(o_ref.dtype)

    return kernel


# ----------------------------- Pallas wrappers -----------------------------

def bn_stats(x2):
    """x2: (M, C) -> (2, C) f32 with rows [sum, sum_sq] (tiled 'arbitrary' reduction)."""
    m, c = x2.shape
    tm = m if m <= 512 else 512
    mp = _round_up(m, tm)
    if mp != m:
        x2 = jnp.pad(x2, ((0, mp - m), (0, 0)))        # zero rows do not change sums
    return pl.pallas_call(
        _bn_stats_kernel,
        out_shape=jax.ShapeDtypeStruct((2, c), jnp.float32),
        grid=(mp // tm,),
        in_specs=[pl.BlockSpec((tm, c), lambda i: (i, 0))],
        out_specs=pl.BlockSpec((2, c), lambda i: (0, 0)),
        compiler_params=_cparams(("arbitrary",)),
    )(x2)


def bn_apply_relu(x2, scale, shift, out_dtype):
    """x2: (M, C), scale/shift: (1, C) f32 -> relu(x*scale+shift) in out_dtype."""
    m, c = x2.shape
    tm = m if m <= 512 else 512
    mp = _round_up(m, tm)
    if mp != m:
        x2 = jnp.pad(x2, ((0, mp - m), (0, 0)))
    y = pl.pallas_call(
        _bn_apply_relu_kernel,
        out_shape=jax.ShapeDtypeStruct((mp, c), out_dtype),
        grid=(mp // tm,),
        in_specs=[pl.BlockSpec((tm, c), lambda i: (i, 0)),
                  pl.BlockSpec((1, c), lambda i: (0, 0)),
                  pl.BlockSpec((1, c), lambda i: (0, 0))],
        out_specs=pl.BlockSpec((tm, c), lambda i: (i, 0)),
        compiler_params=_cparams(("parallel",)),
    )(x2, scale, shift)
    return y[:m]


def matmul_tiled(a, b, out_dtype=jnp.float32):
    """Tiled, pipelined matmul: a (M, K) @ b (K, N) -> (M, N) in out_dtype."""
    m, k = a.shape
    k2, n = b.shape
    assert k == k2
    tm = min(512, _round_up(m, 128))                    # 256+ tiles when dims allow
    tn = min(256, _round_up(n, 128))
    tk = min(256, _round_up(k, 128))
    mp, kp, np_ = _round_up(m, tm), _round_up(k, tk), _round_up(n, tn)
    a = jnp.pad(a, ((0, mp - m), (0, kp - k)))
    b = jnp.pad(b, ((0, kp - k), (0, np_ - n)))
    out = pl.pallas_call(
        _matmul_kernel,
        out_shape=jax.ShapeDtypeStruct((mp, np_), out_dtype),
        grid=(mp // tm, np_ // tn, kp // tk),
        in_specs=[pl.BlockSpec((tm, tk), lambda i, j, kk: (i, kk)),
                  pl.BlockSpec((tk, tn), lambda i, j, kk: (kk, j))],
        out_specs=pl.BlockSpec((tm, tn), lambda i, j, kk: (i, j)),
        scratch_shapes=[pltpu.VMEM((tm, tn), jnp.float32)],
        compiler_params=_cparams(("parallel", "parallel", "arbitrary")),
    )(a, b)
    return out[:m, :n]


def conv3x3(yp, w_k, stride, residual=None, out_dtype=jnp.float32):
    """3x3 conv (spatial zero-padding already applied), grid = one image per step.

    yp:   (N, H+2, W+2, Cin_p) activation (zero-padded borders, lane-padded channels)
    w_k:  (3, 3, Cin_p, Cout_p) (VMEM-resident during the whole call)
    residual: optional (N, OH, OW, Cout_p) f32 added in the epilogue.
    Returns (N, OH, OW, Cout_p) in out_dtype.
    """
    assert stride in (1, 2)
    n, hp, wp, cpi = yp.shape
    cpo = w_k.shape[3]
    oh = (hp - 3) // stride + 1
    ow = (wp - 3) // stride + 1

    if stride == 1:
        x_in = yp
        rows, cols = hp, wp
        tap_offsets = [(kh, kw) for kh in range(3) for kw in range(3)]
    else:
        # Space-to-depth: split rows/cols by parity so every tap slice is contiguous
        # (eliminates strided in-kernel loads and the 2x wasted column DMA).
        hp2, wp2 = (hp + 1) // 2, (wp + 1) // 2
        if hp2 * 2 != hp or wp2 * 2 != wp:
            yp = jnp.pad(yp, ((0, 0), (0, hp2 * 2 - hp), (0, wp2 * 2 - wp), (0, 0)))
        x_in = jnp.transpose(yp.reshape(n, hp2, 2, wp2, 2, cpi), (0, 2, 4, 1, 3, 5))
        x_in = x_in.reshape(n, 4 * hp2, wp2, cpi)       # phase (ph,pw) at rows [(2ph+pw)*hp2, ...)
        rows, cols = 4 * hp2, wp2
        tap_offsets = [((((kh % 2) * 2 + (kw % 2)) * hp2 + kh // 2), kw // 2)
                       for kh in range(3) for kw in range(3)]

    in_specs = [
        pl.BlockSpec((1, rows, cols, cpi), lambda b: (b, 0, 0, 0)),
        pl.BlockSpec((3, 3, cpi, cpo), lambda b: (0, 0, 0, 0)),   # constant -> one DMA
    ]
    args = [x_in, w_k]
    if residual is not None:
        in_specs.append(pl.BlockSpec((1, oh, ow, cpo), lambda b: (b, 0, 0, 0)))
        args.append(residual)

    return pl.pallas_call(
        _make_conv3x3_kernel(oh, ow, tap_offsets, residual is not None),
        out_shape=jax.ShapeDtypeStruct((n, oh, ow, cpo), out_dtype),
        grid=(n,),
        in_specs=in_specs,
        out_specs=pl.BlockSpec((1, oh, ow, cpo), lambda b: (b, 0, 0, 0)),
        compiler_params=_cparams(("parallel",)),
    )(*args)


# ----------------------------- glue (layout / param prep) -----------------------------

def _bn_scale_shift(stats, count, gamma_p, beta_p):
    # TODO(synk): single-pass E[x^2]-E[x]^2 in f32; switch to shifted/two-pass stats
    # if activation means grow large relative to their std.
    mean = stats[0] / count
    var = jnp.maximum(stats[1] / count - mean * mean, 0.0)   # biased (training-mode) var
    inv = jax.lax.rsqrt(var + EPS)
    scale = gamma_p * inv
    shift = beta_p - mean * scale
    return scale.reshape(1, -1), shift.reshape(1, -1)


def _prep_conv3x3_w(w_oihw, cpi, cpo, dtype):
    """(Cout, Cin, 3, 3) -> (3, 3, Cpi, Cpo) with zero-padded channels."""
    w = jnp.transpose(w_oihw, (2, 3, 1, 0))
    w = _pad_axis(_pad_axis(w, 2, cpi), 3, cpo)
    return w.astype(dtype)


def _prep_conv1x1_w(w_oihw, cpi, cpo, dtype):
    """(Cout, Cin, 1, 1) -> (Cpi, Cpo) with zero-padded channels."""
    w = jnp.transpose(w_oihw[:, :, 0, 0], (1, 0))
    w = _pad_axis(_pad_axis(w, 0, cpi), 1, cpo)
    return w.astype(dtype)


def init_preact_block_params(key, in_planes, planes, stride):
    ks = jax.random.split(key, 6)
    params = {
        "bn1_gamma": 1.0 + 0.1 * jax.random.normal(ks[0], (in_planes,), jnp.float32),
        "bn1_beta": 0.1 * jax.random.normal(ks[1], (in_planes,), jnp.float32),
        "conv1_w": 0.1 * jax.random.normal(ks[2], (planes, in_planes, 3, 3), jnp.float32),
        "bn2_gamma": 1.0 + 0.1 * jax.random.normal(ks[3], (planes,), jnp.float32),
        "bn2_beta": 0.1 * jax.random.normal(ks[4], (planes,), jnp.float32),
        "conv2_w": 0.1 * jax.random.normal(ks[5], (planes, planes, 3, 3), jnp.float32),
    }
    if stride != 1 or in_planes != planes:
        params["shortcut_w"] = 0.1 * jax.random.normal(
            jax.random.fold_in(key, 99), (planes, in_planes, 1, 1), jnp.float32)
    return params


def preact_block_forward(x_nchw, params, stride, compute_dtype=jnp.bfloat16):
    """PreActBlock forward. x_nchw: (N, Cin, H, W) -> (N, planes, OH, OW) f32.

    compute_dtype: dtype of MXU operands / inter-kernel activations.  bf16 is the
    recommended default on all generations (v5e/v6e/v7x consume bf16 natively);
    accumulation is always f32.  Use f32 only for exact-tolerance checking.
    """
    n, cin, h, w = x_nchw.shape
    planes = params["conv1_w"].shape[0]
    cpi = _round_up(cin, LANE)      # lane-dense channel padding
    cpo = _round_up(planes, LANE)

    gamma1 = _pad_axis(params["bn1_gamma"].astype(jnp.float32), 0, cpi)
    beta1 = _pad_axis(params["bn1_beta"].astype(jnp.float32), 0, cpi)
    gamma2 = _pad_axis(params["bn2_gamma"].astype(jnp.float32), 0, cpo)
    beta2 = _pad_axis(params["bn2_beta"].astype(jnp.float32), 0, cpo)
    w1 = _prep_conv3x3_w(params["conv1_w"], cpi, cpo, compute_dtype)
    w2 = _prep_conv3x3_w(params["conv2_w"], cpo, cpo, compute_dtype)

    x_nhwc = jnp.transpose(x_nchw, (0, 2, 3, 1)).astype(jnp.float32)
    x_p = _pad_axis(x_nhwc, 3, cpi)                         # (N, H, W, Cpi)
    m1 = n * h * w

    # ---- out = relu(bn1(x)) : tiled stats + tiled normalize ----
    stats1 = bn_stats(x_p.reshape(m1, cpi))
    scale1, shift1 = _bn_scale_shift(stats1, m1, gamma1, beta1)
    y1 = bn_apply_relu(x_p.reshape(m1, cpi), scale1, shift1, compute_dtype)
    y1 = y1.reshape(n, h, w, cpi)

    oh = (h + 2 - 3) // stride + 1
    ow = (w + 2 - 3) // stride + 1
    m2 = n * oh * ow

    # ---- shortcut ----
    if "shortcut_w" in params:
        wsc = _prep_conv1x1_w(params["shortcut_w"], cpi, cpo, compute_dtype)
        y1s = y1[:, ::stride, ::stride, :].reshape(m2, cpi)
        sc = matmul_tiled(y1s, wsc, out_dtype=jnp.float32).reshape(n, oh, ow, cpo)
    else:
        sc = x_p                      # identity: stride==1 and cin==planes ⇒ shapes match

    # ---- out = conv1(out)  (3x3, stride s, pad 1) ----
    y1p = jnp.pad(y1, ((0, 0), (1, 1), (1, 1), (0, 0)))     # zero pad post-ReLU activation
    z1 = conv3x3(y1p, w1, stride, out_dtype=jnp.float32)    # (N, OH, OW, Cpo) f32

    # ---- out = conv2(relu(bn2(out))) + shortcut  (residual fused in conv2 epilogue) ----
    stats2 = bn_stats(z1.reshape(m2, cpo))
    scale2, shift2 = _bn_scale_shift(stats2, m2, gamma2, beta2)
    y2 = bn_apply_relu(z1.reshape(m2, cpo), scale2, shift2, compute_dtype)
    y2p = jnp.pad(y2.reshape(n, oh, ow, cpo), ((0, 0), (1, 1), (1, 1), (0, 0)))
    out = conv3x3(y2p, w2, 1, residual=sc, out_dtype=jnp.float32)

    out = out[:, :, :, :planes]                             # drop lane padding
    return jnp.transpose(out, (0, 3, 1, 2))                 # back to NCHW


# ----------------------------- reference (pure JAX) -----------------------------

def _ref_bn_relu(x_nchw, gamma, beta):
    mean = jnp.mean(x_nchw, axis=(0, 2, 3), keepdims=True)
    var = jnp.mean(jnp.square(x_nchw - mean), axis=(0, 2, 3), keepdims=True)
    y = (x_nchw - mean) * jax.lax.rsqrt(var + EPS)
    y = y * gamma.reshape(1, -1, 1, 1) + beta.reshape(1, -1, 1, 1)
    return jnp.maximum(y, 0.0)


def _ref_conv(x_nchw, w_oihw, stride, padding):
    return jax.lax.conv_general_dilated(
        x_nchw, w_oihw, window_strides=(stride, stride),
        padding=[(padding, padding), (padding, padding)],
        dimension_numbers=("NCHW", "OIHW", "NCHW"),
        precision=jax.lax.Precision.HIGHEST)


def preact_block_reference(x_nchw, params, stride):
    y1 = _ref_bn_relu(x_nchw, params["bn1_gamma"], params["bn1_beta"])
    if "shortcut_w" in params:
        sc = _ref_conv(y1, params["shortcut_w"], stride, 0)
    else:
        sc = x_nchw
    z1 = _ref_conv(y1, params["conv1_w"], stride, 1)
    y2 = _ref_bn_relu(z1, params["bn2_gamma"], params["bn2_beta"])
    z2 = _ref_conv(y2, params["conv2_w"], 1, 1)
    return z2 + sc


# ----------------------------- main -----------------------------

if __name__ == "__main__":
    key = jax.random.PRNGKey(0)
    fwd = jax.jit(preact_block_forward, static_argnums=(2, 3))

    # Config 1: projection shortcut (stride 2, channel increase).
    k_x, k_p = jax.random.split(key)
    N, IN_PLANES, PLANES, H, W, STRIDE = 2, 4, 8, 16, 16, 2
    x = jax.random.normal(k_x, (N, IN_PLANES, H, W), jnp.float32)
    params = init_preact_block_params(k_p, IN_PLANES, PLANES, STRIDE)
    ref = jax.block_until_ready(preact_block_reference(x, params, STRIDE))

    # f32 MXU-operand path (exact-tolerance check).
    out_f32 = jax.block_until_ready(fwd(x, params, STRIDE, jnp.float32))
    np.testing.assert_allclose(np.asarray(out_f32), np.asarray(ref), rtol=1e-3, atol=1e-3)

    # bf16 MXU-operand path (recommended default on v5e/v6e/v7x; f32 accumulation).
    out_bf16 = jax.block_until_ready(fwd(x, params, STRIDE, jnp.bfloat16))
    np.testing.assert_allclose(np.asarray(out_bf16), np.asarray(ref), rtol=5e-2, atol=5e-2)

    # Config 2: identity shortcut (stride 1, same channel count).
    k_x2, k_p2 = jax.random.split(jax.random.fold_in(key, 1))
    N2, P2, H2, W2 = 2, 8, 8, 8
    x2 = jax.random.normal(k_x2, (N2, P2, H2, W2), jnp.float32)
    params2 = init_preact_block_params(k_p2, P2, P2, 1)
    ref2 = jax.block_until_ready(preact_block_reference(x2, params2, 1))
    out2 = jax.block_until_ready(fwd(x2, params2, 1, jnp.float32))
    np.testing.assert_allclose(np.asarray(out2), np.asarray(ref2), rtol=1e-3, atol=1e-3)

    print("KERNEL_OK")
</pallas_src>

<mosaic_0001>
module attributes {stable_mosaic.version = 11 : i64} {
  func.func @_bn_stats_kernel(%arg0: i32, %arg1: memref<512x128xf32, #tpu.memory_space<vmem>>, %arg2: memref<2x128xf32, #tpu.memory_space<vmem>>) attributes {dimension_semantics = [#tpu.dimension_semantics<arbitrary>], iteration_bounds = array<i64: 1>, scalar_prefetch = 0 : i64, scratch_operands = 0 : i64, tpu.core_type = #tpu.core_type<tc>, window_params = [{transform_indices = @transform_0, window_bounds = array<i64: 512, 128>}, {pipeline_mode = #tpu.pipeline_mode<synchronous>, transform_indices = @transform_1, window_bounds = array<i64: 2, 128>}]} {
    %c0_i32 = arith.constant 0 : i32
    %0 = arith.cmpi eq, %arg0, %c0_i32 : i32
    %1 = arith.extui %0 : i1 to i32
    %c0_i32_0 = arith.constant 0 : i32
    %2 = arith.cmpi ne, %1, %c0_i32_0 : i32
    scf.if %2 {
      %cst_7 = arith.constant 0.000000e+00 : f32
      %13 = vector.broadcast %cst_7 : f32 to vector<2x128xf32>
      %c0_8 = arith.constant 0 : index
      %c0_9 = arith.constant 0 : index
      %14 = vector.load %arg2[%c0_8, %c0_9] : memref<2x128xf32, #tpu.memory_space<vmem>>, vector<2x128xf32>
      tpu.vector_store %arg2[%c0_8, %c0_9], %13 {strides = array<i32>} : memref<2x128xf32, #tpu.memory_space<vmem>>, vector<2x128xf32>,
    } else {
    }
    %c0 = arith.constant 0 : index
    %c0_1 = arith.constant 0 : index
    %3 = vector.load %arg1[%c0, %c0_1] : memref<512x128xf32, #tpu.memory_space<vmem>>, vector<512x128xf32>
    %cst = arith.constant dense<0.000000e+00> : vector<128xf32>
    %4 = vector.multi_reduction <add>, %3, %cst [0] : vector<512x128xf32> to vector<128xf32>
    %5 = vector.shape_cast %4 : vector<128xf32> to vector<1x128xf32>
    %6 = arith.mulf %3, %3 : vector<512x128xf32>
    %cst_2 = arith.constant dense<0.000000e+00> : vector<128xf32>
    %7 = vector.multi_reduction <add>, %6, %cst_2 [0] : vector<512x128xf32> to vector<128xf32>
    %8 = vector.shape_cast %7 : vector<128xf32> to vector<1x128xf32>
    %c0_3 = arith.constant 0 : index
    %c0_4 = arith.constant 0 : index
    %9 = vector.load %arg2[%c0_3, %c0_4] : memref<2x128xf32, #tpu.memory_space<vmem>>, vector<2x128xf32>
    %10 = tpu.concatenate %5, %8 in 0 : vector<1x128xf32>, vector<1x128xf32> -> vector<2x128xf32>
    %11 = arith.addf %9, %10 : vector<2x128xf32>
    %c0_5 = arith.constant 0 : index
    %c0_6 = arith.constant 0 : index
    %12 = vector.load %arg2[%c0_5, %c0_6] : memref<2x128xf32, #tpu.memory_space<vmem>>, vector<2x128xf32>
    tpu.vector_store %arg2[%c0_5, %c0_6], %11 {strides = array<i32>} : memref<2x128xf32, #tpu.memory_space<vmem>>, vector<2x128xf32>,
    return
  }
  func.func @transform_0(%arg0: i32) -> (i32, i32) {
    %c0_i32 = arith.constant 0 : i32
    %c0_i32_0 = arith.constant 0 : i32
    return %arg0, %c0_i32 : i32, i32
  }
  func.func @transform_1(%arg0: i32) -> (i32, i32) {
    %c0_i32 = arith.constant 0 : i32
    %c0_i32_0 = arith.constant 0 : i32
    %c0_i32_1 = arith.constant 0 : i32
    return %c0_i32, %c0_i32_0 : i32, i32
  }
}

module attributes {stable_mosaic.version = 11 : i64} {
  func.func @_bn_apply_relu_kernel(%arg0: i32, %arg1: memref<512x128xf32, #tpu.memory_space<vmem>>, %arg2: memref<1x128xf32, #tpu.memory_space<vmem>>, %arg3: memref<1x128xf32, #tpu.memory_space<vmem>>, %arg4: memref<512x128xf32, #tpu.memory_space<vmem>>) attributes {dimension_semantics = [#tpu.dimension_semantics<parallel>], iteration_bounds = array<i64: 1>, scalar_prefetch = 0 : i64, scratch_operands = 0 : i64, tpu.core_type = #tpu.core_type<tc>, window_params = [{transform_indices = @transform_0, window_bounds = array<i64: 512, 128>}, {pipeline_mode = #tpu.pipeline_mode<synchronous>, transform_indices = @transform_1, window_bounds = array<i64: 1, 128>}, {pipeline_mode = #tpu.pipeline_mode<synchronous>, transform_indices = @transform_2, window_bounds = array<i64: 1, 128>}, {transform_indices = @transform_3, window_bounds = array<i64: 512, 128>}]} {
    %c0 = arith.constant 0 : index
    %c0_0 = arith.constant 0 : index
    %0 = vector.load %arg1[%c0, %c0_0] : memref<512x128xf32, #tpu.memory_space<vmem>>, vector<512x128xf32>
    %c0_1 = arith.constant 0 : index
    %c0_2 = arith.constant 0 : index
    %1 = vector.load %arg2[%c0_1, %c0_2] : memref<1x128xf32, #tpu.memory_space<vmem>>, vector<1x128xf32>
    %2 = vector.broadcast %1 : vector<1x128xf32> to vector<512x128xf32>
    %3 = arith.mulf %0, %2 : vector<512x128xf32>
    %c0_3 = arith.constant 0 : index
    %c0_4 = arith.constant 0 : index
    %4 = vector.load %arg3[%c0_3, %c0_4] : memref<1x128xf32, #tpu.memory_space<vmem>>, vector<1x128xf32>
    %5 = vector.broadcast %4 : vector<1x128xf32> to vector<512x128xf32>
    %6 = arith.addf %3, %5 : vector<512x128xf32>
    %cst = arith.constant 0.000000e+00 : f32
    %7 = vector.broadcast %cst : f32 to vector<512x128xf32>
    %8 = arith.maximumf %6, %7 : vector<512x128xf32>
    %c0_5 = arith.constant 0 : index
    %c0_6 = arith.constant 0 : index
    %9 = vector.load %arg4[%c0_5, %c0_6] : memref<512x128xf32, #tpu.memory_space<vmem>>, vector<512x128xf32>
    tpu.vector_store %arg4[%c0_5, %c0_6], %8 {strides = array<i32>} : memref<512x128xf32, #tpu.memory_space<vmem>>, vector<512x128xf32>,
    return
  }
  func.func @transform_0(%arg0: i32) -> (i32, i32) {
    %c0_i32 = arith.constant 0 : i32
    %c0_i32_0 = arith.constant 0 : i32
    return %arg0, %c0_i32 : i32, i32
  }
  func.func @transform_1(%arg0: i32) -> (i32, i32) {
    %c0_i32 = arith.constant 0 : i32
    %c0_i32_0 = arith.constant 0 : i32
    %c0_i32_1 = arith.constant 0 : i32
    return %c0_i32, %c0_i32_0 : i32, i32
  }
  func.func @transform_2(%arg0: i32) -> (i32, i32) {
    %c0_i32 = arith.constant 0 : i32
    %c0_i32_0 = arith.constant 0 : i32
    %c0_i32_1 = arith.constant 0 : i32
    return %c0_i32, %c0_i32_0 : i32, i32
  }
  func.func @transform_3(%arg0: i32) -> (i32, i32) {
    %c0_i32 = arith.constant 0 : i32
    %c0_i32_0 = arith.constant 0 : i32
    return %arg0, %c0_i32 : i32, i32
  }
}

module attributes {stable_mosaic.version = 11 : i64} {
  func.func @_bn_stats_kernel(%arg0: i32, %arg1: memref<128x128xf32, #tpu.memory_space<vmem>>, %arg2: memref<2x128xf32, #tpu.memory_space<vmem>>) attributes {dimension_semantics = [#tpu.dimension_semantics<arbitrary>], iteration_bounds = array<i64: 1>, scalar_prefetch = 0 : i64, scratch_operands = 0 : i64, tpu.core_type = #tpu.core_type<tc>, window_params = [{transform_indices = @transform_0, window_bounds = array<i64: 128, 128>}, {pipeline_mode = #tpu.pipeline_mode<synchronous>, transform_indices = @transform_1, window_bounds = array<i64: 2, 128>}]} {
    %c0_i32 = arith.constant 0 : i32
    %0 = arith.cmpi eq, %arg0, %c0_i32 : i32
    %1 = arith.extui %0 : i1 to i32
    %c0_i32_0 = arith.constant 0 : i32
    %2 = arith.cmpi ne, %1, %c0_i32_0 : i32
    scf.if %2 {
      %cst_7 = arith.constant 0.000000e+00 : f32
      %13 = vector.broadcast %cst_7 : f32 to vector<2x128xf32>
      %c0_8 = arith.constant 0 : index
      %c0_9 = arith.constant 0 : index
      %14 = vector.load %arg2[%c0_8, %c0_9] : memref<2x128xf32, #tpu.memory_space<vmem>>, vector<2x128xf32>
      tpu.vector_store %arg2[%c0_8, %c0_9], %13 {strides = array<i32>} : memref<2x128xf32, #tpu.memory_space<vmem>>, vector<2x128xf32>,
    } else {
    }
    %c0 = arith.constant 0 : index
    %c0_1 = arith.constant 0 : index
    %3 = vector.load %arg1[%c0, %c0_1] : memref<128x128xf32, #tpu.memory_space<vmem>>, vector<128x128xf32>
    %cst = arith.constant dense<0.000000e+00> : vector<128xf32>
    %4 = vector.multi_reduction <add>, %3, %cst [0] : vector<128x128xf32> to vector<128xf32>
    %5 = vector.shape_cast %4 : vector<128xf32> to vector<1x128xf32>
    %6 = arith.mulf %3, %3 : vector<128x128xf32>
    %cst_2 = arith.constant dense<0.000000e+00> : vector<128xf32>
    %7 = vector.multi_reduction <add>, %6, %cst_2 [0] : vector<128x128xf32> to vector<128xf32>
    %8 = vector.shape_cast %7 : vector<128xf32> to vector<1x128xf32>
    %c0_3 = arith.constant 0 : index
    %c0_4 = arith.constant 0 : index
    %9 = vector.load %arg2[%c0_3, %c0_4] : memref<2x128xf32, #tpu.memory_space<vmem>>, vector<2x128xf32>
    %10 = tpu.concatenate %5, %8 in 0 : vector<1x128xf32>, vector<1x128xf32> -> vector<2x128xf32>
    %11 = arith.addf %9, %10 : vector<2x128xf32>
    %c0_5 = arith.constant 0 : index
    %c0_6 = arith.constant 0 : index
    %12 = vector.load %arg2[%c0_5, %c0_6] : memref<2x128xf32, #tpu.memory_space<vmem>>, vector<2x128xf32>
    tpu.vector_store %arg2[%c0_5, %c0_6], %11 {strides = array<i32>} : memref<2x128xf32, #tpu.memory_space<vmem>>, vector<2x128xf32>,
    return
  }
  func.func @transform_0(%arg0: i32) -> (i32, i32) {
    %c0_i32 = arith.constant 0 : i32
    %c0_i32_0 = arith.constant 0 : i32
    return %arg0, %c0_i32 : i32, i32
  }
  func.func @transform_1(%arg0: i32) -> (i32, i32) {
    %c0_i32 = arith.constant 0 : i32
    %c0_i32_0 = arith.constant 0 : i32
    %c0_i32_1 = arith.constant 0 : i32
    return %c0_i32, %c0_i32_0 : i32, i32
  }
}

module attributes {stable_mosaic.version = 11 : i64} {
  func.func @kernel(%arg0: i32, %arg1: memref<1x36x9x128xf32, #tpu.memory_space<vmem>>, %arg2: memref<3x3x128x128xf32, #tpu.memory_space<vmem>>, %arg3: memref<1x8x8x128xf32, #tpu.memory_space<vmem>>) attributes {dimension_semantics = [#tpu.dimension_semantics<parallel>], iteration_bounds = array<i64: 2>, scalar_prefetch = 0 : i64, scratch_operands = 0 : i64, tpu.core_type = #tpu.core_type<tc>, window_params = [{transform_indices = @transform_0, window_bounds = array<i64: 1, 36, 9, 128>}, {pipeline_mode = #tpu.pipeline_mode<synchronous>, transform_indices = @transform_1, window_bounds = array<i64: 3, 3, 128, 128>}, {transform_indices = @transform_2, window_bounds = array<i64: 1, 8, 8, 128>}]} {
    %c0 = arith.constant 0 : index
    %c0_0 = arith.constant 0 : index
    %c0_1 = arith.constant 0 : index
    %c0_2 = arith.constant 0 : index
    %0 = vector.load %arg1[%c0, %c0_0, %c0_1, %c0_2] : memref<1x36x9x128xf32, #tpu.memory_space<vmem>>, vector<1x36x9x128xf32>
    %1 = vector.shape_cast %0 : vector<1x36x9x128xf32> to vector<36x9x128xf32>
    %cst = arith.constant 0.000000e+00 : f32
    %2 = vector.broadcast %cst : f32 to vector<64x128xf32>
    %3 = vector.extract_strided_slice %1 {offsets = [0, 0, 0], sizes = [8, 8, 128], strides = [1, 1, 1]} : vector<36x9x128xf32> to vector<8x8x128xf32>
    %4 = vector.shape_cast %3 : vector<8x8x128xf32> to vector<64x128xf32>
    %c0_3 = arith.constant 0 : index
    %c0_4 = arith.constant 0 : index
    %c0_5 = arith.constant 0 : index
    %c0_6 = arith.constant 0 : index
    %5 = vector.load %arg2[%c0_3, %c0_4, %c0_5, %c0_6] : memref<3x3x128x128xf32, #tpu.memory_space<vmem>>, vector<1x1x128x128xf32>
    %6 = vector.shape_cast %5 : vector<1x1x128x128xf32> to vector<128x128xf32>
    %cst_7 = arith.constant dense<0.000000e+00> : vector<64x128xf32>
    %7 = tpu.matmul %4, %6, %cst_7 {dimension_numbers = #tpu.dot_dimension_numbers<[1], [0], [0], [1], [0, 0, 1, 1], [], []>} : vector<64x128xf32>, vector<128x128xf32>, vector<64x128xf32> -> vector<64x128xf32>
    %8 = arith.addf %2, %7 : vector<64x128xf32>
    %9 = vector.extract_strided_slice %1 {offsets = [9, 0, 0], sizes = [8, 8, 128], strides = [1, 1, 1]} : vector<36x9x128xf32> to vector<8x8x128xf32>
    %10 = vector.shape_cast %9 : vector<8x8x128xf32> to vector<64x128xf32>
    %c0_8 = arith.constant 0 : index
    %c1 = arith.constant 1 : index
    %c0_9 = arith.constant 0 : index
    %c0_10 = arith.constant 0 : index
    %11 = vector.load %arg2[%c0_8, %c1, %c0_9, %c0_10] : memref<3x3x128x128xf32, #tpu.memory_space<vmem>>, vector<1x1x128x128xf32>
    %12 = vector.shape_cast %11 : vector<1x1x128x128xf32> to vector<128x128xf32>
    %cst_11 = arith.constant dense<0.000000e+00> : vector<64x128xf32>
    %13 = tpu.matmul %10, %12, %cst_11 {dimension_numbers = #tpu.dot_dimension_numbers<[1], [0], [0], [1], [0, 0, 1, 1], [], []>} : vector<64x128xf32>, vector<128x128xf32>, vector<64x128xf32> -> vector<64x128xf32>
    %14 = arith.addf %8, %13 : vector<64x128xf32>
    %15 = vector.extract_strided_slice %1 {offsets = [0, 1, 0], sizes = [8, 8, 128], strides = [1, 1, 1]} : vector<36x9x128xf32> to vector<8x8x128xf32>
    %16 = vector.shape_cast %15 : vector<8x8x128xf32> to vector<64x128xf32>
    %c0_12 = arith.constant 0 : index
    %c2 = arith.constant 2 : index
    %c0_13 = arith.constant 0 : index
    %c0_14 = arith.constant 0 : index
    %17 = vector.load %arg2[%c0_12, %c2, %c0_13, %c0_14] : memref<3x3x128x128xf32, #tpu.memory_space<vmem>>, vector<1x1x128x128xf32>
    %18 = vector.shape_cast %17 : vector<1x1x128x128xf32> to vector<128x128xf32>
    %cst_15 = arith.constant dense<0.000000e+00> : vector<64x128xf32>
    %19 = tpu.matmul %16, %18, %cst_15 {dimension_numbers = #tpu.dot_dimension_numbers<[1], [0], [0], [1], [0, 0, 1, 1], [], []>} : vector<64x128xf32>, vector<128x128xf32>, vector<64x128xf32> -> vector<64x128xf32>
    %20 = arith.addf %14, %19 : vector<64x128xf32>
    %21 = vector.extract_strided_slice %1 {offsets = [18, 0, 0], sizes = [8, 8, 128], strides = [1, 1, 1]} : vector<36x9x128xf32> to vector<8x8x128xf32>
    %22 = vector.shape_cast %21 : vector<8x8x128xf32> to vector<64x128xf32>
    %c1_16 = arith.constant 1 : index
    %c0_17 = arith.constant 0 : index
    %c0_18 = arith.constant 0 : index
    %c0_19 = arith.constant 0 : index
    %23 = vector.load %arg2[%c1_16, %c0_17, %c0_18, %c0_19] : memref<3x3x128x128xf32, #tpu.memory_space<vmem>>, vector<1x1x128x128xf32>
    %24 = vector.shape_cast %23 : vector<1x1x128x128xf32> to vector<128x128xf32>
    %cst_20 = arith.constant dense<0.000000e+00> : vector<64x128xf32>
    %25 = tpu.matmul %22, %24, %cst_20 {dimension_numbers = #tpu.dot_dimension_numbers<[1], [0], [0], [1], [0, 0, 1, 1], [], []>} : vector<64x128xf32>, vector<128x128xf32>, vector<64x128xf32> -> vector<64x128xf32>
    %26 = arith.addf %20, %25 : vector<64x128xf32>
    %27 = vector.extract_strided_slice %1 {offsets = [27, 0, 0], sizes = [8, 8, 128], strides = [1, 1, 1]} : vector<36x9x128xf32> to vector<8x8x128xf32>
    %28 = vector.shape_cast %27 : vector<8x8x128xf32> to vector<64x128xf32>
    %c1_21 = arith.constant 1 : index
    %c1_22 = arith.constant 1 : index
    %c0_23 = arith.constant 0 : index
    %c0_24 = arith.constant 0 : index
    %29 = vector.load %arg2[%c1_21, %c1_22, %c0_23, %c0_24] : memref<3x3x128x128xf32, #tpu.memory_space<vmem>>, vector<1x1x128x128xf32>
    %30 = vector.shape_cast %29 : vector<1x1x128x128xf32> to vector<128x128xf32>
    %cst_25 = arith.constant dense<0.000000e+00> : vector<64x128xf32>
    %31 = tpu.matmul %28, %30, %cst_25 {dimension_numbers = #tpu.dot_dimension_numbers<[1], [0], [0], [1], [0, 0, 1, 1], [], []>} : vector<64x128xf32>, vector<128x128xf32>, vector<64x128xf32> -> vector<64x128xf32>
    %32 = arith.addf %26, %31 : vector<64x128xf32>
    %33 = vector.extract_strided_slice %1 {offsets = [18, 1, 0], sizes = [8, 8, 128], strides = [1, 1, 1]} : vector<36x9x128xf32> to vector<8x8x128xf32>
    %34 = vector.shape_cast %33 : vector<8x8x128xf32> to vector<64x128xf32>
    %c1_26 = arith.constant 1 : index
    %c2_27 = arith.constant 2 : index
    %c0_28 = arith.constant 0 : index
    %c0_29 = arith.constant 0 : index
    %35 = vector.load %arg2[%c1_26, %c2_27, %c0_28, %c0_29] : memref<3x3x128x128xf32, #tpu.memory_space<vmem>>, vector<1x1x128x128xf32>
    %36 = vector.shape_cast %35 : vector<1x1x128x128xf32> to vector<128x128xf32>
    %cst_30 = arith.constant dense<0.000000e+00> : vector<64x128xf32>
    %37 = tpu.matmul %34, %36, %cst_30 {dimension_numbers = #tpu.dot_dimension_numbers<[1], [0], [0], [1], [0, 0, 1, 1], [], []>} : vector<64x128xf32>, vector<128x128xf32>, vector<64x128xf32> -> vector<64x128xf32>
    %38 = arith.addf %32, %37 : vector<64x128xf32>
    %39 = vector.extract_strided_slice %1 {offsets = [1, 0, 0], sizes = [8, 8, 128], strides = [1, 1, 1]} : vector<36x9x128xf32> to vector<8x8x128xf32>
    %40 = vector.shape_cast %39 : vector<8x8x128xf32> to vector<64x128xf32>
    %c2_31 = arith.constant 2 : index
    %c0_32 = arith.constant 0 : index
    %c0_33 = arith.constant 0 : index
    %c0_34 = arith.constant 0 : index
    %41 = vector.load %arg2[%c2_31, %c0_32, %c0_33, %c0_34] : memref<3x3x128x128xf32, #tpu.memory_space<vmem>>, vector<1x1x128x128xf32>
    %42 = vector.shape_cast %41 : vector<1x1x128x128xf32> to vector<128x128xf32>
    %cst_35 = arith.constant dense<0.000000e+00> : vector<64x128xf32>
    %43 = tpu.matmul %40, %42, %cst_35 {dimension_numbers = #tpu.dot_dimension_numbers<[1], [0], [0], [1], [0, 0, 1, 1], [], []>} : vector<64x128xf32>, vector<128x128xf32>, vector<64x128xf32> -> vector<64x128xf32>
    %44 = arith.addf %38, %43 : vector<64x128xf32>
    %45 = vector.extract_strided_slice %1 {offsets = [10, 0, 0], sizes = [8, 8, 128], strides = [1, 1, 1]} : vector<36x9x128xf32> to vector<8x8x128xf32>
    %46 = vector.shape_cast %45 : vector<8x8x128xf32> to vector<64x128xf32>
    %c2_36 = arith.constant 2 : index
    %c1_37 = arith.constant 1 : index
    %c0_38 = arith.constant 0 : index
    %c0_39 = arith.constant 0 : index
    %47 = vector.load %arg2[%c2_36, %c1_37, %c0_38, %c0_39] : memref<3x3x128x128xf32, #tpu.memory_space<vmem>>, vector<1x1x128x128xf32>
    %48 = vector.shape_cast %47 : vector<1x1x128x128xf32> to vector<128x128xf32>
    %cst_40 = arith.constant dense<0.000000e+00> : vector<64x128xf32>
    %49 = tpu.matmul %46, %48, %cst_40 {dimension_numbers = #tpu.dot_dimension_numbers<[1], [0], [0], [1], [0, 0, 1, 1], [], []>} : vector<64x128xf32>, vector<128x128xf32>, vector<64x128xf32> -> vector<64x128xf32>
    %50 = arith.addf %44, %49 : vector<64x128xf32>
    %51 = vector.extract_strided_slice %1 {offsets = [1, 1, 0], sizes = [8, 8, 128], strides = [1, 1, 1]} : vector<36x9x128xf32> to vector<8x8x128xf32>
    %52 = vector.shape_cast %51 : vector<8x8x128xf32> to vector<64x128xf32>
    %c2_41 = arith.constant 2 : index
    %c2_42 = arith.constant 2 : index
    %c0_43 = arith.constant 0 : index
    %c0_44 = arith.constant 0 : index
    %53 = vector.load %arg2[%c2_41, %c2_42, %c0_43, %c0_44] : memref<3x3x128x128xf32, #tpu.memory_space<vmem>>, vector<1x1x128x128xf32>
    %54 = vector.shape_cast %53 : vector<1x1x128x128xf32> to vector<128x128xf32>
    %cst_45 = arith.constant dense<0.000000e+00> : vector<64x128xf32>
    %55 = tpu.matmul %52, %54, %cst_45 {dimension_numbers = #tpu.dot_dimension_numbers<[1], [0], [0], [1], [0, 0, 1, 1], [], []>} : vector<64x128xf32>, vector<128x128xf32>, vector<64x128xf32> -> vector<64x128xf32>
    %56 = arith.addf %50, %55 : vector<64x128xf32>
    %57 = vector.shape_cast %56 : vector<64x128xf32> to vector<8x8x128xf32>
    %58 = vector.shape_cast %57 : vector<8x8x128xf32> to vector<1x8x8x128xf32>
    %c0_46 = arith.constant 0 : index
    %c0_47 = arith.constant 0 : index
    %c0_48 = arith.constant 0 : index
    %c0_49 = arith.constant 0 : index
    %59 = vector.load %arg3[%c0_46, %c0_47, %c0_48, %c0_49] : memref<1x8x8x128xf32, #tpu.memory_space<vmem>>, vector<1x8x8x128xf32>
    tpu.vector_store %arg3[%c0_46, %c0_47, %c0_48, %c0_49], %58 {strides = array<i32>} : memref<1x8x8x128xf32, #tpu.memory_space<vmem>>, vector<1x8x8x128xf32>,
    return
  }
  func.func @transform_0(%arg0: i32) -> (i32, i32, i32, i32) {
    %c0_i32 = arith.constant 0 : i32
    %c0_i32_0 = arith.constant 0 : i32
    %c0_i32_1 = arith.constant 0 : i32
    %c0_i32_2 = arith.constant 0 : i32
    return %arg0, %c0_i32, %c0_i32_0, %c0_i32_1 : i32, i32, i32, i32
  }
  func.func @transform_1(%arg0: i32) -> (i32, i32, i32, i32) {
    %c0_i32 = arith.constant 0 : i32
    %c0_i32_0 = arith.constant 0 : i32
    %c0_i32_1 = arith.constant 0 : i32
    %c0_i32_2 = arith.constant 0 : i32
    %c0_i32_3 = arith.constant 0 : i32
    return %c0_i32, %c0_i32_0, %c0_i32_1, %c0_i32_2 : i32, i32, i32, i32
  }
  func.func @transform_2(%arg0: i32) -> (i32, i32, i32, i32) {
    %c0_i32 = arith.constant 0 : i32
    %c0_i32_0 = arith.constant 0 : i32
    %c0_i32_1 = arith.constant 0 : i32
    %c0_i32_2 = arith.constant 0 : i32
    return %arg0, %c0_i32, %c0_i32_0, %c0_i32_1 : i32, i32, i32, i32
  }
}

module attributes {stable_mosaic.version = 11 : i64} {
  func.func @_bn_apply_relu_kernel(%arg0: i32, %arg1: memref<128x128xf32, #tpu.memory_space<vmem>>, %arg2: memref<1x128xf32, #tpu.memory_space<vmem>>, %arg3: memref<1x128xf32, #tpu.memory_space<vmem>>, %arg4: memref<128x128xf32, #tpu.memory_space<vmem>>) attributes {dimension_semantics = [#tpu.dimension_semantics<parallel>], iteration_bounds = array<i64: 1>, scalar_prefetch = 0 : i64, scratch_operands = 0 : i64, tpu.core_type = #tpu.core_type<tc>, window_params = [{transform_indices = @transform_0, window_bounds = array<i64: 128, 128>}, {pipeline_mode = #tpu.pipeline_mode<synchronous>, transform_indices = @transform_1, window_bounds = array<i64: 1, 128>}, {pipeline_mode = #tpu.pipeline_mode<synchronous>, transform_indices = @transform_2, window_bounds = array<i64: 1, 128>}, {transform_indices = @transform_3, window_bounds = array<i64: 128, 128>}]} {
    %c0 = arith.constant 0 : index
    %c0_0 = arith.constant 0 : index
    %0 = vector.load %arg1[%c0, %c0_0] : memref<128x128xf32, #tpu.memory_space<vmem>>, vector<128x128xf32>
    %c0_1 = arith.constant 0 : index
    %c0_2 = arith.constant 0 : index
    %1 = vector.load %arg2[%c0_1, %c0_2] : memref<1x128xf32, #tpu.memory_space<vmem>>, vector<1x128xf32>
    %2 = vector.broadcast %1 : vector<1x128xf32> to vector<128x128xf32>
    %3 = arith.mulf %0, %2 : vector<128x128xf32>
    %c0_3 = arith.constant 0 : index
    %c0_4 = arith.constant 0 : index
    %4 = vector.load %arg3[%c0_3, %c0_4] : memref<1x128xf32, #tpu.memory_space<vmem>>, vector<1x128xf32>
    %5 = vector.broadcast %4 : vector<1x128xf32> to vector<128x128xf32>
    %6 = arith.addf %3, %5 : vector<128x128xf32>
    %cst = arith.constant 0.000000e+00 : f32
    %7 = vector.broadcast %cst : f32 to vector<128x128xf32>
    %8 = arith.maximumf %6, %7 : vector<128x128xf32>
    %c0_5 = arith.constant 0 : index
    %c0_6 = arith.constant 0 : index
    %9 = vector.load %arg4[%c0_5, %c0_6] : memref<128x128xf32, #tpu.memory_space<vmem>>, vector<128x128xf32>
    tpu.vector_store %arg4[%c0_5, %c0_6], %8 {strides = array<i32>} : memref<128x128xf32, #tpu.memory_space<vmem>>, vector<128x128xf32>,
    return
  }
  func.func @transform_0(%arg0: i32) -> (i32, i32) {
    %c0_i32 = arith.constant 0 : i32
    %c0_i32_0 = arith.constant 0 : i32
    return %arg0, %c0_i32 : i32, i32
  }
  func.func @transform_1(%arg0: i32) -> (i32, i32) {
    %c0_i32 = arith.constant 0 : i32
    %c0_i32_0 = arith.constant 0 : i32
    %c0_i32_1 = arith.constant 0 : i32
    return %c0_i32, %c0_i32_0 : i32, i32
  }
  func.func @transform_2(%arg0: i32) -> (i32, i32) {
    %c0_i32 = arith.constant 0 : i32
    %c0_i32_0 = arith.constant 0 : i32
    %c0_i32_1 = arith.constant 0 : i32
    return %c0_i32, %c0_i32_0 : i32, i32
  }
  func.func @transform_3(%arg0: i32) -> (i32, i32) {
    %c0_i32 = arith.constant 0 : i32
    %c0_i32_0 = arith.constant 0 : i32
    return %arg0, %c0_i32 : i32, i32
  }
}

module attributes {stable_mosaic.version = 11 : i64} {
  func.func @_matmul_kernel(%arg0: i32, %arg1: i32, %arg2: i32, %arg3: memref<128x128xf32, #tpu.memory_space<vmem>>, %arg4: memref<128x128xf32, #tpu.memory_space<vmem>>, %arg5: memref<128x128xf32, #tpu.memory_space<vmem>>, %arg6: memref<128x128xf32, #tpu.memory_space<vmem>>) attributes {dimension_semantics = [#tpu.dimension_semantics<parallel>, #tpu.dimension_semantics<parallel>, #tpu.dimension_semantics<arbitrary>], iteration_bounds = array<i64: 1, 1, 1>, scalar_prefetch = 0 : i64, scratch_operands = 1 : i64, tpu.core_type = #tpu.core_type<tc>, window_params = [{transform_indices = @transform_0, window_bounds = array<i64: 128, 128>}, {transform_indices = @transform_1, window_bounds = array<i64: 128, 128>}, {transform_indices = @transform_2, window_bounds = array<i64: 128, 128>}]} {
    %c0_i32 = arith.constant 0 : i32
    %0 = arith.cmpi eq, %arg2, %c0_i32 : i32
    %1 = arith.extui %0 : i1 to i32
    %c0_i32_0 = arith.constant 0 : i32
    %2 = arith.cmpi ne, %1, %c0_i32_0 : i32
    scf.if %2 {
      %cst_10 = arith.constant 0.000000e+00 : f32
      %12 = vector.broadcast %cst_10 : f32 to vector<128x128xf32>
      %c0_11 = arith.constant 0 : index
      %c0_12 = arith.constant 0 : index
      %13 = vector.load %arg6[%c0_11, %c0_12] : memref<128x128xf32, #tpu.memory_space<vmem>>, vector<128x128xf32>
      tpu.vector_store %arg6[%c0_11, %c0_12], %12 {strides = array<i32>} : memref<128x128xf32, #tpu.memory_space<vmem>>, vector<128x128xf32>,
    } else {
    }
    %c0 = arith.constant 0 : index
    %c0_1 = arith.constant 0 : index
    %3 = vector.load %arg6[%c0, %c0_1] : memref<128x128xf32, #tpu.memory_space<vmem>>, vector<128x128xf32>
    %c0_2 = arith.constant 0 : index
    %c0_3 = arith.constant 0 : index
    %4 = vector.load %arg3[%c0_2, %c0_3] : memref<128x128xf32, #tpu.memory_space<vmem>>, vector<128x128xf32>
    %c0_4 = arith.constant 0 : index
    %c0_5 = arith.constant 0 : index
    %5 = vector.load %arg4[%c0_4, %c0_5] : memref<128x128xf32, #tpu.memory_space<vmem>>, vector<128x128xf32>
    %cst = arith.constant dense<0.000000e+00> : vector<128x128xf32>
    %6 = tpu.matmul %4, %5, %cst {dimension_numbers = #tpu.dot_dimension_numbers<[1], [0], [0], [1], [0, 0, 1, 1], [], []>} : vector<128x128xf32>, vector<128x128xf32>, vector<128x128xf32> -> vector<128x128xf32>
    %7 = arith.addf %3, %6 : vector<128x128xf32>
    %c0_6 = arith.constant 0 : index
    %c0_7 = arith.constant 0 : index
    %8 = vector.load %arg6[%c0_6, %c0_7] : memref<128x128xf32, #tpu.memory_space<vmem>>, vector<128x128xf32>
    tpu.vector_store %arg6[%c0_6, %c0_7], %7 {strides = array<i32>} : memref<128x128xf32, #tpu.memory_space<vmem>>, vector<128x128xf32>,
    %c0_i32_8 = arith.constant 0 : i32
    %9 = arith.cmpi eq, %arg2, %c0_i32_8 : i32
    %10 = arith.extui %9 : i1 to i32
    %c0_i32_9 = arith.constant 0 : i32
    %11 = arith.cmpi ne, %10, %c0_i32_9 : i32
    scf.if %11 {
      %c0_10 = arith.constant 0 : index
      %c0_11 = arith.constant 0 : index
      %12 = vector.load %arg6[%c0_10, %c0_11] : memref<128x128xf32, #tpu.memory_space<vmem>>, vector<128x128xf32>
      %c0_12 = arith.constant 0 : index
      %c0_13 = arith.constant 0 : index
      %13 = vector.load %arg5[%c0_12, %c0_13] : memref<128x128xf32, #tpu.memory_space<vmem>>, vector<128x128xf32>
      tpu.vector_store %arg5[%c0_12, %c0_13], %12 {strides = array<i32>} : memref<128x128xf32, #tpu.memory_space<vmem>>, vector<128x128xf32>,
    } else {
    }
    return
  }
  func.func @transform_0(%arg0: i32, %arg1: i32, %arg2: i32) -> (i32, i32) {
    %c0_i32 = arith.constant 0 : i32
    return %arg0, %arg2 : i32, i32
  }
  func.func @transform_1(%arg0: i32, %arg1: i32, %arg2: i32) -> (i32, i32) {
    %c0_i32 = arith.constant 0 : i32
    return %arg2, %arg1 : i32, i32
  }
  func.func @transform_2(%arg0: i32, %arg1: i32, %arg2: i32) -> (i32, i32) {
    %c0_i32 = arith.constant 0 : i32
    return %arg0, %arg1 : i32, i32
  }
}

module attributes {stable_mosaic.version = 11 : i64} {
  func.func @kernel(%arg0: i32, %arg1: memref<1x10x10x128xf32, #tpu.memory_space<vmem>>, %arg2: memref<3x3x128x128xf32, #tpu.memory_space<vmem>>, %arg3: memref<1x8x8x128xf32, #tpu.memory_space<vmem>>, %arg4: memref<1x8x8x128xf32, #tpu.memory_space<vmem>>) attributes {dimension_semantics = [#tpu.dimension_semantics<parallel>], iteration_bounds = array<i64: 2>, scalar_prefetch = 0 : i64, scratch_operands = 0 : i64, tpu.core_type = #tpu.core_type<tc>, window_params = [{transform_indices = @transform_0, window_bounds = array<i64: 1, 10, 10, 128>}, {pipeline_mode = #tpu.pipeline_mode<synchronous>, transform_indices = @transform_1, window_bounds = array<i64: 3, 3, 128, 128>}, {transform_indices = @transform_2, window_bounds = array<i64: 1, 8, 8, 128>}, {transform_indices = @transform_3, window_bounds = array<i64: 1, 8, 8, 128>}]} {
    %c0 = arith.constant 0 : index
    %c0_0 = arith.constant 0 : index
    %c0_1 = arith.constant 0 : index
    %c0_2 = arith.constant 0 : index
    %0 = vector.load %arg1[%c0, %c0_0, %c0_1, %c0_2] : memref<1x10x10x128xf32, #tpu.memory_space<vmem>>, vector<1x10x10x128xf32>
    %1 = vector.shape_cast %0 : vector<1x10x10x128xf32> to vector<10x10x128xf32>
    %cst = arith.constant 0.000000e+00 : f32
    %2 = vector.broadcast %cst : f32 to vector<64x128xf32>
    %3 = vector.extract_strided_slice %1 {offsets = [0, 0, 0], sizes = [8, 8, 128], strides = [1, 1, 1]} : vector<10x10x128xf32> to vector<8x8x128xf32>
    %4 = vector.shape_cast %3 : vector<8x8x128xf32> to vector<64x128xf32>
    %c0_3 = arith.constant 0 : index
    %c0_4 = arith.constant 0 : index
    %c0_5 = arith.constant 0 : index
    %c0_6 = arith.constant 0 : index
    %5 = vector.load %arg2[%c0_3, %c0_4, %c0_5, %c0_6] : memref<3x3x128x128xf32, #tpu.memory_space<vmem>>, vector<1x1x128x128xf32>
    %6 = vector.shape_cast %5 : vector<1x1x128x128xf32> to vector<128x128xf32>
    %cst_7 = arith.constant dense<0.000000e+00> : vector<64x128xf32>
    %7 = tpu.matmul %4, %6, %cst_7 {dimension_numbers = #tpu.dot_dimension_numbers<[1], [0], [0], [1], [0, 0, 1, 1], [], []>} : vector<64x128xf32>, vector<128x128xf32>, vector<64x128xf32> -> vector<64x128xf32>
    %8 = arith.addf %2, %7 : vector<64x128xf32>
    %9 = vector.extract_strided_slice %1 {offsets = [0, 1, 0], sizes = [8, 8, 128], strides = [1, 1, 1]} : vector<10x10x128xf32> to vector<8x8x128xf32>
    %10 = vector.shape_cast %9 : vector<8x8x128xf32> to vector<64x128xf32>
    %c0_8 = arith.constant 0 : index
    %c1 = arith.constant 1 : index
    %c0_9 = arith.constant 0 : index
    %c0_10 = arith.constant 0 : index
    %11 = vector.load %arg2[%c0_8, %c1, %c0_9, %c0_10] : memref<3x3x128x128xf32, #tpu.memory_space<vmem>>, vector<1x1x128x128xf32>
    %12 = vector.shape_cast %11 : vector<1x1x128x128xf32> to vector<128x128xf32>
    %cst_11 = arith.constant dense<0.000000e+00> : vector<64x128xf32>
    %13 = tpu.matmul %10, %12, %cst_11 {dimension_numbers = #tpu.dot_dimension_numbers<[1], [0], [0], [1], [0, 0, 1, 1], [], []>} : vector<64x128xf32>, vector<128x128xf32>, vector<64x128xf32> -> vector<64x128xf32>
    %14 = arith.addf %8, %13 : vector<64x128xf32>
    %15 = vector.extract_strided_slice %1 {offsets = [0, 2, 0], sizes = [8, 8, 128], strides = [1, 1, 1]} : vector<10x10x128xf32> to vector<8x8x128xf32>
    %16 = vector.shape_cast %15 : vector<8x8x128xf32> to vector<64x128xf32>
    %c0_12 = arith.constant 0 : index
    %c2 = arith.constant 2 : index
    %c0_13 = arith.constant 0 : index
    %c0_14 = arith.constant 0 : index
    %17 = vector.load %arg2[%c0_12, %c2, %c0_13, %c0_14] : memref<3x3x128x128xf32, #tpu.memory_space<vmem>>, vector<1x1x128x128xf32>
    %18 = vector.shape_cast %17 : vector<1x1x128x128xf32> to vector<128x128xf32>
    %cst_15 = arith.constant dense<0.000000e+00> : vector<64x128xf32>
    %19 = tpu.matmul %16, %18, %cst_15 {dimension_numbers = #tpu.dot_dimension_numbers<[1], [0], [0], [1], [0, 0, 1, 1], [], []>} : vector<64x128xf32>, vector<128x128xf32>, vector<64x128xf32> -> vector<64x128xf32>
    %20 = arith.addf %14, %19 : vector<64x128xf32>
    %21 = vector.extract_strided_slice %1 {offsets = [1, 0, 0], sizes = [8, 8, 128], strides = [1, 1, 1]} : vector<10x10x128xf32> to vector<8x8x128xf32>
    %22 = vector.shape_cast %21 : vector<8x8x128xf32> to vector<64x128xf32>
    %c1_16 = arith.constant 1 : index
    %c0_17 = arith.constant 0 : index
    %c0_18 = arith.constant 0 : index
    %c0_19 = arith.constant 0 : index
    %23 = vector.load %arg2[%c1_16, %c0_17, %c0_18, %c0_19] : memref<3x3x128x128xf32, #tpu.memory_space<vmem>>, vector<1x1x128x128xf32>
    %24 = vector.shape_cast %23 : vector<1x1x128x128xf32> to vector<128x128xf32>
    %cst_20 = arith.constant dense<0.000000e+00> : vector<64x128xf32>
    %25 = tpu.matmul %22, %24, %cst_20 {dimension_numbers = #tpu.dot_dimension_numbers<[1], [0], [0], [1], [0, 0, 1, 1], [], []>} : vector<64x128xf32>, vector<128x128xf32>, vector<64x128xf32> -> vector<64x128xf32>
    %26 = arith.addf %20, %25 : vector<64x128xf32>
    %27 = vector.extract_strided_slice %1 {offsets = [1, 1, 0], sizes = [8, 8, 128], strides = [1, 1, 1]} : vector<10x10x128xf32> to vector<8x8x128xf32>
    %28 = vector.shape_cast %27 : vector<8x8x128xf32> to vector<64x128xf32>
    %c1_21 = arith.constant 1 : index
    %c1_22 = arith.constant 1 : index
    %c0_23 = arith.constant 0 : index
    %c0_24 = arith.constant 0 : index
    %29 = vector.load %arg2[%c1_21, %c1_22, %c0_23, %c0_24] : memref<3x3x128x128xf32, #tpu.memory_space<vmem>>, vector<1x1x128x128xf32>
    %30 = vector.shape_cast %29 : vector<1x1x128x128xf32> to vector<128x128xf32>
    %cst_25 = arith.constant dense<0.000000e+00> : vector<64x128xf32>
    %31 = tpu.matmul %28, %30, %cst_25 {dimension_numbers = #tpu.dot_dimension_numbers<[1], [0], [0], [1], [0, 0, 1, 1], [], []>} : vector<64x128xf32>, vector<128x128xf32>, vector<64x128xf32> -> vector<64x128xf32>
    %32 = arith.addf %26, %31 : vector<64x128xf32>
    %33 = vector.extract_strided_slice %1 {offsets = [1, 2, 0], sizes = [8, 8, 128], strides = [1, 1, 1]} : vector<10x10x128xf32> to vector<8x8x128xf32>
    %34 = vector.shape_cast %33 : vector<8x8x128xf32> to vector<64x128xf32>
    %c1_26 = arith.constant 1 : index
    %c2_27 = arith.constant 2 : index
    %c0_28 = arith.constant 0 : index
    %c0_29 = arith.constant 0 : index
    %35 = vector.load %arg2[%c1_26, %c2_27, %c0_28, %c0_29] : memref<3x3x128x128xf32, #tpu.memory_space<vmem>>, vector<1x1x128x128xf32>
    %36 = vector.shape_cast %35 : vector<1x1x128x128xf32> to vector<128x128xf32>
    %cst_30 = arith.constant dense<0.000000e+00> : vector<64x128xf32>
    %37 = tpu.matmul %34, %36, %cst_30 {dimension_numbers = #tpu.dot_dimension_numbers<[1], [0], [0], [1], [0, 0, 1, 1], [], []>} : vector<64x128xf32>, vector<128x128xf32>, vector<64x128xf32> -> vector<64x128xf32>
    %38 = arith.addf %32, %37 : vector<64x128xf32>
    %39 = vector.extract_strided_slice %1 {offsets = [2, 0, 0], sizes = [8, 8, 128], strides = [1, 1, 1]} : vector<10x10x128xf32> to vector<8x8x128xf32>
    %40 = vector.shape_cast %39 : vector<8x8x128xf32> to vector<64x128xf32>
    %c2_31 = arith.constant 2 : index
    %c0_32 = arith.constant 0 : index
    %c0_33 = arith.constant 0 : index
    %c0_34 = arith.constant 0 : index
    %41 = vector.load %arg2[%c2_31, %c0_32, %c0_33, %c0_34] : memref<3x3x128x128xf32, #tpu.memory_space<vmem>>, vector<1x1x128x128xf32>
    %42 = vector.shape_cast %41 : vector<1x1x128x128xf32> to vector<128x128xf32>
    %cst_35 = arith.constant dense<0.000000e+00> : vector<64x128xf32>
    %43 = tpu.matmul %40, %42, %cst_35 {dimension_numbers = #tpu.dot_dimension_numbers<[1], [0], [0], [1], [0, 0, 1, 1], [], []>} : vector<64x128xf32>, vector<128x128xf32>, vector<64x128xf32> -> vector<64x128xf32>
    %44 = arith.addf %38, %43 : vector<64x128xf32>
    %45 = vector.extract_strided_slice %1 {offsets = [2, 1, 0], sizes = [8, 8, 128], strides = [1, 1, 1]} : vector<10x10x128xf32> to vector<8x8x128xf32>
    %46 = vector.shape_cast %45 : vector<8x8x128xf32> to vector<64x128xf32>
    %c2_36 = arith.constant 2 : index
    %c1_37 = arith.constant 1 : index
    %c0_38 = arith.constant 0 : index
    %c0_39 = arith.constant 0 : index
    %47 = vector.load %arg2[%c2_36, %c1_37, %c0_38, %c0_39] : memref<3x3x128x128xf32, #tpu.memory_space<vmem>>, vector<1x1x128x128xf32>
    %48 = vector.shape_cast %47 : vector<1x1x128x128xf32> to vector<128x128xf32>
    %cst_40 = arith.constant dense<0.000000e+00> : vector<64x128xf32>
    %49 = tpu.matmul %46, %48, %cst_40 {dimension_numbers = #tpu.dot_dimension_numbers<[1], [0], [0], [1], [0, 0, 1, 1], [], []>} : vector<64x128xf32>, vector<128x128xf32>, vector<64x128xf32> -> vector<64x128xf32>
    %50 = arith.addf %44, %49 : vector<64x128xf32>
    %51 = vector.extract_strided_slice %1 {offsets = [2, 2, 0], sizes = [8, 8, 128], strides = [1, 1, 1]} : vector<10x10x128xf32> to vector<8x8x128xf32>
    %52 = vector.shape_cast %51 : vector<8x8x128xf32> to vector<64x128xf32>
    %c2_41 = arith.constant 2 : index
    %c2_42 = arith.constant 2 : index
    %c0_43 = arith.constant 0 : index
    %c0_44 = arith.constant 0 : index
    %53 = vector.load %arg2[%c2_41, %c2_42, %c0_43, %c0_44] : memref<3x3x128x128xf32, #tpu.memory_space<vmem>>, vector<1x1x128x128xf32>
    %54 = vector.shape_cast %53 : vector<1x1x128x128xf32> to vector<128x128xf32>
    %cst_45 = arith.constant dense<0.000000e+00> : vector<64x128xf32>
    %55 = tpu.matmul %52, %54, %cst_45 {dimension_numbers = #tpu.dot_dimension_numbers<[1], [0], [0], [1], [0, 0, 1, 1], [], []>} : vector<64x128xf32>, vector<128x128xf32>, vector<64x128xf32> -> vector<64x128xf32>
    %56 = arith.addf %50, %55 : vector<64x128xf32>
    %57 = vector.shape_cast %56 : vector<64x128xf32> to vector<8x8x128xf32>
    %c0_46 = arith.constant 0 : index
    %c0_47 = arith.constant 0 : index
    %c0_48 = arith.constant 0 : index
    %c0_49 = arith.constant 0 : index
    %58 = vector.load %arg3[%c0_46, %c0_47, %c0_48, %c0_49] : memref<1x8x8x128xf32, #tpu.memory_space<vmem>>, vector<1x8x8x128xf32>
    %59 = vector.shape_cast %58 : vector<1x8x8x128xf32> to vector<8x8x128xf32>
    %60 = arith.addf %57, %59 : vector<8x8x128xf32>
    %61 = vector.shape_cast %60 : vector<8x8x128xf32> to vector<1x8x8x128xf32>
    %c0_50 = arith.constant 0 : index
    %c0_51 = arith.constant 0 : index
    %c0_52 = arith.constant 0 : index
    %c0_53 = arith.constant 0 : index
    %62 = vector.load %arg4[%c0_50, %c0_51, %c0_52, %c0_53] : memref<1x8x8x128xf32, #tpu.memory_space<vmem>>, vector<1x8x8x128xf32>
    tpu.vector_store %arg4[%c0_50, %c0_51, %c0_52, %c0_53], %61 {strides = array<i32>} : memref<1x8x8x128xf32, #tpu.memory_space<vmem>>, vector<1x8x8x128xf32>,
    return
  }
  func.func @transform_0(%arg0: i32) -> (i32, i32, i32, i32) {
    %c0_i32 = arith.constant 0 : i32
    %c0_i32_0 = arith.constant 0 : i32
    %c0_i32_1 = arith.constant 0 : i32
    %c0_i32_2 = arith.constant 0 : i32
    return %arg0, %c0_i32, %c0_i32_0, %c0_i32_1 : i32, i32, i32, i32
  }
  func.func @transform_1(%arg0: i32) -> (i32, i32, i32, i32) {
    %c0_i32 = arith.constant 0 : i32
    %c0_i32_0 = arith.constant 0 : i32
    %c0_i32_1 = arith.constant 0 : i32
    %c0_i32_2 = arith.constant 0 : i32
    %c0_i32_3 = arith.constant 0 : i32
    return %c0_i32, %c0_i32_0, %c0_i32_1, %c0_i32_2 : i32, i32, i32, i32
  }
  func.func @transform_2(%arg0: i32) -> (i32, i32, i32, i32) {
    %c0_i32 = arith.constant 0 : i32
    %c0_i32_0 = arith.constant 0 : i32
    %c0_i32_1 = arith.constant 0 : i32
    %c0_i32_2 = arith.constant 0 : i32
    return %arg0, %c0_i32, %c0_i32_0, %c0_i32_1 : i32, i32, i32, i32
  }
  func.func @transform_3(%arg0: i32) -> (i32, i32, i32, i32) {
    %c0_i32 = arith.constant 0 : i32
    %c0_i32_0 = arith.constant 0 : i32
    %c0_i32_1 = arith.constant 0 : i32
    %c0_i32_2 = arith.constant 0 : i32
    return %arg0, %c0_i32, %c0_i32_0, %c0_i32_1 : i32, i32, i32, i32
  }
}

</mosaic_0001>

<bundles_post_ra>
// kernel: preact_block_forward.7
= control target key start
LH: loop header
LB: loop body
LE: loop exit
PB: predicated region body
PF: predicated region fallthrough
CT: control target
= control target key end

     0   :  { %v289_v0 = vmov 0.0   ;;  %vm280_vm0 = vcmask 1040384   ;;  %s501_s0 = inlined_call_operand.vmem [shape: f32[512,128], index: 0, kind: input, shape index: {}]   ;;  %s502_s1 = inlined_call_operand.vmem [shape: f32[2,128], index: 1, kind: output, shape index: {}]  }
   0x1   :  { %12 = vst [vmem:[%s502_s1] sm:$0x3] %v289_v0  ;;  %v13_v1 = vld [vmem:[%s501_s0] sm:$0xff]  ;;  %v14_v2 = vld [vmem:[%s501_s0 + $0x8] sm:$0xff]  ;;  %v15_v3 = vld [vmem:[%s501_s0 + $0x10] sm:$0xff] }
   0x2   :  { %v16_v4 = vld [vmem:[%s501_s0 + $0x18] sm:$0xff]  ;;  %v77_v5 = vadd.f32 %v14_v2, %v13_v1  ;;  %v146_v6 = vmul.f32 %v13_v1, %v13_v1  ;;  %v147_v7 = vmul.f32 %v14_v2, %v14_v2  ;;  %v148_v8 = vmul.f32 %v15_v3, %v15_v3  ;;  %v17_v9 = vld [vmem:[%s501_s0 + $0x20] sm:$0xff]  ;;  %v18_v13 = vld [vmem:[%s501_s0 + $0x28] sm:$0xff] }
   0x3   :  { %v149_v11 = vmul.f32 %v16_v4, %v16_v4  ;;  %v150_v15 = vmul.f32 %v17_v9, %v17_v9  ;;  %v19_v17 = vld [vmem:[%s501_s0 + $0x30] sm:$0xff]  ;;  %v151_v19 = vmul.f32 %v18_v13, %v18_v13  ;;  %v20_v21 = vld [vmem:[%s501_s0 + $0x38] sm:$0xff]  ;;  %v21_v25 = vld [vmem:[%s501_s0 + $0x40] sm:$0xff] }
   0x4   :  { %v78_v10 = vadd.f32 %v77_v5, %v15_v3  ;;  %v210_v12 = vadd.f32 %v147_v7, %v146_v6  ;;  %v152_v23 = vmul.f32 %v19_v17, %v19_v17  ;;  %v153_v27 = vmul.f32 %v20_v21, %v20_v21  ;;  %v22_v29 = vld [vmem:[%s501_s0 + $0x48] sm:$0xff]  ;;  %v23_v33 = vld [vmem:[%s501_s0 + $0x50] sm:$0xff]  ;;  %v24_v37 = vld [vmem:[%s501_s0 + $0x58] sm:$0xff] }
   0x5   :  { %v154_v31 = vmul.f32 %v21_v25, %v21_v25  ;;  %v155_v35 = vmul.f32 %v22_v29, %v22_v29  ;;  %v156_v39 = vmul.f32 %v23_v33, %v23_v33  ;;  %v25_v41 = vld [vmem:[%s501_s0 + $0x60] sm:$0xff]  ;;  %v157_v43 = vmul.f32 %v24_v37, %v24_v37  ;;  %v26_v45 = vld [vmem:[%s501_s0 + $0x68] sm:$0xff]  ;;  %v27_v49 = vld [vmem:[%s501_s0 + $0x70] sm:$0xff] }
   0x6   :  { %v79_v14 = vadd.f32 %v78_v10, %v16_v4  ;;  %v211_v16 = vadd.f32 %v210_v12, %v148_v8  ;;  %v158_v47 = vmul.f32 %v25_v41, %v25_v41  ;;  %v159_v51 = vmul.f32 %v26_v45, %v26_v45  ;;  %v28_v53 = vld [vmem:[%s501_s0 + $0x78] sm:$0xff]  ;;  %v29_v57 = vld [vmem:[%s501_s0 + $0x80] sm:$0xff]  ;;  %v30_v61 = vld [vmem:[%s501_s0 + $0x88] sm:$0xff] }
   0x7   :  { %v160_v55 = vmul.f32 %v27_v49, %v27_v49  ;;  %v161_v59 = vmul.f32 %v28_v53, %v28_v53  ;;  %v162_v63 = vmul.f32 %v29_v57, %v29_v57  ;;  %v31_v1 = vld [vmem:[%s501_s0 + $0x90] sm:$0xff]  ;;  %v163_v3 = vmul.f32 %v30_v61, %v30_v61  ;;  %v32_v5 = vld [vmem:[%s501_s0 + $0x98] sm:$0xff] }
   0x8   :  { %v80_v18 = vadd.f32 %v79_v14, %v17_v9  ;;  %v212_v20 = vadd.f32 %v211_v16, %v149_v11  ;;  %v164_v7 = vmul.f32 %v31_v1, %v31_v1  ;;  %v33_v9 = vld [vmem:[%s501_s0 + $0xa0] sm:$0xff]  ;;  %v165_v11 = vmul.f32 %v32_v5, %v32_v5 }
   0xa   :  { %v81_v22 = vadd.f32 %v80_v18, %v18_v13  ;;  %v213_v24 = vadd.f32 %v212_v20, %v150_v15  ;;  %v34_v13 = vld [vmem:[%s501_s0 + $0xa8] sm:$0xff]  ;;  %v166_v15 = vmul.f32 %v33_v9, %v33_v9 }
   0xc   :  { %v82_v26 = vadd.f32 %v81_v22, %v19_v17  ;;  %v214_v28 = vadd.f32 %v213_v24, %v151_v19  ;;  %v35_v17 = vld [vmem:[%s501_s0 + $0xb0] sm:$0xff]  ;;  %v167_v19 = vmul.f32 %v34_v13, %v34_v13 }
   0xe   :  { %v83_v30 = vadd.f32 %v82_v26, %v20_v21  ;;  %v215_v32 = vadd.f32 %v214_v28, %v152_v23  ;;  %v36_v21 = vld [vmem:[%s501_s0 + $0xb8] sm:$0xff]  ;;  %v168_v23 = vmul.f32 %v35_v17, %v35_v17 }
  0x10   :  { %v84_v34 = vadd.f32 %v83_v30, %v21_v25  ;;  %v216_v36 = vadd.f32 %v215_v32, %v153_v27  ;;  %v37_v25 = vld [vmem:[%s501_s0 + $0xc0] sm:$0xff]  ;;  %v169_v27 = vmul.f32 %v36_v21, %v36_v21 }
  0x12   :  { %v85_v38 = vadd.f32 %v84_v34, %v22_v29  ;;  %v217_v40 = vadd.f32 %v216_v36, %v154_v31  ;;  %v38_v29 = vld [vmem:[%s501_s0 + $0xc8] sm:$0xff]  ;;  %v170_v31 = vmul.f32 %v37_v25, %v37_v25 }
  0x14   :  { %v86_v42 = vadd.f32 %v85_v38, %v23_v33  ;;  %v218_v44 = vadd.f32 %v217_v40, %v155_v35  ;;  %v39_v33 = vld [vmem:[%s501_s0 + $0xd0] sm:$0xff]  ;;  %v171_v35 = vmul.f32 %v38_v29, %v38_v29 }
  0x16   :  { %v87_v46 = vadd.f32 %v86_v42, %v24_v37  ;;  %v219_v48 = vadd.f32 %v218_v44, %v156_v39  ;;  %v40_v37 = vld [vmem:[%s501_s0 + $0xd8] sm:$0xff]  ;;  %v172_v39 = vmul.f32 %v39_v33, %v39_v33 }
  0x18   :  { %v88_v50 = vadd.f32 %v87_v46, %v25_v41  ;;  %v220_v52 = vadd.f32 %v219_v48, %v157_v43  ;;  %v41_v41 = vld [vmem:[%s501_s0 + $0xe0] sm:$0xff]  ;;  %v173_v43 = vmul.f32 %v40_v37, %v40_v37 }
  0x1a   :  { %v89_v54 = vadd.f32 %v88_v50, %v26_v45  ;;  %v221_v56 = vadd.f32 %v220_v52, %v158_v47  ;;  %v42_v45 = vld [vmem:[%s501_s0 + $0xe8] sm:$0xff]  ;;  %v174_v47 = vmul.f32 %v41_v41, %v41_v41 }
  0x1c   :  { %v90_v58 = vadd.f32 %v89_v54, %v27_v49  ;;  %v222_v60 = vadd.f32 %v221_v56, %v159_v51  ;;  %v43_v49 = vld [vmem:[%s501_s0 + $0xf0] sm:$0xff]  ;;  %v175_v51 = vmul.f32 %v42_v45, %v42_v45 }
  0x1e   :  { %v91_v62 = vadd.f32 %v90_v58, %v28_v53  ;;  %v223_v0 = vadd.f32 %v222_v60, %v160_v55  ;;  %v44_v53 = vld [vmem:[%s501_s0 + $0xf8] sm:$0xff]  ;;  %v176_v55 = vmul.f32 %v43_v49, %v43_v49 }
  0x20   :  { %v92_v2 = vadd.f32 %v91_v62, %v29_v57  ;;  %v224_v4 = vadd.f32 %v223_v0, %v161_v59  ;;  %v45_v57 = vld [vmem:[%s501_s0 + $0x100] sm:$0xff]  ;;  %v177_v59 = vmul.f32 %v44_v53, %v44_v53 }
  0x22   :  { %v93_v6 = vadd.f32 %v92_v2, %v30_v61  ;;  %v225_v8 = vadd.f32 %v224_v4, %v162_v63  ;;  %v46_v61 = vld [vmem:[%s501_s0 + $0x108] sm:$0xff]  ;;  %v178_v63 = vmul.f32 %v45_v57, %v45_v57 }
  0x24   :  { %v94_v10 = vadd.f32 %v93_v6, %v31_v1  ;;  %v226_v12 = vadd.f32 %v225_v8, %v163_v3  ;;  %v47_v1 = vld [vmem:[%s501_s0 + $0x110] sm:$0xff]  ;;  %v179_v3 = vmul.f32 %v46_v61, %v46_v61 }
  0x26   :  { %v95_v14 = vadd.f32 %v94_v10, %v32_v5  ;;  %v227_v16 = vadd.f32 %v226_v12, %v164_v7  ;;  %v48_v5 = vld [vmem:[%s501_s0 + $0x118] sm:$0xff]  ;;  %v180_v7 = vmul.f32 %v47_v1, %v47_v1 }
  0x28   :  { %v96_v18 = vadd.f32 %v95_v14, %v33_v9  ;;  %v228_v20 = vadd.f32 %v227_v16, %v165_v11  ;;  %v49_v9 = vld [vmem:[%s501_s0 + $0x120] sm:$0xff]  ;;  %v181_v11 = vmul.f32 %v48_v5, %v48_v5 }
  0x2a   :  { %v97_v22 = vadd.f32 %v96_v18, %v34_v13  ;;  %v229_v24 = vadd.f32 %v228_v20, %v166_v15  ;;  %v50_v13 = vld [vmem:[%s501_s0 + $0x128] sm:$0xff]  ;;  %v182_v15 = vmul.f32 %v49_v9, %v49_v9 }
  0x2c   :  { %v98_v26 = vadd.f32 %v97_v22, %v35_v17  ;;  %v230_v28 = vadd.f32 %v229_v24, %v167_v19  ;;  %v51_v17 = vld [vmem:[%s501_s0 + $0x130] sm:$0xff]  ;;  %v183_v19 = vmul.f32 %v50_v13, %v50_v13 }
  0x2e   :  { %v99_v30 = vadd.f32 %v98_v26, %v36_v21  ;;  %v231_v32 = vadd.f32 %v230_v28, %v168_v23  ;;  %v52_v21 = vld [vmem:[%s501_s0 + $0x138] sm:$0xff]  ;;  %v184_v23 = vmul.f32 %v51_v17, %v51_v17 }
  0x30   :  { %v100_v34 = vadd.f32 %v99_v30, %v37_v25  ;;  %v232_v36 = vadd.f32 %v231_v32, %v169_v27  ;;  %v53_v25 = vld [vmem:[%s501_s0 + $0x140] sm:$0xff]  ;;  %v185_v27 = vmul.f32 %v52_v21, %v52_v21 }
  0x32   :  { %v101_v38 = vadd.f32 %v100_v34, %v38_v29  ;;  %v233_v40 = vadd.f32 %v232_v36, %v170_v31  ;;  %v54_v29 = vld [vmem:[%s501_s0 + $0x148] sm:$0xff]  ;;  %v186_v31 = vmul.f32 %v53_v25, %v53_v25 }
  0x34   :  { %v102_v42 = vadd.f32 %v101_v38, %v39_v33  ;;  %v234_v44 = vadd.f32 %v233_v40, %v171_v35  ;;  %v55_v33 = vld [vmem:[%s501_s0 + $0x150] sm:$0xff]  ;;  %v187_v35 = vmul.f32 %v54_v29, %v54_v29 }
  0x36   :  { %v103_v46 = vadd.f32 %v102_v42, %v40_v37  ;;  %v235_v48 = vadd.f32 %v234_v44, %v172_v39  ;;  %v56_v37 = vld [vmem:[%s501_s0 + $0x158] sm:$0xff]  ;;  %v188_v39 = vmul.f32 %v55_v33, %v55_v33 }
  0x38   :  { %v104_v50 = vadd.f32 %v103_v46, %v41_v41  ;;  %v236_v52 = vadd.f32 %v235_v48, %v173_v43  ;;  %v57_v41 = vld [vmem:[%s501_s0 + $0x160] sm:$0xff]  ;;  %v189_v43 = vmul.f32 %v56_v37, %v56_v37 }
  0x3a   :  { %v105_v54 = vadd.f32 %v104_v50, %v42_v45  ;;  %v237_v56 = vadd.f32 %v236_v52, %v174_v47  ;;  %v58_v45 = vld [vmem:[%s501_s0 + $0x168] sm:$0xff]  ;;  %v190_v47 = vmul.f32 %v57_v41, %v57_v41 }
  0x3c   :  { %v106_v58 = vadd.f32 %v105_v54, %v43_v49  ;;  %v238_v60 = vadd.f32 %v237_v56, %v175_v51  ;;  %v59_v49 = vld [vmem:[%s501_s0 + $0x170] sm:$0xff]  ;;  %v191_v51 = vmul.f32 %v58_v45, %v58_v45 }
  0x3e   :  { %v107_v62 = vadd.f32 %v106_v58, %v44_v53  ;;  %v239_v0 = vadd.f32 %v238_v60, %v176_v55  ;;  %v60_v53 = vld [vmem:[%s501_s0 + $0x178] sm:$0xff]  ;;  %v192_v55 = vmul.f32 %v59_v49, %v59_v49 }
  0x40   :  { %v108_v2 = vadd.f32 %v107_v62, %v45_v57  ;;  %v240_v4 = vadd.f32 %v239_v0, %v177_v59  ;;  %v61_v57 = vld [vmem:[%s501_s0 + $0x180] sm:$0xff]  ;;  %v193_v59 = vmul.f32 %v60_v53, %v60_v53 }
  0x42   :  { %v109_v6 = vadd.f32 %v108_v2, %v46_v61  ;;  %v241_v8 = vadd.f32 %v240_v4, %v178_v63  ;;  %v62_v61 = vld [vmem:[%s501_s0 + $0x188] sm:$0xff]  ;;  %v194_v63 = vmul.f32 %v61_v57, %v61_v57 }
  0x44   :  { %v110_v10 = vadd.f32 %v109_v6, %v47_v1  ;;  %v242_v12 = vadd.f32 %v241_v8, %v179_v3  ;;  %v63_v1 = vld [vmem:[%s501_s0 + $0x190] sm:$0xff]  ;;  %v195_v3 = vmul.f32 %v62_v61, %v62_v61 }
  0x46   :  { %v111_v14 = vadd.f32 %v110_v10, %v48_v5  ;;  %v243_v16 = vadd.f32 %v242_v12, %v180_v7  ;;  %v64_v5 = vld [vmem:[%s501_s0 + $0x198] sm:$0xff]  ;;  %v196_v7 = vmul.f32 %v63_v1, %v63_v1 }
  0x48   :  { %v112_v18 = vadd.f32 %v111_v14, %v49_v9  ;;  %v244_v20 = vadd.f32 %v243_v16, %v181_v11  ;;  %v65_v9 = vld [vmem:[%s501_s0 + $0x1a0] sm:$0xff]  ;;  %v197_v11 = vmul.f32 %v64_v5, %v64_v5 }
  0x4a   :  { %v113_v22 = vadd.f32 %v112_v18, %v50_v13  ;;  %v245_v24 = vadd.f32 %v244_v20, %v182_v15  ;;  %v66_v13 = vld [vmem:[%s501_s0 + $0x1a8] sm:$0xff]  ;;  %v198_v15 = vmul.f32 %v65_v9, %v65_v9 }
  0x4c   :  { %v114_v26 = vadd.f32 %v113_v22, %v51_v17  ;;  %v246_v28 = vadd.f32 %v245_v24, %v183_v19  ;;  %v67_v17 = vld [vmem:[%s501_s0 + $0x1b0] sm:$0xff]  ;;  %v199_v19 = vmul.f32 %v66_v13, %v66_v13 }
  0x4e   :  { %v115_v30 = vadd.f32 %v114_v26, %v52_v21  ;;  %v247_v32 = vadd.f32 %v246_v28, %v184_v23  ;;  %v68_v21 = vld [vmem:[%s501_s0 + $0x1b8] sm:$0xff]  ;;  %v200_v23 = vmul.f32 %v67_v17, %v67_v17 }
  0x50   :  { %v116_v34 = vadd.f32 %v115_v30, %v53_v25  ;;  %v248_v36 = vadd.f32 %v247_v32, %v185_v27  ;;  %v69_v25 = vld [vmem:[%s501_s0 + $0x1c0] sm:$0xff]  ;;  %v201_v27 = vmul.f32 %v68_v21, %v68_v21 }
  0x52   :  { %v117_v38 = vadd.f32 %v116_v34, %v54_v29  ;;  %v249_v40 = vadd.f32 %v248_v36, %v186_v31  ;;  %v70_v29 = vld [vmem:[%s501_s0 + $0x1c8] sm:$0xff]  ;;  %v202_v31 = vmul.f32 %v69_v25, %v69_v25 }
  0x54   :  { %v118_v42 = vadd.f32 %v117_v38, %v55_v33  ;;  %v250_v44 = vadd.f32 %v249_v40, %v187_v35  ;;  %v71_v33 = vld [vmem:[%s501_s0 + $0x1d0] sm:$0xff]  ;;  %v203_v35 = vmul.f32 %v70_v29, %v70_v29 }
  0x56   :  { %v119_v46 = vadd.f32 %v118_v42, %v56_v37  ;;  %v251_v48 = vadd.f32 %v250_v44, %v188_v39  ;;  %v72_v37 = vld [vmem:[%s501_s0 + $0x1d8] sm:$0xff]  ;;  %v204_v39 = vmul.f32 %v71_v33, %v71_v33 }
  0x58   :  { %v120_v50 = vadd.f32 %v119_v46, %v57_v41  ;;  %v252_v52 = vadd.f32 %v251_v48, %v189_v43  ;;  %v73_v41 = vld [vmem:[%s501_s0 + $0x1e0] sm:$0xff]  ;;  %v205_v43 = vmul.f32 %v72_v37, %v72_v37 }
  0x5a   :  { %v121_v54 = vadd.f32 %v120_v50, %v58_v45  ;;  %v253_v56 = vadd.f32 %v252_v52, %v190_v47  ;;  %v74_v45 = vld [vmem:[%s501_s0 + $0x1e8] sm:$0xff]  ;;  %v206_v47 = vmul.f32 %v73_v41, %v73_v41 }
  0x5c   :  { %v122_v58 = vadd.f32 %v121_v54, %v59_v49  ;;  %v254_v60 = vadd.f32 %v253_v56, %v191_v51  ;;  %v75_v49 = vld [vmem:[%s501_s0 + $0x1f0] sm:$0xff]  ;;  %v207_v51 = vmul.f32 %v74_v45, %v74_v45 }
  0x5e   :  { %v123_v62 = vadd.f32 %v122_v58, %v60_v53  ;;  %v255_v0 = vadd.f32 %v254_v60, %v192_v55  ;;  %v76_v53 = vld [vmem:[%s501_s0 + $0x1f8] sm:$0xff]  ;;  %v208_v55 = vmul.f32 %v75_v49, %v75_v49 }
  0x5f   :  { %v209_v58 = vmul.f32 %v76_v53, %v76_v53 }
  0x60   :  { %v124_v2 = vadd.f32 %v123_v62, %v61_v57  ;;  %v256_v4 = vadd.f32 %v255_v0, %v193_v59 }
  0x62   :  { %v125_v6 = vadd.f32 %v124_v2, %v62_v61  ;;  %v257_v8 = vadd.f32 %v256_v4, %v194_v63 }
  0x64   :  { %v126_v10 = vadd.f32 %v125_v6, %v63_v1  ;;  %v258_v12 = vadd.f32 %v257_v8, %v195_v3 }
  0x66   :  { %v127_v14 = vadd.f32 %v126_v10, %v64_v5  ;;  %v259_v16 = vadd.f32 %v258_v12, %v196_v7 }
  0x68   :  { %v128_v18 = vadd.f32 %v127_v14, %v65_v9  ;;  %v260_v20 = vadd.f32 %v259_v16, %v197_v11  ;;  %v279_v11 = vld [vmem:[%s502_s1] sm:$0x3] }
  0x6a   :  { %v129_v22 = vadd.f32 %v128_v18, %v66_v13  ;;  %v261_v24 = vadd.f32 %v260_v20, %v198_v15 }
  0x6c   :  { %v130_v26 = vadd.f32 %v129_v22, %v67_v17  ;;  %v262_v28 = vadd.f32 %v261_v24, %v199_v19 }
  0x6e   :  { %v131_v30 = vadd.f32 %v130_v26, %v68_v21  ;;  %v263_v32 = vadd.f32 %v262_v28, %v200_v23 }
  0x70   :  { %v132_v34 = vadd.f32 %v131_v30, %v69_v25  ;;  %v264_v36 = vadd.f32 %v263_v32, %v201_v27 }
  0x72   :  { %v133_v38 = vadd.f32 %v132_v34, %v70_v29  ;;  %v265_v40 = vadd.f32 %v264_v36, %v202_v31 }
  0x74   :  { %v134_v42 = vadd.f32 %v133_v38, %v71_v33  ;;  %v266_v44 = vadd.f32 %v265_v40, %v203_v35 }
  0x76   :  { %v135_v46 = vadd.f32 %v134_v42, %v72_v37  ;;  %v267_v48 = vadd.f32 %v266_v44, %v204_v39 }
  0x78   :  { %v136_v50 = vadd.f32 %v135_v46, %v73_v41  ;;  %v268_v52 = vadd.f32 %v267_v48, %v205_v43 }
  0x7a   :  { %v137_v54 = vadd.f32 %v136_v50, %v74_v45  ;;  %v269_v56 = vadd.f32 %v268_v52, %v206_v47 }
  0x7c   :  { %v138_v57 = vadd.f32 %v137_v54, %v75_v49  ;;  %v270_v59 = vadd.f32 %v269_v56, %v207_v51 }
  0x7e   :  { %v139_v60 = vadd.f32 %v138_v57, %v76_v53  ;;  %v271_v61 = vadd.f32 %v270_v59, %v208_v55 }
  0x80   :  { %v140_v62 = vrot.slane %v139_v60, 4  ;;  %v272_v63 = vadd.f32 %v271_v61, %v209_v58 }
  0x82   :  { %v141_v0 = vadd.f32 %v140_v62, %v139_v60  ;;  %v273_v1 = vrot.slane %v272_v63, 4 }
  0x84   :  { %v142_v2 = vrot.slane %v141_v0, 2  ;;  %v274_v3 = vadd.f32 %v273_v1, %v272_v63 }
  0x86   :  { %v143_v4 = vadd.f32 %v142_v2, %v141_v0  ;;  %v275_v5 = vrot.slane %v274_v3, 2 }
  0x88   :  { %v144_v6 = vrot.slane %v143_v4, 1  ;;  %v276_v7 = vadd.f32 %v275_v5, %v274_v3 }
  0x8a   :  { %v145_v8 = vadd.f32 %v144_v6, %v143_v4  ;;  %v277_v9 = vrot.slane %v276_v7, 1 }
  0x8c   :  { %v278_v10 = vadd.f32 %v277_v9, %v276_v7 }
  0x8e   :  { %v281_v12 = vsel %vm280_vm0, %v145_v8, %v278_v10 }
  0x8f   :  { %v282_v13 = vadd.f32 %v281_v12, %v279_v11 }
  0x91   :  { %283 = vst [vmem:[%s502_s1] sm:$0x3] %v282_v13 }

// kernel: preact_block_forward.8
= control target key start
LH: loop header
LB: loop body
LE: loop exit
PB: predicated region body
PF: predicated region fallthrough
CT: control target
= control target key end

     0   :  { %s896_s0 = inlined_call_operand.vmem [shape: f32[512,128], index: 0, kind: input, shape index: {}]   ;;  %s897_s1 = inlined_call_operand.vmem [shape: f32[1,128], index: 1, kind: input, shape index: {}]   ;;  %s898_s2 = inlined_call_operand.vmem [shape: f32[1,128], index: 2, kind: input, shape index: {}]   ;;  %s899_s3 = inlined_call_operand.vmem [shape: f32[512,128], index: 3, kind: output, shape index: {}]  }
   0x1   :  { %v14_v0 = vld [vmem:[%s896_s0] sm:$0xff]  ;;  %v15_v4 = vld [vmem:[%s896_s0 + $0x8] sm:$0xff]  ;;  %v16_v5 = vld [vmem:[%s896_s0 + $0x10] sm:$0xff] }
   0x2   :  { %v380_v1 = vld [vmem:[%s897_s1] ss:$0 sm:$0xff]  ;;  %v17_v6 = vld [vmem:[%s896_s0 + $0x18] sm:$0xff]  ;;  %v19_v11 = vld [vmem:[%s896_s0 + $0x28] sm:$0xff] }
   0x3   :  { %v385_v2 = vld [vmem:[%s898_s2] ss:$0 sm:$0xff]  ;;  %v85_v3 = vmul.f32 %v380_v1, %v14_v0  ;;  %v86_v7 = vmul.f32 %v380_v1, %v15_v4  ;;  %v87_v8 = vmul.f32 %v380_v1, %v16_v5  ;;  %v88_v9 = vmul.f32 %v380_v1, %v17_v6  ;;  %v20_v12 = vld [vmem:[%s896_s0 + $0x30] sm:$0xff]  ;;  %v21_v17 = vld [vmem:[%s896_s0 + $0x38] sm:$0xff] }
   0x4   :  { %v18_v10 = vld [vmem:[%s896_s0 + $0x20] sm:$0xff]  ;;  %v90_v15 = vmul.f32 %v380_v1, %v19_v11  ;;  %v91_v16 = vmul.f32 %v380_v1, %v20_v12  ;;  %v92_v21 = vmul.f32 %v380_v1, %v21_v17  ;;  %v23_v27 = vld [vmem:[%s896_s0 + $0x48] sm:$0xff]  ;;  %v24_v28 = vld [vmem:[%s896_s0 + $0x50] sm:$0xff] }
   0x5   :  { %v156_v13 = vadd.f32 %v385_v2, %v85_v3  ;;  %v89_v14 = vmul.f32 %v380_v1, %v18_v10  ;;  %v157_v18 = vadd.f32 %v385_v2, %v86_v7  ;;  %v158_v19 = vadd.f32 %v385_v2, %v87_v8  ;;  %v22_v22 = vld [vmem:[%s896_s0 + $0x40] sm:$0xff]  ;;  %v25_v29 = vld [vmem:[%s896_s0 + $0x58] sm:$0xff]  ;;  %v27_v35 = vld [vmem:[%s896_s0 + $0x68] sm:$0xff] }
   0x6   :  { %v159_v20 = vadd.f32 %v385_v2, %v88_v9  ;;  %v161_v25 = vadd.f32 %v385_v2, %v90_v15  ;;  %v162_v26 = vadd.f32 %v385_v2, %v91_v16  ;;  %v163_v33 = vadd.f32 %v385_v2, %v92_v21  ;;  %v26_v34 = vld [vmem:[%s896_s0 + $0x60] sm:$0xff]  ;;  %v28_v36 = vld [vmem:[%s896_s0 + $0x70] sm:$0xff]  ;;  %v29_v41 = vld [vmem:[%s896_s0 + $0x78] sm:$0xff] }
   0x7   :  { %v220_v23 = vmax.f32 %v156_v13, 0.0  ;;  %v160_v24 = vadd.f32 %v385_v2, %v89_v14  ;;  %v221_v30 = vmax.f32 %v157_v18, 0.0  ;;  %v222_v31 = vmax.f32 %v158_v19, 0.0  ;;  %v30_v54 = vld [vmem:[%s896_s0 + $0x80] sm:$0xff]  ;;  %v31_v59 = vld [vmem:[%s896_s0 + $0x88] sm:$0xff]  ;;  %v32_v60 = vld [vmem:[%s896_s0 + $0x90] sm:$0xff] }
   0x8   :  { %v223_v32 = vmax.f32 %v159_v20, 0.0  ;;  %v225_v38 = vmax.f32 %v161_v25, 0.0  ;;  %v226_v39 = vmax.f32 %v162_v26, 0.0  ;;  %v93_v40 = vmul.f32 %v380_v1, %v22_v22  ;;  %v33_v61 = vld [vmem:[%s896_s0 + $0x98] sm:$0xff]  ;;  %v34_v4 = vld [vmem:[%s896_s0 + $0xa0] sm:$0xff]  ;;  %v35_v5 = vld [vmem:[%s896_s0 + $0xa8] sm:$0xff] }
   0x9   :  { %284 = vst [vmem:[%s899_s3] sm:$0xff] %v220_v23  ;;  %v224_v37 = vmax.f32 %v160_v24, 0.0  ;;  %285 = vst [vmem:[%s899_s3 + $0x8] sm:$0xff] %v221_v30  ;;  %v227_v42 = vmax.f32 %v163_v33, 0.0  ;;  %v94_v43 = vmul.f32 %v380_v1, %v23_v27  ;;  %v95_v44 = vmul.f32 %v380_v1, %v24_v28  ;;  %v36_v6 = vld [vmem:[%s896_s0 + $0xb0] sm:$0xff]  ;;  %v37_v11 = vld [vmem:[%s896_s0 + $0xb8] sm:$0xff] }
   0xa   :  { %286 = vst [vmem:[%s899_s3 + $0x10] sm:$0xff] %v222_v31  ;;  %287 = vst [vmem:[%s899_s3 + $0x18] sm:$0xff] %v223_v32  ;;  %v96_v45 = vmul.f32 %v380_v1, %v25_v29  ;;  %v164_v46 = vadd.f32 %v385_v2, %v93_v40  ;;  %v97_v47 = vmul.f32 %v380_v1, %v26_v34  ;;  %v38_v24 = vld [vmem:[%s896_s0 + $0xc0] sm:$0xff]  ;;  %v39_v29 = vld [vmem:[%s896_s0 + $0xc8] sm:$0xff] }
   0xb   :  { %288 = vst [vmem:[%s899_s3 + $0x20] sm:$0xff] %v224_v37  ;;  %289 = vst [vmem:[%s899_s3 + $0x28] sm:$0xff] %v225_v38  ;;  %v98_v48 = vmul.f32 %v380_v1, %v27_v35  ;;  %v99_v49 = vmul.f32 %v380_v1, %v28_v36  ;;  %v165_v50 = vadd.f32 %v385_v2, %v94_v43  ;;  %v40_v30 = vld [vmem:[%s896_s0 + $0xd0] sm:$0xff]  ;;  %v41_v31 = vld [vmem:[%s896_s0 + $0xd8] sm:$0xff] }
   0xc   :  { %290 = vst [vmem:[%s899_s3 + $0x30] sm:$0xff] %v226_v39  ;;  %291 = vst [vmem:[%s899_s3 + $0x38] sm:$0xff] %v227_v42  ;;  %v166_v51 = vadd.f32 %v385_v2, %v95_v44  ;;  %v167_v52 = vadd.f32 %v385_v2, %v96_v45  ;;  %v100_v53 = vmul.f32 %v380_v1, %v29_v41  ;;  %v228_v55 = vmax.f32 %v164_v46, 0.0  ;;  %v42_v36 = vld [vmem:[%s896_s0 + $0xe0] sm:$0xff]  ;;  %v43_v37 = vld [vmem:[%s896_s0 + $0xe8] sm:$0xff] }
   0xd   :  { %v168_v56 = vadd.f32 %v385_v2, %v97_v47  ;;  %v169_v57 = vadd.f32 %v385_v2, %v98_v48  ;;  %v170_v58 = vadd.f32 %v385_v2, %v99_v49  ;;  %v229_v62 = vmax.f32 %v165_v50, 0.0  ;;  %v44_v38 = vld [vmem:[%s896_s0 + $0xf0] sm:$0xff]  ;;  %v45_v43 = vld [vmem:[%s896_s0 + $0xf8] sm:$0xff] }
   0xe   :  { %v230_v63 = vmax.f32 %v166_v51, 0.0  ;;  %v231_v0 = vmax.f32 %v167_v52, 0.0  ;;  %v171_v3 = vadd.f32 %v385_v2, %v100_v53  ;;  %292 = vst [vmem:[%s899_s3 + $0x40] sm:$0xff] %v228_v55  ;;  %v101_v10 = vmul.f32 %v380_v1, %v30_v54 }
   0xf   :  { %v232_v7 = vmax.f32 %v168_v56, 0.0  ;;  %v233_v8 = vmax.f32 %v169_v57, 0.0  ;;  %v234_v9 = vmax.f32 %v170_v58, 0.0  ;;  %293 = vst [vmem:[%s899_s3 + $0x48] sm:$0xff] %v229_v62  ;;  %v102_v13 = vmul.f32 %v380_v1, %v31_v59  ;;  %v46_v56 = vld [vmem:[%s896_s0 + $0x100] sm:$0xff]  ;;  %v48_v62 = vld [vmem:[%s896_s0 + $0x110] sm:$0xff] }
  0x10   :  { %294 = vst [vmem:[%s899_s3 + $0x50] sm:$0xff] %v230_v63  ;;  %295 = vst [vmem:[%s899_s3 + $0x58] sm:$0xff] %v231_v0  ;;  %v235_v12 = vmax.f32 %v171_v3, 0.0  ;;  %v103_v14 = vmul.f32 %v380_v1, %v32_v60  ;;  %v104_v15 = vmul.f32 %v380_v1, %v33_v61  ;;  %v172_v16 = vadd.f32 %v385_v2, %v101_v10  ;;  %v47_v61 = vld [vmem:[%s896_s0 + $0x108] sm:$0xff]  ;;  %v49_v63 = vld [vmem:[%s896_s0 + $0x118] sm:$0xff] }
  0x11   :  { %296 = vst [vmem:[%s899_s3 + $0x60] sm:$0xff] %v232_v7  ;;  %297 = vst [vmem:[%s899_s3 + $0x68] sm:$0xff] %v233_v8  ;;  %v105_v17 = vmul.f32 %v380_v1, %v34_v4  ;;  %v106_v18 = vmul.f32 %v380_v1, %v35_v5  ;;  %v107_v19 = vmul.f32 %v380_v1, %v36_v6  ;;  %v50_v6 = vld [vmem:[%s896_s0 + $0x120] sm:$0xff]  ;;  %v51_v7 = vld [vmem:[%s896_s0 + $0x128] sm:$0xff] }
  0x12   :  { %298 = vst [vmem:[%s899_s3 + $0x70] sm:$0xff] %v234_v9  ;;  %299 = vst [vmem:[%s899_s3 + $0x78] sm:$0xff] %v235_v12  ;;  %v173_v20 = vadd.f32 %v385_v2, %v102_v13  ;;  %v174_v21 = vadd.f32 %v385_v2, %v103_v14  ;;  %v175_v22 = vadd.f32 %v385_v2, %v104_v15  ;;  %v236_v25 = vmax.f32 %v172_v16, 0.0  ;;  %v52_v8 = vld [vmem:[%s896_s0 + $0x130] sm:$0xff]  ;;  %v53_v13 = vld [vmem:[%s896_s0 + $0x138] sm:$0xff] }
  0x13   :  { %v108_v23 = vmul.f32 %v380_v1, %v37_v11  ;;  %v176_v26 = vadd.f32 %v385_v2, %v105_v17  ;;  %v177_v27 = vadd.f32 %v385_v2, %v106_v18  ;;  %v178_v28 = vadd.f32 %v385_v2, %v107_v19 }
  0x14   :  { %v237_v32 = vmax.f32 %v173_v20, 0.0  ;;  %v238_v33 = vmax.f32 %v174_v21, 0.0  ;;  %v239_v34 = vmax.f32 %v175_v22, 0.0  ;;  %300 = vst [vmem:[%s899_s3 + $0x80] sm:$0xff] %v236_v25  ;;  %v109_v42 = vmul.f32 %v380_v1, %v38_v24 }
  0x15   :  { %v179_v35 = vadd.f32 %v385_v2, %v108_v23  ;;  %v240_v39 = vmax.f32 %v176_v26, 0.0  ;;  %v241_v40 = vmax.f32 %v177_v27, 0.0  ;;  %v242_v41 = vmax.f32 %v178_v28, 0.0  ;;  %v54_v26 = vld [vmem:[%s896_s0 + $0x140] sm:$0xff] }
  0x16   :  { %301 = vst [vmem:[%s899_s3 + $0x88] sm:$0xff] %v237_v32  ;;  %302 = vst [vmem:[%s899_s3 + $0x90] sm:$0xff] %v238_v33  ;;  %v110_v45 = vmul.f32 %v380_v1, %v39_v29  ;;  %v111_v46 = vmul.f32 %v380_v1, %v40_v30  ;;  %v112_v47 = vmul.f32 %v380_v1, %v41_v31  ;;  %v55_v31 = vld [vmem:[%s896_s0 + $0x148] sm:$0xff]  ;;  %v56_v32 = vld [vmem:[%s896_s0 + $0x150] sm:$0xff] }
  0x17   :  { %303 = vst [vmem:[%s899_s3 + $0x98] sm:$0xff] %v239_v34  ;;  %v243_v44 = vmax.f32 %v179_v35, 0.0  ;;  %304 = vst [vmem:[%s899_s3 + $0xa0] sm:$0xff] %v240_v39  ;;  %v180_v48 = vadd.f32 %v385_v2, %v109_v42  ;;  %v113_v49 = vmul.f32 %v380_v1, %v42_v36  ;;  %v114_v50 = vmul.f32 %v380_v1, %v43_v37  ;;  %v57_v33 = vld [vmem:[%s896_s0 + $0x158] sm:$0xff]  ;;  %v59_v39 = vld [vmem:[%s896_s0 + $0x168] sm:$0xff] }
  0x18   :  { %305 = vst [vmem:[%s899_s3 + $0xa8] sm:$0xff] %v241_v40  ;;  %306 = vst [vmem:[%s899_s3 + $0xb0] sm:$0xff] %v242_v41  ;;  %v115_v51 = vmul.f32 %v380_v1, %v44_v38  ;;  %v181_v52 = vadd.f32 %v385_v2, %v110_v45  ;;  %v182_v53 = vadd.f32 %v385_v2, %v111_v46  ;;  %v58_v38 = vld [vmem:[%s896_s0 + $0x160] sm:$0xff]  ;;  %v60_v40 = vld [vmem:[%s896_s0 + $0x170] sm:$0xff] }
  0x19   :  { %307 = vst [vmem:[%s899_s3 + $0xb8] sm:$0xff] %v243_v44  ;;  %v183_v54 = vadd.f32 %v385_v2, %v112_v47  ;;  %v116_v55 = vmul.f32 %v380_v1, %v45_v43  ;;  %v244_v57 = vmax.f32 %v180_v48, 0.0  ;;  %v184_v58 = vadd.f32 %v385_v2, %v113_v49  ;;  %v61_v45 = vld [vmem:[%s896_s0 + $0x178] sm:$0xff] }
  0x1a   :  { %v185_v59 = vadd.f32 %v385_v2, %v114_v50  ;;  %v186_v60 = vadd.f32 %v385_v2, %v115_v51  ;;  %v245_v0 = vmax.f32 %v181_v52, 0.0  ;;  %v246_v3 = vmax.f32 %v182_v53, 0.0 }
  0x1b   :  { %v247_v4 = vmax.f32 %v183_v54, 0.0  ;;  %v187_v5 = vadd.f32 %v385_v2, %v116_v55  ;;  %308 = vst [vmem:[%s899_s3 + $0xc0] sm:$0xff] %v244_v57  ;;  %v248_v9 = vmax.f32 %v184_v58, 0.0  ;;  %v117_v12 = vmul.f32 %v380_v1, %v46_v56  ;;  %v62_v58 = vld [vmem:[%s896_s0 + $0x180] sm:$0xff] }
  0x1c   :  { %v249_v10 = vmax.f32 %v185_v59, 0.0  ;;  %v250_v11 = vmax.f32 %v186_v60, 0.0  ;;  %309 = vst [vmem:[%s899_s3 + $0xc8] sm:$0xff] %v245_v0  ;;  %310 = vst [vmem:[%s899_s3 + $0xd0] sm:$0xff] %v246_v3  ;;  %v118_v15 = vmul.f32 %v380_v1, %v47_v61  ;;  %v119_v16 = vmul.f32 %v380_v1, %v48_v62  ;;  %v64_v0 = vld [vmem:[%s896_s0 + $0x190] sm:$0xff]  ;;  %v65_v3 = vld [vmem:[%s896_s0 + $0x198] sm:$0xff] }
  0x1d   :  { %311 = vst [vmem:[%s899_s3 + $0xd8] sm:$0xff] %v247_v4  ;;  %v251_v14 = vmax.f32 %v187_v5, 0.0  ;;  %v120_v17 = vmul.f32 %v380_v1, %v49_v63  ;;  %312 = vst [vmem:[%s899_s3 + $0xe0] sm:$0xff] %v248_v9  ;;  %v188_v18 = vadd.f32 %v385_v2, %v117_v12  ;;  %v121_v19 = vmul.f32 %v380_v1, %v50_v6  ;;  %v63_v63 = vld [vmem:[%s896_s0 + $0x188] sm:$0xff] }
  0x1e   :  { %313 = vst [vmem:[%s899_s3 + $0xe8] sm:$0xff] %v249_v10  ;;  %314 = vst [vmem:[%s899_s3 + $0xf0] sm:$0xff] %v250_v11  ;;  %v122_v20 = vmul.f32 %v380_v1, %v51_v7  ;;  %v123_v21 = vmul.f32 %v380_v1, %v52_v8  ;;  %v189_v22 = vadd.f32 %v385_v2, %v118_v15  ;;  %v66_v8 = vld [vmem:[%s896_s0 + $0x1a0] sm:$0xff]  ;;  %v67_v9 = vld [vmem:[%s896_s0 + $0x1a8] sm:$0xff] }
  0x1f   :  { %315 = vst [vmem:[%s899_s3 + $0xf8] sm:$0xff] %v251_v14  ;;  %v190_v23 = vadd.f32 %v385_v2, %v119_v16  ;;  %v191_v24 = vadd.f32 %v385_v2, %v120_v17  ;;  %v124_v25 = vmul.f32 %v380_v1, %v53_v13  ;;  %v252_v27 = vmax.f32 %v188_v18, 0.0  ;;  %v68_v10 = vld [vmem:[%s896_s0 + $0x1b0] sm:$0xff]  ;;  %v69_v15 = vld [vmem:[%s896_s0 + $0x1b8] sm:$0xff] }
  0x20   :  { %v192_v28 = vadd.f32 %v385_v2, %v121_v19  ;;  %v193_v29 = vadd.f32 %v385_v2, %v122_v20  ;;  %v194_v30 = vadd.f32 %v385_v2, %v123_v21  ;;  %v253_v34 = vmax.f32 %v189_v22, 0.0 }
  0x21   :  { %v254_v35 = vmax.f32 %v190_v23, 0.0  ;;  %v255_v36 = vmax.f32 %v191_v24, 0.0  ;;  %v195_v37 = vadd.f32 %v385_v2, %v124_v25  ;;  %316 = vst [vmem:[%s899_s3 + $0x100] sm:$0xff] %v252_v27  ;;  %v125_v44 = vmul.f32 %v380_v1, %v54_v26 }
  0x22   :  { %v256_v41 = vmax.f32 %v192_v28, 0.0  ;;  %v257_v42 = vmax.f32 %v193_v29, 0.0  ;;  %v258_v43 = vmax.f32 %v194_v30, 0.0  ;;  %317 = vst [vmem:[%s899_s3 + $0x108] sm:$0xff] %v253_v34  ;;  %v126_v47 = vmul.f32 %v380_v1, %v55_v31  ;;  %v70_v28 = vld [vmem:[%s896_s0 + $0x1c0] sm:$0xff]  ;;  %v72_v34 = vld [vmem:[%s896_s0 + $0x1d0] sm:$0xff] }
  0x23   :  { %318 = vst [vmem:[%s899_s3 + $0x110] sm:$0xff] %v254_v35  ;;  %319 = vst [vmem:[%s899_s3 + $0x118] sm:$0xff] %v255_v36  ;;  %v259_v46 = vmax.f32 %v195_v37, 0.0  ;;  %v127_v48 = vmul.f32 %v380_v1, %v56_v32  ;;  %v128_v49 = vmul.f32 %v380_v1, %v57_v33  ;;  %v196_v50 = vadd.f32 %v385_v2, %v125_v44  ;;  %v71_v33 = vld [vmem:[%s896_s0 + $0x1c8] sm:$0xff]  ;;  %v73_v35 = vld [vmem:[%s896_s0 + $0x1d8] sm:$0xff] }
  0x24   :  { %320 = vst [vmem:[%s899_s3 + $0x120] sm:$0xff] %v256_v41  ;;  %321 = vst [vmem:[%s899_s3 + $0x128] sm:$0xff] %v257_v42  ;;  %v129_v51 = vmul.f32 %v380_v1, %v58_v38  ;;  %v130_v52 = vmul.f32 %v380_v1, %v59_v39  ;;  %v131_v53 = vmul.f32 %v380_v1, %v60_v40  ;;  %v74_v40 = vld [vmem:[%s896_s0 + $0x1e0] sm:$0xff]  ;;  %v75_v41 = vld [vmem:[%s896_s0 + $0x1e8] sm:$0xff] }
  0x25   :  { %322 = vst [vmem:[%s899_s3 + $0x130] sm:$0xff] %v258_v43  ;;  %323 = vst [vmem:[%s899_s3 + $0x138] sm:$0xff] %v259_v46  ;;  %v197_v54 = vadd.f32 %v385_v2, %v126_v47  ;;  %v198_v55 = vadd.f32 %v385_v2, %v127_v48  ;;  %v199_v56 = vadd.f32 %v385_v2, %v128_v49  ;;  %v260_v59 = vmax.f32 %v196_v50, 0.0  ;;  %v76_v42 = vld [vmem:[%s896_s0 + $0x1f0] sm:$0xff]  ;;  %v77_v47 = vld [vmem:[%s896_s0 + $0x1f8] sm:$0xff] }
  0x26   :  { %v132_v57 = vmul.f32 %v380_v1, %v61_v45  ;;  %v200_v60 = vadd.f32 %v385_v2, %v129_v51  ;;  %v201_v61 = vadd.f32 %v385_v2, %v130_v52  ;;  %v202_v62 = vadd.f32 %v385_v2, %v131_v53 }
  0x27   :  { %v261_v4 = vmax.f32 %v197_v54, 0.0  ;;  %v262_v5 = vmax.f32 %v198_v55, 0.0  ;;  %v263_v6 = vmax.f32 %v199_v56, 0.0  ;;  %324 = vst [vmem:[%s899_s3 + $0x140] sm:$0xff] %v260_v59  ;;  %v133_v14 = vmul.f32 %v380_v1, %v62_v58 }
  0x28   :  { %v203_v7 = vadd.f32 %v385_v2, %v132_v57  ;;  %v264_v11 = vmax.f32 %v200_v60, 0.0  ;;  %v265_v12 = vmax.f32 %v201_v61, 0.0  ;;  %v266_v13 = vmax.f32 %v202_v62, 0.0 }
  0x29   :  { %325 = vst [vmem:[%s899_s3 + $0x148] sm:$0xff] %v261_v4  ;;  %326 = vst [vmem:[%s899_s3 + $0x150] sm:$0xff] %v262_v5  ;;  %v134_v17 = vmul.f32 %v380_v1, %v63_v63  ;;  %v135_v18 = vmul.f32 %v380_v1, %v64_v0  ;;  %v136_v19 = vmul.f32 %v380_v1, %v65_v3 }
  0x2a   :  { %327 = vst [vmem:[%s899_s3 + $0x158] sm:$0xff] %v263_v6  ;;  %v267_v16 = vmax.f32 %v203_v7, 0.0  ;;  %328 = vst [vmem:[%s899_s3 + $0x160] sm:$0xff] %v264_v11  ;;  %v204_v20 = vadd.f32 %v385_v2, %v133_v14  ;;  %v137_v21 = vmul.f32 %v380_v1, %v66_v8  ;;  %v138_v22 = vmul.f32 %v380_v1, %v67_v9 }
  0x2b   :  { %329 = vst [vmem:[%s899_s3 + $0x168] sm:$0xff] %v265_v12  ;;  %330 = vst [vmem:[%s899_s3 + $0x170] sm:$0xff] %v266_v13  ;;  %v139_v23 = vmul.f32 %v380_v1, %v68_v10  ;;  %v205_v24 = vadd.f32 %v385_v2, %v134_v17  ;;  %v206_v25 = vadd.f32 %v385_v2, %v135_v18 }
  0x2c   :  { %331 = vst [vmem:[%s899_s3 + $0x178] sm:$0xff] %v267_v16  ;;  %v207_v26 = vadd.f32 %v385_v2, %v136_v19  ;;  %v140_v27 = vmul.f32 %v380_v1, %v69_v15  ;;  %v268_v29 = vmax.f32 %v204_v20, 0.0  ;;  %v208_v30 = vadd.f32 %v385_v2, %v137_v21 }
  0x2d   :  { %v209_v31 = vadd.f32 %v385_v2, %v138_v22  ;;  %v210_v32 = vadd.f32 %v385_v2, %v139_v23  ;;  %v269_v36 = vmax.f32 %v205_v24, 0.0  ;;  %v270_v37 = vmax.f32 %v206_v25, 0.0 }
  0x2e   :  { %v271_v38 = vmax.f32 %v207_v26, 0.0  ;;  %v211_v39 = vadd.f32 %v385_v2, %v140_v27  ;;  %332 = vst [vmem:[%s899_s3 + $0x180] sm:$0xff] %v268_v29  ;;  %v272_v43 = vmax.f32 %v208_v30, 0.0  ;;  %v141_v46 = vmul.f32 %v380_v1, %v70_v28 }
  0x2f   :  { %v273_v44 = vmax.f32 %v209_v31, 0.0  ;;  %v274_v45 = vmax.f32 %v210_v32, 0.0  ;;  %333 = vst [vmem:[%s899_s3 + $0x188] sm:$0xff] %v269_v36  ;;  %334 = vst [vmem:[%s899_s3 + $0x190] sm:$0xff] %v270_v37  ;;  %v142_v49 = vmul.f32 %v380_v1, %v71_v33  ;;  %v143_v50 = vmul.f32 %v380_v1, %v72_v34 }
  0x30   :  { %335 = vst [vmem:[%s899_s3 + $0x198] sm:$0xff] %v271_v38  ;;  %v275_v48 = vmax.f32 %v211_v39, 0.0  ;;  %v144_v51 = vmul.f32 %v380_v1, %v73_v35  ;;  %336 = vst [vmem:[%s899_s3 + $0x1a0] sm:$0xff] %v272_v43  ;;  %v212_v52 = vadd.f32 %v385_v2, %v141_v46  ;;  %v145_v53 = vmul.f32 %v380_v1, %v74_v40 }
  0x31   :  { %337 = vst [vmem:[%s899_s3 + $0x1a8] sm:$0xff] %v273_v44  ;;  %338 = vst [vmem:[%s899_s3 + $0x1b0] sm:$0xff] %v274_v45  ;;  %v146_v54 = vmul.f32 %v380_v1, %v75_v41  ;;  %v147_v55 = vmul.f32 %v380_v1, %v76_v42  ;;  %v213_v56 = vadd.f32 %v385_v2, %v142_v49 }
  0x32   :  { %339 = vst [vmem:[%s899_s3 + $0x1b8] sm:$0xff] %v275_v48  ;;  %v214_v57 = vadd.f32 %v385_v2, %v143_v50  ;;  %v215_v58 = vadd.f32 %v385_v2, %v144_v51  ;;  %v148_v59 = vmul.f32 %v380_v1, %v77_v47  ;;  %v276_v60 = vmax.f32 %v212_v52, 0.0 }
  0x33   :  { %v216_v61 = vadd.f32 %v385_v2, %v145_v53  ;;  %v217_v62 = vadd.f32 %v385_v2, %v146_v54  ;;  %v218_v63 = vadd.f32 %v385_v2, %v147_v55  ;;  %v277_v0 = vmax.f32 %v213_v56, 0.0 }
  0x34   :  { %v278_v3 = vmax.f32 %v214_v57, 0.0  ;;  %v279_v4 = vmax.f32 %v215_v58, 0.0  ;;  %v219_v5 = vadd.f32 %v385_v2, %v148_v59  ;;  %340 = vst [vmem:[%s899_s3 + $0x1c0] sm:$0xff] %v276_v60 }
  0x35   :  { %v280_v6 = vmax.f32 %v216_v61, 0.0  ;;  %v281_v7 = vmax.f32 %v217_v62, 0.0  ;;  %v282_v8 = vmax.f32 %v218_v63, 0.0  ;;  %341 = vst [vmem:[%s899_s3 + $0x1c8] sm:$0xff] %v277_v0 }
  0x36   :  { %342 = vst [vmem:[%s899_s3 + $0x1d0] sm:$0xff] %v278_v3  ;;  %343 = vst [vmem:[%s899_s3 + $0x1d8] sm:$0xff] %v279_v4  ;;  %v283_v1 = vmax.f32 %v219_v5, 0.0 }
  0x37   :  { %344 = vst [vmem:[%s899_s3 + $0x1e0] sm:$0xff] %v280_v6  ;;  %345 = vst [vmem:[%s899_s3 + $0x1e8] sm:$0xff] %v281_v7 }
  0x38   :  { %346 = vst [vmem:[%s899_s3 + $0x1f0] sm:$0xff] %v282_v8  ;;  %347 = vst [vmem:[%s899_s3 + $0x1f8] sm:$0xff] %v283_v1 }

// kernel: preact_block_forward.11
= control target key start
LH: loop header
LB: loop body
LE: loop exit
PB: predicated region body
PF: predicated region fallthrough
CT: control target
= control target key end

     0   :  { %v97_v0 = vmov 0.0   ;;  %vm88_vm0 = vcmask 1040384   ;;  %s165_s1 = inlined_call_operand.vmem [shape: f32[2,128], index: 1, kind: output, shape index: {}]   ;;  %s166_s0 = inlined_call_operand.vmem [shape: f32[128,128], index: 0, kind: input, shape index: {}]  }
   0x1   :  { %12 = vst [vmem:[%s165_s1] sm:$0x3] %v97_v0  ;;  %v13_v1 = vld [vmem:[%s166_s0] sm:$0xff]  ;;  %v14_v2 = vld [vmem:[%s166_s0 + $0x8] sm:$0xff]  ;;  %v15_v3 = vld [vmem:[%s166_s0 + $0x10] sm:$0xff] }
   0x2   :  { %v16_v4 = vld [vmem:[%s166_s0 + $0x18] sm:$0xff]  ;;  %v29_v5 = vadd.f32 %v14_v2, %v13_v1  ;;  %v50_v6 = vmul.f32 %v13_v1, %v13_v1  ;;  %v51_v7 = vmul.f32 %v14_v2, %v14_v2  ;;  %v52_v8 = vmul.f32 %v15_v3, %v15_v3  ;;  %v17_v9 = vld [vmem:[%s166_s0 + $0x20] sm:$0xff]  ;;  %v18_v13 = vld [vmem:[%s166_s0 + $0x28] sm:$0xff] }
   0x3   :  { %v53_v11 = vmul.f32 %v16_v4, %v16_v4  ;;  %v54_v15 = vmul.f32 %v17_v9, %v17_v9  ;;  %v19_v17 = vld [vmem:[%s166_s0 + $0x30] sm:$0xff]  ;;  %v55_v19 = vmul.f32 %v18_v13, %v18_v13  ;;  %v20_v21 = vld [vmem:[%s166_s0 + $0x38] sm:$0xff]  ;;  %v21_v25 = vld [vmem:[%s166_s0 + $0x40] sm:$0xff] }
   0x4   :  { %v30_v10 = vadd.f32 %v29_v5, %v15_v3  ;;  %v66_v12 = vadd.f32 %v51_v7, %v50_v6  ;;  %v56_v23 = vmul.f32 %v19_v17, %v19_v17  ;;  %v57_v27 = vmul.f32 %v20_v21, %v20_v21  ;;  %v22_v29 = vld [vmem:[%s166_s0 + $0x48] sm:$0xff]  ;;  %v23_v33 = vld [vmem:[%s166_s0 + $0x50] sm:$0xff]  ;;  %v24_v37 = vld [vmem:[%s166_s0 + $0x58] sm:$0xff] }
   0x5   :  { %v58_v31 = vmul.f32 %v21_v25, %v21_v25  ;;  %v59_v35 = vmul.f32 %v22_v29, %v22_v29  ;;  %v60_v39 = vmul.f32 %v23_v33, %v23_v33  ;;  %v25_v41 = vld [vmem:[%s166_s0 + $0x60] sm:$0xff]  ;;  %v61_v43 = vmul.f32 %v24_v37, %v24_v37  ;;  %v26_v45 = vld [vmem:[%s166_s0 + $0x68] sm:$0xff]  ;;  %v27_v49 = vld [vmem:[%s166_s0 + $0x70] sm:$0xff] }
   0x6   :  { %v31_v14 = vadd.f32 %v30_v10, %v16_v4  ;;  %v67_v16 = vadd.f32 %v66_v12, %v52_v8  ;;  %v62_v47 = vmul.f32 %v25_v41, %v25_v41  ;;  %v63_v51 = vmul.f32 %v26_v45, %v26_v45  ;;  %v28_v53 = vld [vmem:[%s166_s0 + $0x78] sm:$0xff] }
   0x7   :  { %v64_v55 = vmul.f32 %v27_v49, %v27_v49  ;;  %v65_v58 = vmul.f32 %v28_v53, %v28_v53 }
   0x8   :  { %v32_v18 = vadd.f32 %v31_v14, %v17_v9  ;;  %v68_v20 = vadd.f32 %v67_v16, %v53_v11  ;;  %v87_v11 = vld [vmem:[%s165_s1] sm:$0x3] }
   0xa   :  { %v33_v22 = vadd.f32 %v32_v18, %v18_v13  ;;  %v69_v24 = vadd.f32 %v68_v20, %v54_v15 }
   0xc   :  { %v34_v26 = vadd.f32 %v33_v22, %v19_v17  ;;  %v70_v28 = vadd.f32 %v69_v24, %v55_v19 }
   0xe   :  { %v35_v30 = vadd.f32 %v34_v26, %v20_v21  ;;  %v71_v32 = vadd.f32 %v70_v28, %v56_v23 }
  0x10   :  { %v36_v34 = vadd.f32 %v35_v30, %v21_v25  ;;  %v72_v36 = vadd.f32 %v71_v32, %v57_v27 }
  0x12   :  { %v37_v38 = vadd.f32 %v36_v34, %v22_v29  ;;  %v73_v40 = vadd.f32 %v72_v36, %v58_v31 }
  0x14   :  { %v38_v42 = vadd.f32 %v37_v38, %v23_v33  ;;  %v74_v44 = vadd.f32 %v73_v40, %v59_v35 }
  0x16   :  { %v39_v46 = vadd.f32 %v38_v42, %v24_v37  ;;  %v75_v48 = vadd.f32 %v74_v44, %v60_v39 }
  0x18   :  { %v40_v50 = vadd.f32 %v39_v46, %v25_v41  ;;  %v76_v52 = vadd.f32 %v75_v48, %v61_v43 }
  0x1a   :  { %v41_v54 = vadd.f32 %v40_v50, %v26_v45  ;;  %v77_v56 = vadd.f32 %v76_v52, %v62_v47 }
  0x1c   :  { %v42_v57 = vadd.f32 %v41_v54, %v27_v49  ;;  %v78_v59 = vadd.f32 %v77_v56, %v63_v51 }
  0x1e   :  { %v43_v60 = vadd.f32 %v42_v57, %v28_v53  ;;  %v79_v61 = vadd.f32 %v78_v59, %v64_v55 }
  0x20   :  { %v44_v62 = vrot.slane %v43_v60, 4  ;;  %v80_v63 = vadd.f32 %v79_v61, %v65_v58 }
  0x22   :  { %v45_v0 = vadd.f32 %v44_v62, %v43_v60  ;;  %v81_v1 = vrot.slane %v80_v63, 4 }
  0x24   :  { %v46_v2 = vrot.slane %v45_v0, 2  ;;  %v82_v3 = vadd.f32 %v81_v1, %v80_v63 }
  0x26   :  { %v47_v4 = vadd.f32 %v46_v2, %v45_v0  ;;  %v83_v5 = vrot.slane %v82_v3, 2 }
  0x28   :  { %v48_v6 = vrot.slane %v47_v4, 1  ;;  %v84_v7 = vadd.f32 %v83_v5, %v82_v3 }
  0x2a   :  { %v49_v8 = vadd.f32 %v48_v6, %v47_v4  ;;  %v85_v9 = vrot.slane %v84_v7, 1 }
  0x2c   :  { %v86_v10 = vadd.f32 %v85_v9, %v84_v7 }
  0x2e   :  { %v89_v12 = vsel %vm88_vm0, %v49_v8, %v86_v10 }
  0x2f   :  { %v90_v13 = vadd.f32 %v89_v12, %v87_v11 }
  0x31   :  { %91 = vst [vmem:[%s165_s1] sm:$0x3] %v90_v13 }

// kernel: preact_block_forward.12
= control target key start
LH: loop header
LB: loop body
LE: loop exit
PB: predicated region body
PF: predicated region fallthrough
CT: control target
= control target key end

     0   :  { %s254_s0 = inlined_call_operand.vmem [shape: f32[128,128], index: 0, kind: input, shape index: {}]   ;;  %s255_s1 = inlined_call_operand.vmem [shape: f32[1,128], index: 1, kind: input, shape index: {}]   ;;  %s256_s2 = inlined_call_operand.vmem [shape: f32[1,128], index: 2, kind: input, shape index: {}]   ;;  %s257_s3 = inlined_call_operand.vmem [shape: f32[128,128], index: 3, kind: output, shape index: {}]  }
   0x1   :  { %v14_v0 = vld [vmem:[%s254_s0] sm:$0xff]  ;;  %v15_v4 = vld [vmem:[%s254_s0 + $0x8] sm:$0xff]  ;;  %v16_v5 = vld [vmem:[%s254_s0 + $0x10] sm:$0xff] }
   0x2   :  { %v112_v1 = vld [vmem:[%s255_s1] ss:$0 sm:$0xff]  ;;  %v17_v6 = vld [vmem:[%s254_s0 + $0x18] sm:$0xff]  ;;  %v19_v11 = vld [vmem:[%s254_s0 + $0x28] sm:$0xff] }
   0x3   :  { %v143_v2 = vld [vmem:[%s256_s2] ss:$0 sm:$0xff]  ;;  %v37_v3 = vmul.f32 %v112_v1, %v14_v0  ;;  %v38_v7 = vmul.f32 %v112_v1, %v15_v4  ;;  %v39_v8 = vmul.f32 %v112_v1, %v16_v5  ;;  %v40_v9 = vmul.f32 %v112_v1, %v17_v6  ;;  %v20_v12 = vld [vmem:[%s254_s0 + $0x30] sm:$0xff]  ;;  %v21_v17 = vld [vmem:[%s254_s0 + $0x38] sm:$0xff] }
   0x4   :  { %v18_v10 = vld [vmem:[%s254_s0 + $0x20] sm:$0xff]  ;;  %v42_v15 = vmul.f32 %v112_v1, %v19_v11  ;;  %v43_v16 = vmul.f32 %v112_v1, %v20_v12  ;;  %v44_v21 = vmul.f32 %v112_v1, %v21_v17  ;;  %v23_v27 = vld [vmem:[%s254_s0 + $0x48] sm:$0xff]  ;;  %v24_v28 = vld [vmem:[%s254_s0 + $0x50] sm:$0xff] }
   0x5   :  { %v60_v13 = vadd.f32 %v143_v2, %v37_v3  ;;  %v41_v14 = vmul.f32 %v112_v1, %v18_v10  ;;  %v61_v18 = vadd.f32 %v143_v2, %v38_v7  ;;  %v62_v19 = vadd.f32 %v143_v2, %v39_v8  ;;  %v22_v22 = vld [vmem:[%s254_s0 + $0x40] sm:$0xff]  ;;  %v25_v29 = vld [vmem:[%s254_s0 + $0x58] sm:$0xff]  ;;  %v27_v35 = vld [vmem:[%s254_s0 + $0x68] sm:$0xff] }
   0x6   :  { %v63_v20 = vadd.f32 %v143_v2, %v40_v9  ;;  %v65_v25 = vadd.f32 %v143_v2, %v42_v15  ;;  %v66_v26 = vadd.f32 %v143_v2, %v43_v16  ;;  %v67_v33 = vadd.f32 %v143_v2, %v44_v21  ;;  %v26_v34 = vld [vmem:[%s254_s0 + $0x60] sm:$0xff]  ;;  %v28_v36 = vld [vmem:[%s254_s0 + $0x70] sm:$0xff]  ;;  %v29_v41 = vld [vmem:[%s254_s0 + $0x78] sm:$0xff] }
   0x7   :  { %v76_v23 = vmax.f32 %v60_v13, 0.0  ;;  %v64_v24 = vadd.f32 %v143_v2, %v41_v14  ;;  %v77_v30 = vmax.f32 %v61_v18, 0.0  ;;  %v78_v31 = vmax.f32 %v62_v19, 0.0 }
   0x8   :  { %v79_v32 = vmax.f32 %v63_v20, 0.0  ;;  %v81_v38 = vmax.f32 %v65_v25, 0.0  ;;  %v82_v39 = vmax.f32 %v66_v26, 0.0  ;;  %v45_v40 = vmul.f32 %v112_v1, %v22_v22 }
   0x9   :  { %92 = vst [vmem:[%s257_s3] sm:$0xff] %v76_v23  ;;  %v80_v37 = vmax.f32 %v64_v24, 0.0  ;;  %93 = vst [vmem:[%s257_s3 + $0x8] sm:$0xff] %v77_v30  ;;  %v83_v42 = vmax.f32 %v67_v33, 0.0  ;;  %v46_v43 = vmul.f32 %v112_v1, %v23_v27  ;;  %v47_v44 = vmul.f32 %v112_v1, %v24_v28 }
   0xa   :  { %94 = vst [vmem:[%s257_s3 + $0x10] sm:$0xff] %v78_v31  ;;  %95 = vst [vmem:[%s257_s3 + $0x18] sm:$0xff] %v79_v32  ;;  %v48_v45 = vmul.f32 %v112_v1, %v25_v29  ;;  %v68_v46 = vadd.f32 %v143_v2, %v45_v40  ;;  %v49_v47 = vmul.f32 %v112_v1, %v26_v34 }
   0xb   :  { %96 = vst [vmem:[%s257_s3 + $0x20] sm:$0xff] %v80_v37  ;;  %97 = vst [vmem:[%s257_s3 + $0x28] sm:$0xff] %v81_v38  ;;  %v50_v48 = vmul.f32 %v112_v1, %v27_v35  ;;  %v51_v49 = vmul.f32 %v112_v1, %v28_v36  ;;  %v69_v50 = vadd.f32 %v143_v2, %v46_v43 }
   0xc   :  { %98 = vst [vmem:[%s257_s3 + $0x30] sm:$0xff] %v82_v39  ;;  %99 = vst [vmem:[%s257_s3 + $0x38] sm:$0xff] %v83_v42  ;;  %v70_v51 = vadd.f32 %v143_v2, %v47_v44  ;;  %v71_v52 = vadd.f32 %v143_v2, %v48_v45  ;;  %v52_v53 = vmul.f32 %v112_v1, %v29_v41  ;;  %v84_v54 = vmax.f32 %v68_v46, 0.0 }
   0xd   :  { %v72_v55 = vadd.f32 %v143_v2, %v49_v47  ;;  %v73_v56 = vadd.f32 %v143_v2, %v50_v48  ;;  %v74_v57 = vadd.f32 %v143_v2, %v51_v49  ;;  %v85_v58 = vmax.f32 %v69_v50, 0.0 }
   0xe   :  { %v86_v59 = vmax.f32 %v70_v51, 0.0  ;;  %v87_v60 = vmax.f32 %v71_v52, 0.0  ;;  %v75_v61 = vadd.f32 %v143_v2, %v52_v53  ;;  %100 = vst [vmem:[%s257_s3 + $0x40] sm:$0xff] %v84_v54 }
   0xf   :  { %v88_v62 = vmax.f32 %v72_v55, 0.0  ;;  %v89_v63 = vmax.f32 %v73_v56, 0.0  ;;  %v90_v0 = vmax.f32 %v74_v57, 0.0  ;;  %101 = vst [vmem:[%s257_s3 + $0x48] sm:$0xff] %v85_v58 }
  0x10   :  { %102 = vst [vmem:[%s257_s3 + $0x50] sm:$0xff] %v86_v59  ;;  %103 = vst [vmem:[%s257_s3 + $0x58] sm:$0xff] %v87_v60  ;;  %v91_v1 = vmax.f32 %v75_v61, 0.0 }
  0x11   :  { %104 = vst [vmem:[%s257_s3 + $0x60] sm:$0xff] %v88_v62  ;;  %105 = vst [vmem:[%s257_s3 + $0x68] sm:$0xff] %v89_v63 }
  0x12   :  { %106 = vst [vmem:[%s257_s3 + $0x70] sm:$0xff] %v90_v0  ;;  %107 = vst [vmem:[%s257_s3 + $0x78] sm:$0xff] %v91_v1 }

// kernel: preact_block_forward.9
= control target key start
LH: loop header
LB: loop body
LE: loop exit
PB: predicated region body
PF: predicated region fallthrough
CT: control target
= control target key end

     0   :  { %s574_s1 = inlined_call_operand.vmem [shape: f32[128,128], index: 1, kind: input, shape index: {}]   ;;  %s575_s0 = inlined_call_operand.vmem [shape: f32[128,128], index: 0, kind: input, shape index: {}]   ;;  %s576_s2 = inlined_call_operand.vmem [shape: f32[128,128], index: 2, kind: output, shape index: {}]  }
   0x1   :  { %v78_v0 = vld [vmem:[%s574_s1 + $0x78] sm:$0xff]  ;;  %v77_v1 = vld [vmem:[%s574_s1 + $0x70] sm:$0xff]  ;;  %v76_v2 = vld [vmem:[%s574_s1 + $0x68] sm:$0xff] }
   0x2   :  { %327 = vmatprep.subr.mxu0 %v78_v0  ;;  %383 = vmatprep.subr.mxu1 %v78_v0  ;;  %v75_v3 = vld [vmem:[%s574_s1 + $0x60] sm:$0xff]  ;;  %v74_v4 = vld [vmem:[%s574_s1 + $0x58] sm:$0xff]  ;;  %v73_v5 = vld [vmem:[%s574_s1 + $0x50] sm:$0xff] }
   0x3   :  { %328 = vmatpush3.msra.mxu0 %v78_v0  ;;  %399 = vmatpush3.msra.mxu1 %v78_v0  ;;  %v72_v6 = vld [vmem:[%s574_s1 + $0x48] sm:$0xff]  ;;  %v71_v7 = vld [vmem:[%s574_s1 + $0x40] sm:$0xff]  ;;  %v70_v8 = vld [vmem:[%s574_s1 + $0x38] sm:$0xff] }
   0x4   :  { %329 = vmatprep.subr.mxu0 %v77_v1  ;;  %384 = vmatprep.subr.mxu1 %v77_v1  ;;  %v69_v9 = vld [vmem:[%s574_s1 + $0x30] sm:$0xff]  ;;  %v68_v10 = vld [vmem:[%s574_s1 + $0x28] sm:$0xff]  ;;  %v67_v11 = vld [vmem:[%s574_s1 + $0x20] sm:$0xff] }
   0x5   :  { %330 = vmatpush3.msra.mxu0 %v77_v1  ;;  %400 = vmatpush3.msra.mxu1 %v77_v1  ;;  %v66_v12 = vld [vmem:[%s574_s1 + $0x18] sm:$0xff]  ;;  %v65_v13 = vld [vmem:[%s574_s1 + $0x10] sm:$0xff]  ;;  %v64_v14 = vld [vmem:[%s574_s1 + $0x8] sm:$0xff] }
   0x6   :  { %331 = vmatprep.subr.mxu0 %v76_v2  ;;  %385 = vmatprep.subr.mxu1 %v76_v2  ;;  %v63_v15 = vld [vmem:[%s574_s1] sm:$0xff]  ;;  %v48_v18 = vld [vmem:[%s575_s0 + $0x8] sm:$0xff]  ;;  %v49_v20 = vld [vmem:[%s575_s0 + $0x10] sm:$0xff] }
   0x7   :  { %332 = vmatpush3.msra.mxu0 %v76_v2  ;;  %401 = vmatpush3.msra.mxu1 %v76_v2  ;;  %v47_v16 = vld [vmem:[%s575_s0] sm:$0xff]  ;;  %v56_v19 = vld [vmem:[%s575_s0 + $0x48] sm:$0xff]  ;;  %v57_v21 = vld [vmem:[%s575_s0 + $0x50] sm:$0xff] }
   0x8   :  { %333 = vmatprep.subr.mxu0 %v75_v3  ;;  %386 = vmatprep.subr.mxu1 %v75_v3  ;;  %v55_v17 = vld [vmem:[%s575_s0 + $0x40] sm:$0xff]  ;;  %v50_v22 = vld [vmem:[%s575_s0 + $0x18] sm:$0xff]  ;;  %v52_v26 = vld [vmem:[%s575_s0 + $0x28] sm:$0xff] }
   0x9   :  { %334 = vmatpush3.msra.mxu0 %v75_v3  ;;  %402 = vmatpush3.msra.mxu1 %v75_v3  ;;  %v58_v23 = vld [vmem:[%s575_s0 + $0x58] sm:$0xff]  ;;  %v51_v24 = vld [vmem:[%s575_s0 + $0x20] sm:$0xff]  ;;  %v60_v27 = vld [vmem:[%s575_s0 + $0x68] sm:$0xff] }
   0xa   :  { %335 = vmatprep.subr.mxu0 %v74_v4  ;;  %387 = vmatprep.subr.mxu1 %v74_v4  ;;  %v59_v25 = vld [vmem:[%s575_s0 + $0x60] sm:$0xff]  ;;  %v53_v28 = vld [vmem:[%s575_s0 + $0x30] sm:$0xff]  ;;  %v54_v30 = vld [vmem:[%s575_s0 + $0x38] sm:$0xff] }
   0xb   :  { %336 = vmatpush3.msra.mxu0 %v74_v4  ;;  %403 = vmatpush3.msra.mxu1 %v74_v4  ;;  %v61_v29 = vld [vmem:[%s575_s0 + $0x70] sm:$0xff]  ;;  %v62_v31 = vld [vmem:[%s575_s0 + $0x78] sm:$0xff] }
   0xc   :  { %337 = vmatprep.subr.mxu0 %v73_v5  ;;  %388 = vmatprep.subr.mxu1 %v73_v5 }
   0xd   :  { %338 = vmatpush3.msra.mxu0 %v73_v5  ;;  %404 = vmatpush3.msra.mxu1 %v73_v5 }
   0xe   :  { %339 = vmatprep.subr.mxu0 %v72_v6  ;;  %389 = vmatprep.subr.mxu1 %v72_v6 }
   0xf   :  { %340 = vmatpush3.msra.mxu0 %v72_v6  ;;  %405 = vmatpush3.msra.mxu1 %v72_v6 }
  0x10   :  { %341 = vmatprep.subr.mxu0 %v71_v7  ;;  %390 = vmatprep.subr.mxu1 %v71_v7 }
  0x11   :  { %342 = vmatpush3.msra.mxu0 %v71_v7  ;;  %406 = vmatpush3.msra.mxu1 %v71_v7 }
  0x12   :  { %343 = vmatprep.subr.mxu0 %v70_v8  ;;  %391 = vmatprep.subr.mxu1 %v70_v8 }
  0x13   :  { %344 = vmatpush3.msra.mxu0 %v70_v8  ;;  %407 = vmatpush3.msra.mxu1 %v70_v8 }
  0x14   :  { %345 = vmatprep.subr.mxu0 %v69_v9  ;;  %392 = vmatprep.subr.mxu1 %v69_v9 }
  0x15   :  { %346 = vmatpush3.msra.mxu0 %v69_v9  ;;  %408 = vmatpush3.msra.mxu1 %v69_v9 }
  0x16   :  { %347 = vmatprep.subr.mxu0 %v68_v10  ;;  %393 = vmatprep.subr.mxu1 %v68_v10 }
  0x17   :  { %348 = vmatpush3.msra.mxu0 %v68_v10  ;;  %409 = vmatpush3.msra.mxu1 %v68_v10 }
  0x18   :  { %349 = vmatprep.subr.mxu0 %v67_v11  ;;  %394 = vmatprep.subr.mxu1 %v67_v11 }
  0x19   :  { %350 = vmatpush3.msra.mxu0 %v67_v11  ;;  %410 = vmatpush3.msra.mxu1 %v67_v11 }
  0x1a   :  { %351 = vmatprep.subr.mxu0 %v66_v12  ;;  %395 = vmatprep.subr.mxu1 %v66_v12 }
  0x1b   :  { %352 = vmatpush3.msra.mxu0 %v66_v12  ;;  %411 = vmatpush3.msra.mxu1 %v66_v12 }
  0x1c   :  { %353 = vmatprep.subr.mxu0 %v65_v13  ;;  %396 = vmatprep.subr.mxu1 %v65_v13 }
  0x1d   :  { %354 = vmatpush3.msra.mxu0 %v65_v13  ;;  %412 = vmatpush3.msra.mxu1 %v65_v13 }
  0x1e   :  { %355 = vmatprep.subr.mxu0 %v64_v14  ;;  %397 = vmatprep.subr.mxu1 %v64_v14 }
  0x1f   :  { %356 = vmatpush3.msra.mxu0 %v64_v14  ;;  %413 = vmatpush3.msra.mxu1 %v64_v14 }
  0x20   :  { %357 = vmatprep.subr.mxu0 %v63_v15  ;;  %398 = vmatprep.subr.mxu1 %v63_v15 }
  0x21   :  { %358 = vmatpush3.msra.mxu0 %v63_v15  ;;  %414 = vmatpush3.msra.mxu1 %v63_v15 }
  0x22   :  { %359 = vmatprep.mubr.f32.mxu0 %v47_v16  ;;  %371 = vmatprep.mubr.f32.mxu1 %v55_v17 }
  0x23   :  { %360 = vmatmul.mubr.f32.vlgmr.msra.gmra.mxu0 %v48_v18  ;;  %372 = vmatmul.mubr.f32.vlgmr.msra.gmra.mxu1 %v56_v19 }
  0x24   :  { %362 = vmatprep.mubr.f32.mxu0 %v49_v20  ;;  %374 = vmatprep.mubr.f32.mxu1 %v57_v21 }
  0x27   :  { %363 = vmatmul.mubr.f32.gmra.mxu0 %v50_v22  ;;  %375 = vmatmul.mubr.f32.gmra.mxu1 %v58_v23 }
  0x28   :  { %365 = vmatprep.mubr.f32.mxu0 %v51_v24  ;;  %377 = vmatprep.mubr.f32.mxu1 %v59_v25 }
  0x2b   :  { %366 = vmatmul.mubr.f32.gmra.mxu0 %v52_v26  ;;  %378 = vmatmul.mubr.f32.gmra.mxu1 %v60_v27 }
  0x2c   :  { %368 = vmatprep.mubr.f32.mxu0 %v53_v28  ;;  %380 = vmatprep.mubr.f32.mxu1 %v61_v29 }
  0x2f   :  { %369 = vmatmul.mubr.f32.gmra.mxu0 %v54_v30  ;;  %381 = vmatmul.mubr.f32.gmra.mxu1 %v62_v31 }
  0xe3   :  { %v361_v32 = vpop.f32.mrf.mxu0  ;;  %v373_v33 = vpop.f32.mrf.mxu1 }
  0xe4   :  { %276 = vst [vmem:[%s576_s2 + $0x8] sm:$0xff] %v361_v32  ;;  %284 = vst [vmem:[%s576_s2 + $0x48] sm:$0xff] %v373_v33 }
  0xe5   :  { %v145_v34 = vpop.f32.mrf.mxu0  ;;  %v185_v35 = vpop.f32.mrf.mxu1 }
  0xe6   :  { %275 = vst [vmem:[%s576_s2] sm:$0xff] %v145_v34  ;;  %283 = vst [vmem:[%s576_s2 + $0x40] sm:$0xff] %v185_v35 }
  0xe7   :  { %v364_v36 = vpop.f32.mrf.mxu0  ;;  %v376_v37 = vpop.f32.mrf.mxu1 }
  0xe8   :  { %278 = vst [vmem:[%s576_s2 + $0x18] sm:$0xff] %v364_v36  ;;  %286 = vst [vmem:[%s576_s2 + $0x58] sm:$0xff] %v376_v37 }
  0xe9   :  { %v155_v38 = vpop.f32.mrf.mxu0  ;;  %v195_v39 = vpop.f32.mrf.mxu1 }
  0xea   :  { %277 = vst [vmem:[%s576_s2 + $0x10] sm:$0xff] %v155_v38  ;;  %285 = vst [vmem:[%s576_s2 + $0x50] sm:$0xff] %v195_v39 }
  0xeb   :  { %v367_v40 = vpop.f32.mrf.mxu0  ;;  %v379_v41 = vpop.f32.mrf.mxu1 }
  0xec   :  { %280 = vst [vmem:[%s576_s2 + $0x28] sm:$0xff] %v367_v40  ;;  %288 = vst [vmem:[%s576_s2 + $0x68] sm:$0xff] %v379_v41 }
  0xed   :  { %v165_v42 = vpop.f32.mrf.mxu0  ;;  %v205_v43 = vpop.f32.mrf.mxu1 }
  0xee   :  { %279 = vst [vmem:[%s576_s2 + $0x20] sm:$0xff] %v165_v42  ;;  %287 = vst [vmem:[%s576_s2 + $0x60] sm:$0xff] %v205_v43 }
  0xef   :  { %v370_v44 = vpop.f32.mrf.mxu0  ;;  %v382_v45 = vpop.f32.mrf.mxu1 }
  0xf0   :  { %282 = vst [vmem:[%s576_s2 + $0x38] sm:$0xff] %v370_v44  ;;  %290 = vst [vmem:[%s576_s2 + $0x78] sm:$0xff] %v382_v45 }
  0xf1   :  { %v175_v46 = vpop.f32.mrf.mxu0  ;;  %v215_v47 = vpop.f32.mrf.mxu1 }
  0xf2   :  { %281 = vst [vmem:[%s576_s2 + $0x30] sm:$0xff] %v175_v46  ;;  %289 = vst [vmem:[%s576_s2 + $0x70] sm:$0xff] %v215_v47 }

// kernel: preact_block_forward.10
= control target key start
LH: loop header
LB: loop body
LE: loop exit
PB: predicated region body
PF: predicated region fallthrough
CT: control target
= control target key end

     0   :  { %s2329_s9 = smov 0   ;;  %s3002_s0 = inlined_call_operand.vmem [shape: f32[2,36,9,128], index: 0, kind: input, shape index: {}]   ;;  %s3003_s1 = inlined_call_operand.vmem [shape: f32[3,3,128,128], index: 1, kind: input, shape index: {}]   ;;  %s3004_s2 = inlined_call_operand.vmem [shape: f32[2,8,8,128], index: 2, kind: output, shape index: {}]  }
   0x1 LB: > { %s1514_s10 = sadd.s32 4294967295, %s2312_s9   ;;  %p1518_p0 = scmp.ge.s32.totalorder %s2312_s9, 1  ;;  %s2312_s9 = sphi %s2329_s9, %s12_s9  }
   0x2   : > { %p112_p1 = scmp.lt.s32.totalorder %s2312_s9, 3 }
   0x4   : > { %p113_p2 = pnand %p1518_p0, %p112_p1 }
   0x6   : > { %116 = sbr.rel (%p113_p2) target bundleno = 408 (0x198), region = 28 }
   0xb   : > { %v1537_v0 = vld [vmem:[%s3003_s1 + $0xf8] sm:$0xff]  ;;  %v1536_v2 = vld [vmem:[%s3003_s1 + $0xf0] sm:$0xff]  ;;  %v1535_v4 = vld [vmem:[%s3003_s1 + $0xe8] sm:$0xff]  ;;  %p134_p3 = scmp.lt.s32.totalorder %s1514_s10, 1  ;;  %vm454_vm0 = vcmask 1046528  }
   0xc   : > { %v210_v1 = vld [vmem:[%s3003_s1 + $0x78] sm:$0xff]  ;;  %1869 = vmatprep.subr.mxu0 %v1537_v0  ;;  %v209_v3 = vld [vmem:[%s3003_s1 + $0x70] sm:$0xff]  ;;  %v208_v5 = vld [vmem:[%s3003_s1 + $0x68] sm:$0xff] }
   0xd   : > { %1913 = vmatprep.subr.mxu1 %v210_v1  ;;  %1870 = vmatpush3.msra.mxu0 %v1537_v0  ;;  %v1534_v6 = vld [vmem:[%s3003_s1 + $0xe0] sm:$0xff]  ;;  %v1533_v8 = vld [vmem:[%s3003_s1 + $0xd8] sm:$0xff]  ;;  %v1532_v10 = vld [vmem:[%s3003_s1 + $0xd0] sm:$0xff]  ;;  %s3014_s10 = smov (!%p134_p3, %s1514_s10), 1 }
   0xe   : > { %1914 = vmatpush3.msra.mxu1 %v210_v1  ;;  %1871 = vmatprep.subr.mxu0 %v1536_v2  ;;  %v207_v7 = vld [vmem:[%s3003_s1 + $0x60] sm:$0xff]  ;;  %v206_v9 = vld [vmem:[%s3003_s1 + $0x58] sm:$0xff]  ;;  %v205_v11 = vld [vmem:[%s3003_s1 + $0x50] sm:$0xff]  ;;  %s2297_s11 = smul.u32 576, %s3014_s10  ;;  %s1652_s25 = sshll.u32 %s3014_s10, 6 }
   0xf   : > { %1915 = vmatprep.subr.mxu1 %v209_v3  ;;  %1872 = vmatpush3.msra.mxu0 %v1536_v2  ;;  %v1531_v12 = vld [vmem:[%s3003_s1 + $0xc8] sm:$0xff]  ;;  %v1530_v14 = vld [vmem:[%s3003_s1 + $0xc0] sm:$0xff]  ;;  %v1529_v16 = vld [vmem:[%s3003_s1 + $0xb8] sm:$0xff]  ;;  %s143_s28 = scalar_lea.vmem %s3004_s2, %s1652_s25 }
  0x10   : > { %1916 = vmatpush3.msra.mxu1 %v209_v3  ;;  %1873 = vmatprep.subr.mxu0 %v1535_v4  ;;  %v204_v13 = vld [vmem:[%s3003_s1 + $0x48] sm:$0xff]  ;;  %v203_v15 = vld [vmem:[%s3003_s1 + $0x40] sm:$0xff]  ;;  %v202_v17 = vld [vmem:[%s3003_s1 + $0x38] sm:$0xff]  ;;  %s2437_s22 = scalar_lea.vmem %s3002_s0, %s2297_s11 }
  0x11   : > { %1917 = vmatprep.subr.mxu1 %v208_v5  ;;  %1874 = vmatpush3.msra.mxu0 %v1535_v4  ;;  %v1528_v18 = vld [vmem:[%s3003_s1 + $0xb0] sm:$0xff]  ;;  %v1527_v20 = vld [vmem:[%s3003_s1 + $0xa8] sm:$0xff]  ;;  %v1526_v22 = vld [vmem:[%s3003_s1 + $0xa0] sm:$0xff] }
  0x12   : > { %1918 = vmatpush3.msra.mxu1 %v208_v5  ;;  %1875 = vmatprep.subr.mxu0 %v1534_v6  ;;  %v201_v19 = vld [vmem:[%s3003_s1 + $0x30] sm:$0xff]  ;;  %v200_v21 = vld [vmem:[%s3003_s1 + $0x28] sm:$0xff]  ;;  %v199_v23 = vld [vmem:[%s3003_s1 + $0x20] sm:$0xff] }
  0x13   : > { %1919 = vmatprep.subr.mxu1 %v207_v7  ;;  %1876 = vmatpush3.msra.mxu0 %v1534_v6  ;;  %v1525_v24 = vld [vmem:[%s3003_s1 + $0x98] sm:$0xff]  ;;  %v1524_v26 = vld [vmem:[%s3003_s1 + $0x90] sm:$0xff]  ;;  %v1523_v28 = vld [vmem:[%s3003_s1 + $0x88] sm:$0xff] }
  0x14   : > { %1920 = vmatpush3.msra.mxu1 %v207_v7  ;;  %1877 = vmatprep.subr.mxu0 %v1533_v8  ;;  %v198_v25 = vld [vmem:[%s3003_s1 + $0x18] sm:$0xff]  ;;  %v197_v27 = vld [vmem:[%s3003_s1 + $0x10] sm:$0xff]  ;;  %v196_v29 = vld [vmem:[%s3003_s1 + $0x8] sm:$0xff] }
  0x15   : > { %1921 = vmatprep.subr.mxu1 %v206_v9  ;;  %1878 = vmatpush3.msra.mxu0 %v1533_v8  ;;  %v1522_v30 = vld [vmem:[%s3003_s1 + $0x80] sm:$0xff]  ;;  %v162_v32 = vld [vmem:[%s2437_s22 + $0x90] sm:$0xff]  ;;  %v1553_v36 = vld [vmem:[%s3003_s1 + $0x178] sm:$0xff] }
  0x16   : > { %1922 = vmatpush3.msra.mxu1 %v206_v9  ;;  %1879 = vmatprep.subr.mxu0 %v1532_v10  ;;  %v195_v31 = vld [vmem:[%s3003_s1] sm:$0xff]  ;;  %v2453_v35 = vld [vmem:[%s2437_s22 + $0x10] sm:$0xff]  ;;  %v1569_v37 = vld [vmem:[%s3003_s1 + $0x1f8] sm:$0xff] }
  0x17   : > { %1923 = vmatprep.subr.mxu1 %v205_v11  ;;  %1880 = vmatpush3.msra.mxu0 %v1532_v10  ;;  %v2447_v33 = vld [vmem:[%s2437_s22] sm:$0xff]  ;;  %v1552_v38 = vld [vmem:[%s3003_s1 + $0x170] sm:$0xff]  ;;  %v1551_v40 = vld [vmem:[%s3003_s1 + $0x168] sm:$0xff] }
  0x18   : > { %1924 = vmatpush3.msra.mxu1 %v205_v11  ;;  %1881 = vmatprep.subr.mxu0 %v1531_v12  ;;  %v2450_v34 = vld [vmem:[%s2437_s22 + $0xa0] sm:$0xff]  ;;  %v1568_v39 = vld [vmem:[%s3003_s1 + $0x1f0] sm:$0xff]  ;;  %v1567_v41 = vld [vmem:[%s3003_s1 + $0x1e8] sm:$0xff] }
  0x19   : > { %1925 = vmatprep.subr.mxu1 %v204_v13  ;;  %1882 = vmatpush3.msra.mxu0 %v1531_v12  ;;  %v1550_v42 = vld [vmem:[%s3003_s1 + $0x160] sm:$0xff]  ;;  %v1549_v44 = vld [vmem:[%s3003_s1 + $0x158] sm:$0xff]  ;;  %v1548_v46 = vld [vmem:[%s3003_s1 + $0x150] sm:$0xff] }
  0x1a   : > { %1926 = vmatpush3.msra.mxu1 %v204_v13  ;;  %1883 = vmatprep.subr.mxu0 %v1530_v14  ;;  %v1566_v43 = vld [vmem:[%s3003_s1 + $0x1e0] sm:$0xff]  ;;  %v1565_v45 = vld [vmem:[%s3003_s1 + $0x1d8] sm:$0xff]  ;;  %v1564_v47 = vld [vmem:[%s3003_s1 + $0x1d0] sm:$0xff] }
  0x1b   : > { %1927 = vmatprep.subr.mxu1 %v203_v15  ;;  %1884 = vmatpush3.msra.mxu0 %v1530_v14  ;;  %v1547_v48 = vld [vmem:[%s3003_s1 + $0x148] sm:$0xff]  ;;  %v1546_v50 = vld [vmem:[%s3003_s1 + $0x140] sm:$0xff]  ;;  %v1545_v52 = vld [vmem:[%s3003_s1 + $0x138] sm:$0xff] }
  0x1c   : > { %1928 = vmatpush3.msra.mxu1 %v203_v15  ;;  %1885 = vmatprep.subr.mxu0 %v1529_v16  ;;  %v1563_v49 = vld [vmem:[%s3003_s1 + $0x1c8] sm:$0xff]  ;;  %v1562_v51 = vld [vmem:[%s3003_s1 + $0x1c0] sm:$0xff]  ;;  %v1561_v53 = vld [vmem:[%s3003_s1 + $0x1b8] sm:$0xff]  ;;  %v455_v15 = vrot.slane %v2447_v33, 1 }
  0x1d   : > { %1929 = vmatprep.subr.mxu1 %v202_v17  ;;  %1886 = vmatpush3.msra.mxu0 %v1529_v16  ;;  %v2513_v54 = vld [vmem:[%s2437_s22 + $0xb0] sm:$0xff]  ;;  %v2516_v55 = vld [vmem:[%s2437_s22 + $0x20] sm:$0xff]  ;;  %v1543_v60 = vld [vmem:[%s3003_s1 + $0x128] sm:$0xff] }
  0x1e   : > { %1930 = vmatpush3.msra.mxu1 %v202_v17  ;;  %1887 = vmatprep.subr.mxu0 %v1528_v18  ;;  %v1544_v56 = vld [vmem:[%s3003_s1 + $0x130] sm:$0xff]  ;;  %v2525_v58 = vld [vmem:[%s2437_s22 + $0xc0] sm:$0xff]  ;;  %v1559_v61 = vld [vmem:[%s3003_s1 + $0x1a8] sm:$0xff] }
  0x1f   : > { %1931 = vmatprep.subr.mxu1 %v201_v19  ;;  %1888 = vmatpush3.msra.mxu0 %v1528_v18  ;;  %v1560_v57 = vld [vmem:[%s3003_s1 + $0x1b0] sm:$0xff]  ;;  %v2544_v63 = vld [vmem:[%s2437_s22 + $0x40] sm:$0xff]  ;;  %v1541_v4 = vld [vmem:[%s3003_s1 + $0x118] sm:$0xff] }
  0x20   : > { %1932 = vmatpush3.msra.mxu1 %v201_v19  ;;  %1889 = vmatprep.subr.mxu0 %v1527_v20  ;;  %v2528_v59 = vld [vmem:[%s2437_s22 + $0x30] sm:$0xff]  ;;  %v1542_v0 = vld [vmem:[%s3003_s1 + $0x120] sm:$0xff]  ;;  %v1557_v5 = vld [vmem:[%s3003_s1 + $0x198] sm:$0xff] }
  0x21   : > { %1933 = vmatprep.subr.mxu1 %v200_v21  ;;  %1890 = vmatpush3.msra.mxu0 %v1527_v20  ;;  %v2541_v62 = vld [vmem:[%s2437_s22 + $0xd0] sm:$0xff]  ;;  %v1558_v1 = vld [vmem:[%s3003_s1 + $0x1a0] sm:$0xff]  ;;  %v145_v8 = vld [vmem:[%s2437_s22 + $0x8] sm:$0x1] }
  0x22   : > { %1934 = vmatpush3.msra.mxu1 %v200_v21  ;;  %1891 = vmatprep.subr.mxu0 %v1526_v22  ;;  %v2553_v2 = vld [vmem:[%s2437_s22 + $0xe0] sm:$0xff]  ;;  %v2556_v3 = vld [vmem:[%s2437_s22 + $0x50] sm:$0xff]  ;;  %v147_v13 = vld [vmem:[%s2437_s22 + $0x18] sm:$0x1]  ;;  %v456_v16 = vrot.slane %v145_v8, 1  ;;  %v458_v21 = vrot.slane %v2453_v35, 1 }
  0x23   : > { %1935 = vmatprep.subr.mxu1 %v199_v23  ;;  %1892 = vmatpush3.msra.mxu0 %v1526_v22  ;;  %v2569_v6 = vld [vmem:[%s2437_s22 + $0xf0] sm:$0xff]  ;;  %v2572_v7 = vld [vmem:[%s2437_s22 + $0x60] sm:$0xff]  ;;  %v1539_v18 = vld [vmem:[%s3003_s1 + $0x108] sm:$0xff]  ;;  %v459_v22 = vrot.slane %v147_v13, 1 }
  0x24   : > { %1936 = vmatpush3.msra.mxu1 %v199_v23  ;;  %1893 = vmatprep.subr.mxu0 %v1525_v24  ;;  %v1540_v9 = vld [vmem:[%s3003_s1 + $0x110] sm:$0xff]  ;;  %v2582_v11 = vld [vmem:[%s2437_s22 + $0x100] sm:$0xff]  ;;  %v1555_v19 = vld [vmem:[%s3003_s1 + $0x188] sm:$0xff] }
  0x25   : > { %1937 = vmatprep.subr.mxu1 %v198_v25  ;;  %1894 = vmatpush3.msra.mxu0 %v1525_v24  ;;  %v1556_v10 = vld [vmem:[%s3003_s1 + $0x190] sm:$0xff]  ;;  %v2589_v14 = vld [vmem:[%s2437_s22 + $0x80] sm:$0xff]  ;;  %v161_v20 = vld [vmem:[%s2437_s22 + $0x88] sm:$0x1] }
  0x26   : > { %1938 = vmatpush3.msra.mxu1 %v198_v25  ;;  %1895 = vmatprep.subr.mxu0 %v1524_v26  ;;  %v2585_v12 = vld [vmem:[%s2437_s22 + $0x70] sm:$0xff]  ;;  %v1317_v17 = vrot.slane %v2589_v14, 1  ;;  %v1318_v23 = vrot.slane %v161_v20, 1  ;;  %v1538_v24 = vld [vmem:[%s3003_s1 + $0x100] sm:$0xff]  ;;  %v1581_v8 = vld [vmem:[%s3003_s1 + $0x258] sm:$0xff] }
  0x27   : > { %1939 = vmatprep.subr.mxu1 %v197_v27  ;;  %1896 = vmatpush3.msra.mxu0 %v1524_v26  ;;  %v1554_v25 = vld [vmem:[%s3003_s1 + $0x180] sm:$0xff]  ;;  %v149_v26 = vld [vmem:[%s2437_s22 + $0x28] sm:$0x1]  ;;  %v476_v13 = vrot.slane %v2585_v12, 1 }
  0x28   : > { %1940 = vmatpush3.msra.mxu1 %v197_v27  ;;  %1897 = vmatprep.subr.mxu0 %v1523_v28  ;;  %v457_v27 = vsel %vm454_vm0, %v455_v15, %v456_v16  ;;  %v2693_v15 = vld [vmem:[%s2437_s22 + $0x160] sm:$0xff] }
  0x29   : > { %1941 = vmatprep.subr.mxu1 %v196_v29  ;;  %1898 = vmatpush3.msra.mxu0 %v1523_v28  ;;  %v151_v28 = vld [vmem:[%s2437_s22 + $0x38] sm:$0x1] }
  0x2a   : > { %1942 = vmatpush3.msra.mxu1 %v196_v29  ;;  %1899 = vmatprep.subr.mxu0 %v1522_v30  ;;  %v2615_v29 = vsel %vm454_vm0, %v1317_v17, %v1318_v23  ;;  %v1580_v17 = vld [vmem:[%s3003_s1 + $0x250] sm:$0xff]  ;;  %v1595_v23 = vld [vmem:[%s3003_s1 + $0x2c8] sm:$0xff] }
  0x2b   : > { %1943 = vmatprep.subr.mxu1 %v195_v31  ;;  %1900 = vmatpush3.msra.mxu0 %v1522_v30  ;;  %v2618_v30 = vld [vmem:[%s2437_s22 + $0x120] sm:$0xff] }
  0x2c   : > { %1901 = vmatprep.mubr.f32.mxu0 %v162_v32  ;;  %1944 = vmatpush3.msra.mxu1 %v195_v31  ;;  %v461_v31 = vrot.slane %v2516_v55, 1  ;;  %v2622_v32 = vsel %vm454_vm0, %v458_v21, %v459_v22  ;;  %v1579_v22 = vld [vmem:[%s3003_s1 + $0x248] sm:$0xff] }
  0x2d   : > { %1945 = vmatprep.mubr.f32.mxu1 %v2447_v33  ;;  %1902 = vmatmul.mubr.f32.vlgmr.msra.gmra.mxu0 %v2450_v34  ;;  %v2625_v33 = vld [vmem:[%s2437_s22 + $0x130] sm:$0xff] }
  0x2e   : > { %1946 = vmatmul.mubr.f32.vlgmr.msra.gmra.mxu1 %v2453_v35  ;;  %1957 = vmatprep.subr.mxu0 %v1553_v36 }
  0x2f   : > { %2001 = vmatprep.subr.mxu1 %v1569_v37  ;;  %1958 = vmatpush3.msra.mxu0 %v1553_v36  ;;  %v462_v36 = vrot.slane %v149_v26, 1  ;;  %v2728_v26 = vld [vmem:[%s2437_s22 + $0x190] sm:$0xff] }
  0x30   : > { %2002 = vmatpush3.msra.mxu1 %v1569_v37  ;;  %1959 = vmatprep.subr.mxu0 %v1552_v38  ;;  %v464_v37 = vrot.slane %v2528_v59, 1 }
  0x31   : > { %2003 = vmatprep.subr.mxu1 %v1568_v39  ;;  %1960 = vmatpush3.msra.mxu0 %v1552_v38  ;;  %v1585_v38 = vld [vmem:[%s3003_s1 + $0x278] sm:$0xff] }
  0x32   : > { %2004 = vmatpush3.msra.mxu1 %v1568_v39  ;;  %1961 = vmatprep.subr.mxu0 %v1551_v40  ;;  %v1601_v39 = vld [vmem:[%s3003_s1 + $0x2f8] sm:$0xff] }
  0x33   : > { %2005 = vmatprep.subr.mxu1 %v1567_v41  ;;  %1962 = vmatpush3.msra.mxu0 %v1551_v40  ;;  %v465_v40 = vrot.slane %v151_v28, 1  ;;  %v1577_v28 = vld [vmem:[%s3003_s1 + $0x238] sm:$0xff] }
  0x34   : > { %2006 = vmatpush3.msra.mxu1 %v1567_v41  ;;  %1963 = vmatprep.subr.mxu0 %v1550_v42  ;;  %v1584_v41 = vld [vmem:[%s3003_s1 + $0x270] sm:$0xff] }
  0x35   : > { %2007 = vmatprep.subr.mxu1 %v1566_v43  ;;  %1964 = vmatpush3.msra.mxu0 %v1550_v42  ;;  %v1600_v42 = vld [vmem:[%s3003_s1 + $0x2f0] sm:$0xff] }
  0x36   : > { %2008 = vmatpush3.msra.mxu1 %v1566_v43  ;;  %1965 = vmatprep.subr.mxu0 %v1549_v44  ;;  %v153_v43 = vld [vmem:[%s2437_s22 + $0x48] sm:$0x1] }
  0x37   : > { %2009 = vmatprep.subr.mxu1 %v1565_v45  ;;  %1966 = vmatpush3.msra.mxu0 %v1549_v44  ;;  %v2645_v44 = vsel %vm454_vm0, %v461_v31, %v462_v36  ;;  %v1593_v31 = vld [vmem:[%s3003_s1 + $0x2b8] sm:$0xff]  ;;  %v1576_v36 = vld [vmem:[%s3003_s1 + $0x230] sm:$0xff] }
  0x38   : > { %2010 = vmatpush3.msra.mxu1 %v1565_v45  ;;  %1967 = vmatprep.subr.mxu0 %v1548_v46  ;;  %v155_v45 = vld [vmem:[%s2437_s22 + $0x58] sm:$0x1] }
  0x39   : > { %2011 = vmatprep.subr.mxu1 %v1564_v47  ;;  %1968 = vmatpush3.msra.mxu0 %v1548_v46  ;;  %v2649_v46 = vsel %vm454_vm0, %v464_v37, %v465_v40  ;;  %v1592_v37 = vld [vmem:[%s3003_s1 + $0x2b0] sm:$0xff]  ;;  %v1574_v40 = vld [vmem:[%s3003_s1 + $0x220] sm:$0xff] }
  0x3a   : > { %2012 = vmatpush3.msra.mxu1 %v1564_v47  ;;  %1969 = vmatprep.subr.mxu0 %v1547_v48  ;;  %v467_v47 = vrot.slane %v2544_v63, 1 }
  0x3b   : > { %2013 = vmatprep.subr.mxu1 %v1563_v49  ;;  %1970 = vmatpush3.msra.mxu0 %v1547_v48  ;;  %v1583_v48 = vld [vmem:[%s3003_s1 + $0x268] sm:$0xff] }
  0x3c   : > { %2014 = vmatpush3.msra.mxu1 %v1563_v49  ;;  %1971 = vmatprep.subr.mxu0 %v1546_v50  ;;  %v1599_v49 = vld [vmem:[%s3003_s1 + $0x2e8] sm:$0xff] }
  0x3d   : > { %2015 = vmatprep.subr.mxu1 %v1562_v51  ;;  %1972 = vmatpush3.msra.mxu0 %v1546_v50  ;;  %v468_v50 = vrot.slane %v153_v43, 1  ;;  %v1589_v43 = vld [vmem:[%s3003_s1 + $0x298] sm:$0xff] }
  0x3e   : > { %2016 = vmatpush3.msra.mxu1 %v1562_v51  ;;  %1973 = vmatprep.subr.mxu0 %v1545_v52  ;;  %v470_v51 = vrot.slane %v2556_v3, 1 }
  0x3f   : > { %2017 = vmatprep.subr.mxu1 %v1561_v53  ;;  %1974 = vmatpush3.msra.mxu0 %v1545_v52  ;;  %v2661_v52 = vld [vmem:[%s2437_s22 + $0x140] sm:$0xff] }
  0x40   : > { %2018 = vmatpush3.msra.mxu1 %v1561_v53  ;;  %1904 = vmatprep.mubr.f32.mxu0 %v2513_v54  ;;  %v471_v53 = vrot.slane %v155_v45, 1  ;;  %v172_v45 = vld [vmem:[%s2437_s22 + $0x128] sm:$0x1] }
  0x41   : > { %1948 = vmatprep.mubr.f32.mxu1 %v2516_v55  ;;  %1975 = vmatprep.subr.mxu0 %v1544_v56 }
  0x42   : > { %2019 = vmatprep.subr.mxu1 %v1560_v57  ;;  %1905 = vmatmul.mubr.f32.gmra.mxu0 %v2525_v58 }
  0x43   : > { %1949 = vmatmul.mubr.f32.gmra.mxu1 %v2528_v59  ;;  %1976 = vmatpush3.msra.mxu0 %v1544_v56  ;;  %v1582_v56 = vld [vmem:[%s3003_s1 + $0x260] sm:$0xff] }
  0x44   : > { %2020 = vmatpush3.msra.mxu1 %v1560_v57  ;;  %1977 = vmatprep.subr.mxu0 %v1543_v60  ;;  %v2668_v57 = vld [vmem:[%s2437_s22 + $0x150] sm:$0xff] }
  0x45   : > { %2021 = vmatprep.subr.mxu1 %v1559_v61  ;;  %1978 = vmatpush3.msra.mxu0 %v1543_v60  ;;  %v1598_v60 = vld [vmem:[%s3003_s1 + $0x2e0] sm:$0xff] }
  0x46   : > { %2022 = vmatpush3.msra.mxu1 %v1559_v61  ;;  %1907 = vmatprep.mubr.f32.mxu0 %v2541_v62  ;;  %v157_v61 = vld [vmem:[%s2437_s22 + $0x68] sm:$0x1] }
  0x47   : > { %1951 = vmatprep.mubr.f32.mxu1 %v2544_v63  ;;  %1979 = vmatprep.subr.mxu0 %v1542_v0 }
  0x48   : > { %2023 = vmatprep.subr.mxu1 %v1558_v1  ;;  %1908 = vmatmul.mubr.f32.gmra.mxu0 %v2553_v2 }
  0x49   : > { %1952 = vmatmul.mubr.f32.gmra.mxu1 %v2556_v3  ;;  %1980 = vmatpush3.msra.mxu0 %v1542_v0  ;;  %v2676_v0 = vsel %vm454_vm0, %v467_v47, %v468_v50  ;;  %v1572_v47 = vld [vmem:[%s3003_s1 + $0x210] sm:$0xff]  ;;  %v893_v50 = vrot.slane %v2618_v30, 1 }
  0x4a   : > { %2024 = vmatpush3.msra.mxu1 %v1558_v1  ;;  %1981 = vmatprep.subr.mxu0 %v1541_v4  ;;  %v159_v1 = vld [vmem:[%s2437_s22 + $0x78] sm:$0x1] }
  0x4b   : > { %2025 = vmatprep.subr.mxu1 %v1557_v5  ;;  %1982 = vmatpush3.msra.mxu0 %v1541_v4  ;;  %v2680_v4 = vsel %vm454_vm0, %v470_v51, %v471_v53  ;;  %v477_v16 = vrot.slane %v159_v1, 1  ;;  %v1571_v51 = vld [vmem:[%s3003_s1 + $0x208] sm:$0xff]  ;;  %v1586_v1 = vld [vmem:[%s3003_s1 + $0x280] sm:$0xff] }
  0x4c   : > { %2026 = vmatpush3.msra.mxu1 %v1557_v5  ;;  %1910 = vmatprep.mubr.f32.mxu0 %v2569_v6  ;;  %v473_v5 = vrot.slane %v2572_v7, 1  ;;  %v1587_v53 = vld [vmem:[%s3003_s1 + $0x288] sm:$0xff] }
  0x4d   : > { %1954 = vmatprep.mubr.f32.mxu1 %v2572_v7  ;;  %1983 = vmatprep.subr.mxu0 %v1540_v9  ;;  %v2710_v21 = vsel %vm454_vm0, %v476_v13, %v477_v16  ;;  %v1617_v13 = vld [vmem:[%s3003_s1 + $0x378] sm:$0xff] }
  0x4e   : > { %2027 = vmatprep.subr.mxu1 %v1556_v10  ;;  %1911 = vmatmul.mubr.f32.gmra.mxu0 %v2582_v11  ;;  %v1633_v16 = vld [vmem:[%s3003_s1 + $0x3f8] sm:$0xff] }
  0x4f   : > { %1955 = vmatmul.mubr.f32.gmra.mxu1 %v2585_v12  ;;  %1984 = vmatpush3.msra.mxu0 %v1540_v9  ;;  %v1597_v9 = vld [vmem:[%s3003_s1 + $0x2d8] sm:$0xff] }
  0x50   : > { %2028 = vmatpush3.msra.mxu1 %v1556_v10  ;;  %1985 = vmatprep.subr.mxu0 %v1539_v18  ;;  %v474_v10 = vrot.slane %v157_v61, 1 }
  0x51   : > { %2029 = vmatprep.subr.mxu1 %v1555_v19  ;;  %1986 = vmatpush3.msra.mxu0 %v1539_v18  ;;  %v2700_v18 = vld [vmem:[%s2437_s22 + $0x170] sm:$0xff] }
  0x52   : > { %2030 = vmatpush3.msra.mxu1 %v1555_v19  ;;  %1987 = vmatprep.subr.mxu0 %v1538_v24  ;;  %v1596_v19 = vld [vmem:[%s3003_s1 + $0x2d0] sm:$0xff]  ;;  %v2707_v20 = vsel %vm454_vm0, %v473_v5, %v474_v10  ;;  %v176_v10 = vld [vmem:[%s2437_s22 + $0x148] sm:$0x1] }
  0x53   : > { %2031 = vmatprep.subr.mxu1 %v1554_v25  ;;  %1988 = vmatpush3.msra.mxu0 %v1538_v24  ;;  %v2721_v24 = vld [vmem:[%s2437_s22 + $0x180] sm:$0xff]  ;;  %v187_v5 = vld [vmem:[%s2437_s22 + $0x1b0] sm:$0xff] }
  0x54   : > { %1989 = vmatprep.mubr.f32.mxu0 %v457_v27  ;;  %2032 = vmatpush3.msra.mxu1 %v1554_v25  ;;  %v1578_v25 = vld [vmem:[%s3003_s1 + $0x240] sm:$0xff] }
  0x55   : > { %2033 = vmatprep.mubr.f32.mxu1 %v2618_v30  ;;  %1990 = vmatmul.mubr.f32.vlgmr.msra.gmra.mxu0 %v2622_v32  ;;  %v1594_v27 = vld [vmem:[%s3003_s1 + $0x2c0] sm:$0xff] }
  0x56   : > { %2034 = vmatmul.mubr.f32.vlgmr.msra.gmra.mxu1 %v2625_v33  ;;  %2045 = vmatprep.subr.mxu0 %v1585_v38  ;;  %v1570_v30 = vld [vmem:[%s3003_s1 + $0x200] sm:$0xff] }
  0x57   : > { %2089 = vmatprep.subr.mxu1 %v1601_v39  ;;  %2046 = vmatpush3.msra.mxu0 %v1585_v38  ;;  %v1575_v38 = vld [vmem:[%s3003_s1 + $0x228] sm:$0xff] }
  0x58   : > { %2090 = vmatpush3.msra.mxu1 %v1601_v39  ;;  %2047 = vmatprep.subr.mxu0 %v1584_v41  ;;  %v1591_v39 = vld [vmem:[%s3003_s1 + $0x2a8] sm:$0xff] }
  0x59   : > { %2091 = vmatprep.subr.mxu1 %v1600_v42  ;;  %1992 = vmatprep.mubr.f32.mxu0 %v2645_v44 }
  0x5a   : > { %2048 = vmatpush3.msra.mxu0 %v1584_v41  ;;  %2092 = vmatpush3.msra.mxu1 %v1600_v42  ;;  %v1590_v41 = vld [vmem:[%s3003_s1 + $0x2a0] sm:$0xff]  ;;  %v1573_v42 = vld [vmem:[%s3003_s1 + $0x218] sm:$0xff] }
  0x5b   : > { %1993 = vmatmul.mubr.f32.gmra.mxu0 %v2649_v46  ;;  %2049 = vmatprep.subr.mxu0 %v1583_v48 }
  0x5c   : > { %2093 = vmatprep.subr.mxu1 %v1599_v49  ;;  %2036 = vmatprep.mubr.f32.mxu1 %v2661_v52 }
  0x5d   : > { %2050 = vmatpush3.msra.mxu0 %v1583_v48  ;;  %2094 = vmatpush3.msra.mxu1 %v1599_v49  ;;  %v1588_v48 = vld [vmem:[%s3003_s1 + $0x290] sm:$0xff]  ;;  %v174_v49 = vld [vmem:[%s2437_s22 + $0x138] sm:$0x1] }
  0x5e   : > { %2051 = vmatprep.subr.mxu0 %v1582_v56  ;;  %2037 = vmatmul.mubr.f32.gmra.mxu1 %v2668_v57  ;;  %v897_v61 = vrot.slane %v174_v49, 1  ;;  %v192_v49 = vld [vmem:[%s2437_s22 + $0x200] sm:$0xff] }
  0x5f   : > { %2095 = vmatprep.subr.mxu1 %v1598_v60  ;;  %1995 = vmatprep.mubr.f32.mxu0 %v2676_v0 }
  0x60   : > { %2052 = vmatpush3.msra.mxu0 %v1582_v56  ;;  %2096 = vmatpush3.msra.mxu1 %v1598_v60  ;;  %v894_v56 = vrot.slane %v172_v45, 1  ;;  %v896_v60 = vrot.slane %v2625_v33, 1 }
  0x61   : > { %1996 = vmatmul.mubr.f32.gmra.mxu0 %v2680_v4  ;;  %2053 = vmatprep.subr.mxu0 %v1581_v8 }
  0x62   : > { %2097 = vmatprep.subr.mxu1 %v1597_v9  ;;  %2039 = vmatprep.mubr.f32.mxu1 %v2693_v15  ;;  %v895_v33 = vsel %vm454_vm0, %v893_v50, %v894_v56  ;;  %v1613_v50 = vld [vmem:[%s3003_s1 + $0x358] sm:$0xff]  ;;  %v1612_v56 = vld [vmem:[%s3003_s1 + $0x350] sm:$0xff] }
  0x63   : > { %2054 = vmatpush3.msra.mxu0 %v1581_v8  ;;  %2098 = vmatpush3.msra.mxu1 %v1597_v9  ;;  %v188_v8 = vld [vmem:[%s2437_s22 + $0x1c0] sm:$0xff]  ;;  %v898_v9 = vsel %vm454_vm0, %v896_v60, %v897_v61  ;;  %v186_v60 = vld [vmem:[%s2437_s22 + $0x198] sm:$0x1]  ;;  %v911_v61 = vrot.slane %v2721_v24, 1 }
  0x64   : > { %2055 = vmatprep.subr.mxu0 %v1580_v17  ;;  %2040 = vmatmul.mubr.f32.gmra.mxu1 %v2700_v18 }
  0x65   : > { %2099 = vmatprep.subr.mxu1 %v1596_v19  ;;  %1998 = vmatprep.mubr.f32.mxu0 %v2707_v20 }
  0x66   : > { %2056 = vmatpush3.msra.mxu0 %v1580_v17  ;;  %2100 = vmatpush3.msra.mxu1 %v1596_v19  ;;  %v178_v17 = vld [vmem:[%s2437_s22 + $0x158] sm:$0x1]  ;;  %v899_v19 = vrot.slane %v2661_v52, 1  ;;  %v190_v52 = vld [vmem:[%s2437_s22 + $0x1e0] sm:$0xff] }
  0x67   : > { %1999 = vmatmul.mubr.f32.gmra.mxu0 %v2710_v21  ;;  %2057 = vmatprep.subr.mxu0 %v1579_v22 }
  0x68   : > { %2101 = vmatprep.subr.mxu1 %v1595_v23  ;;  %2042 = vmatprep.mubr.f32.mxu1 %v2721_v24  ;;  %v1611_v24 = vld [vmem:[%s3003_s1 + $0x348] sm:$0xff] }
  0x69   : > { %2058 = vmatpush3.msra.mxu0 %v1579_v22  ;;  %2102 = vmatpush3.msra.mxu1 %v1595_v23  ;;  %v1616_v22 = vld [vmem:[%s3003_s1 + $0x370] sm:$0xff] }
  0x6a   : > { %2059 = vmatprep.subr.mxu0 %v1578_v25  ;;  %2043 = vmatmul.mubr.f32.gmra.mxu1 %v2728_v26  ;;  %v1632_v23 = vld [vmem:[%s3003_s1 + $0x3f0] sm:$0xff] }
  0x6b   : > { %2103 = vmatprep.subr.mxu1 %v1594_v27  ;;  %2060 = vmatpush3.msra.mxu0 %v1578_v25  ;;  %v900_v25 = vrot.slane %v176_v10, 1  ;;  %v915_v10 = vrot.slane %v186_v60, 1 }
  0x6c   : > { %2104 = vmatpush3.msra.mxu1 %v1594_v27  ;;  %2061 = vmatprep.subr.mxu0 %v1577_v28  ;;  %v189_v27 = vld [vmem:[%s2437_s22 + $0x1d0] sm:$0xff] }
  0x6d   : > { %2105 = vmatprep.subr.mxu1 %v1593_v31  ;;  %2062 = vmatpush3.msra.mxu0 %v1577_v28  ;;  %v902_v28 = vrot.slane %v2668_v57, 1  ;;  %v901_v57 = vsel %vm454_vm0, %v899_v19, %v900_v25  ;;  %v1626_v19 = vld [vmem:[%s3003_s1 + $0x3c0] sm:$0xff]  ;;  %v1608_v25 = vld [vmem:[%s3003_s1 + $0x330] sm:$0xff] }
  0x6e   : > { %2106 = vmatpush3.msra.mxu1 %v1593_v31  ;;  %2063 = vmatprep.subr.mxu0 %v1576_v36  ;;  %v903_v31 = vrot.slane %v178_v17, 1 }
  0x6f   : > { %2107 = vmatprep.subr.mxu1 %v1592_v37  ;;  %2064 = vmatpush3.msra.mxu0 %v1576_v36  ;;  %v1615_v36 = vld [vmem:[%s3003_s1 + $0x368] sm:$0xff] }
  0x70   : > { %2108 = vmatpush3.msra.mxu1 %v1592_v37  ;;  %2065 = vmatprep.subr.mxu0 %v1575_v38  ;;  %v1631_v37 = vld [vmem:[%s3003_s1 + $0x3e8] sm:$0xff] }
  0x71   : > { %2109 = vmatprep.subr.mxu1 %v1591_v39  ;;  %2066 = vmatpush3.msra.mxu0 %v1575_v38  ;;  %v180_v38 = vld [vmem:[%s2437_s22 + $0x168] sm:$0x1] }
  0x72   : > { %2110 = vmatpush3.msra.mxu1 %v1591_v39  ;;  %2067 = vmatprep.subr.mxu0 %v1574_v40  ;;  %v1614_v39 = vld [vmem:[%s3003_s1 + $0x360] sm:$0xff]  ;;  %v906_v45 = vrot.slane %v180_v38, 1  ;;  %v1621_v38 = vld [vmem:[%s3003_s1 + $0x398] sm:$0xff] }
  0x73   : > { %2111 = vmatprep.subr.mxu1 %v1590_v41  ;;  %2068 = vmatpush3.msra.mxu0 %v1574_v40  ;;  %v182_v40 = vld [vmem:[%s2437_s22 + $0x178] sm:$0x1] }
  0x74   : > { %2112 = vmatpush3.msra.mxu1 %v1590_v41  ;;  %2069 = vmatprep.subr.mxu0 %v1573_v42  ;;  %v905_v41 = vrot.slane %v2693_v15, 1  ;;  %v909_v15 = vrot.slane %v182_v40, 1  ;;  %v1603_v40 = vld [vmem:[%s3003_s1 + $0x308] sm:$0xff] }
  0x75   : > { %2113 = vmatprep.subr.mxu1 %v1589_v43  ;;  %2070 = vmatpush3.msra.mxu0 %v1573_v42  ;;  %v904_v42 = vsel %vm454_vm0, %v902_v28, %v903_v31  ;;  %v1607_v28 = vld [vmem:[%s3003_s1 + $0x328] sm:$0xff]  ;;  %v1606_v31 = vld [vmem:[%s3003_s1 + $0x320] sm:$0xff] }
  0x76   : > { %2114 = vmatpush3.msra.mxu1 %v1589_v43  ;;  %2071 = vmatprep.subr.mxu0 %v1572_v47  ;;  %v1630_v43 = vld [vmem:[%s3003_s1 + $0x3e0] sm:$0xff] }
  0x77   : > { %2115 = vmatprep.subr.mxu1 %v1588_v48  ;;  %2072 = vmatpush3.msra.mxu0 %v1572_v47  ;;  %v191_v47 = vld [vmem:[%s2437_s22 + $0x1f0] sm:$0xff] }
  0x78   : > { %2116 = vmatpush3.msra.mxu1 %v1588_v48  ;;  %2073 = vmatprep.subr.mxu0 %v1571_v51  ;;  %v908_v48 = vrot.slane %v2700_v18, 1  ;;  %v907_v18 = vsel %vm454_vm0, %v905_v41, %v906_v45  ;;  %v1619_v41 = vld [vmem:[%s3003_s1 + $0x388] sm:$0xff]  ;;  %v1649_v45 = vld [vmem:[%s3003_s1 + $0x478] sm:$0xff] }
  0x79   : > { %2117 = vmatprep.subr.mxu1 %v1587_v53  ;;  %2074 = vmatpush3.msra.mxu0 %v1571_v51  ;;  %v1629_v51 = vld [vmem:[%s3003_s1 + $0x3d8] sm:$0xff] }
  0x7a   : > { %2118 = vmatpush3.msra.mxu1 %v1587_v53  ;;  %2075 = vmatprep.subr.mxu0 %v1570_v30  ;;  %v184_v53 = vld [vmem:[%s2437_s22 + $0x188] sm:$0x1] }
  0x7b   : > { %2119 = vmatprep.subr.mxu1 %v1586_v1  ;;  %2076 = vmatpush3.msra.mxu0 %v1570_v30  ;;  %v910_v30 = vsel %vm454_vm0, %v908_v48, %v909_v15 }
  0x7c   : > { %2077 = vmatprep.mubr.f32.mxu0 %v187_v5  ;;  %2120 = vmatpush3.msra.mxu1 %v1586_v1  ;;  %v1628_v1 = vld [vmem:[%s3003_s1 + $0x3d0] sm:$0xff]  ;;  %v912_v5 = vrot.slane %v184_v53, 1 }
  0x7d   : > { %2121 = vmatprep.mubr.f32.mxu1 %v895_v33  ;;  %2078 = vmatmul.mubr.f32.vlgmr.msra.gmra.mxu0 %v188_v8  ;;  %v193_v33 = vld [vmem:[%s2437_s22 + $0x210] sm:$0xff]  ;;  %v914_v8 = vrot.slane %v2728_v26, 1  ;;  %v1610_v26 = vld [vmem:[%s3003_s1 + $0x340] sm:$0xff] }
  0x7e   : > { %2122 = vmatmul.mubr.f32.vlgmr.msra.gmra.mxu1 %v898_v9  ;;  %2133 = vmatprep.subr.mxu0 %v1617_v13  ;;  %v194_v9 = vld [vmem:[%s2437_s22 + $0x220] sm:$0xff] }
  0x7f   : > { %2177 = vmatprep.subr.mxu1 %v1633_v16  ;;  %2134 = vmatpush3.msra.mxu0 %v1617_v13  ;;  %v1627_v13 = vld [vmem:[%s3003_s1 + $0x3c8] sm:$0xff]  ;;  %v916_v17 = vsel %vm454_vm0, %v914_v8, %v915_v10 }
  0x80   : > { %2178 = vmatpush3.msra.mxu1 %v1633_v16  ;;  %2135 = vmatprep.subr.mxu0 %v1616_v22  ;;  %v913_v16 = vsel %vm454_vm0, %v911_v61, %v912_v5 }
  0x81   : > { %2179 = vmatprep.subr.mxu1 %v1632_v23  ;;  %2080 = vmatprep.mubr.f32.mxu0 %v189_v27  ;;  %v1624_v27 = vld [vmem:[%s3003_s1 + $0x3b0] sm:$0xff] }
  0x82   : > { %2136 = vmatpush3.msra.mxu0 %v1616_v22  ;;  %2180 = vmatpush3.msra.mxu1 %v1632_v23  ;;  %v1609_v22 = vld [vmem:[%s3003_s1 + $0x338] sm:$0xff] }
  0x83   : > { %2081 = vmatmul.mubr.f32.gmra.mxu0 %v190_v52  ;;  %2137 = vmatprep.subr.mxu0 %v1615_v36  ;;  %v1625_v23 = vld [vmem:[%s3003_s1 + $0x3b8] sm:$0xff]  ;;  %v1623_v52 = vld [vmem:[%s3003_s1 + $0x3a8] sm:$0xff] }
  0x84   : > { %2181 = vmatprep.subr.mxu1 %v1631_v37  ;;  %2124 = vmatprep.mubr.f32.mxu1 %v901_v57  ;;  %v1604_v57 = vld [vmem:[%s3003_s1 + $0x310] sm:$0xff] }
  0x85   : > { %2138 = vmatpush3.msra.mxu0 %v1615_v36  ;;  %2182 = vmatpush3.msra.mxu1 %v1631_v37  ;;  %v1622_v36 = vld [vmem:[%s3003_s1 + $0x3a0] sm:$0xff]  ;;  %v1605_v37 = vld [vmem:[%s3003_s1 + $0x318] sm:$0xff] }
  0x86   : > { %2139 = vmatprep.subr.mxu0 %v1614_v39  ;;  %2125 = vmatmul.mubr.f32.gmra.mxu1 %v904_v42  ;;  %v1602_v42 = vld [vmem:[%s3003_s1 + $0x300] sm:$0xff] }
  0x87   : > { %2183 = vmatprep.subr.mxu1 %v1630_v43  ;;  %2083 = vmatprep.mubr.f32.mxu0 %v191_v47  ;;  %v1648_v47 = vld [vmem:[%s3003_s1 + $0x470] sm:$0xff] }
  0x88   : > { %2140 = vmatpush3.msra.mxu0 %v1614_v39  ;;  %2184 = vmatpush3.msra.mxu1 %v1630_v43  ;;  %v1620_v39 = vld [vmem:[%s3003_s1 + $0x390] sm:$0xff]  ;;  %v1618_v43 = vld [vmem:[%s3003_s1 + $0x380] sm:$0xff] }
  0x89   : > { %2084 = vmatmul.mubr.f32.gmra.mxu0 %v192_v49  ;;  %2141 = vmatprep.subr.mxu0 %v1613_v50 }
  0x8a   : > { %2185 = vmatprep.subr.mxu1 %v1629_v51  ;;  %2127 = vmatprep.mubr.f32.mxu1 %v907_v18 }
  0x8b   : > { %2142 = vmatpush3.msra.mxu0 %v1613_v50  ;;  %2186 = vmatpush3.msra.mxu1 %v1629_v51 }
  0x8c   : > { %2143 = vmatprep.subr.mxu0 %v1612_v56  ;;  %2128 = vmatmul.mubr.f32.gmra.mxu1 %v910_v30 }
  0x8d   : > { %2187 = vmatprep.subr.mxu1 %v1628_v1  ;;  %2086 = vmatprep.mubr.f32.mxu0 %v193_v33 }
  0x8e   : > { %2144 = vmatpush3.msra.mxu0 %v1612_v56  ;;  %2188 = vmatpush3.msra.mxu1 %v1628_v1 }
  0x8f   : > { %2087 = vmatmul.mubr.f32.gmra.mxu0 %v194_v9  ;;  %2145 = vmatprep.subr.mxu0 %v1611_v24 }
  0x90   : > { %2189 = vmatprep.subr.mxu1 %v1627_v13  ;;  %2130 = vmatprep.mubr.f32.mxu1 %v913_v16 }
  0x91   : > { %2146 = vmatpush3.msra.mxu0 %v1611_v24  ;;  %2190 = vmatpush3.msra.mxu1 %v1627_v13 }
  0x92   : > { %2147 = vmatprep.subr.mxu0 %v1610_v26  ;;  %2131 = vmatmul.mubr.f32.gmra.mxu1 %v916_v17 }
  0x93   : > { %2191 = vmatprep.subr.mxu1 %v1626_v19  ;;  %2148 = vmatpush3.msra.mxu0 %v1610_v26 }
  0x94   : > { %2192 = vmatpush3.msra.mxu1 %v1626_v19  ;;  %2149 = vmatprep.subr.mxu0 %v1609_v22 }
  0x95   : > { %2193 = vmatprep.subr.mxu1 %v1625_v23  ;;  %2150 = vmatpush3.msra.mxu0 %v1609_v22 }
  0x96   : > { %2194 = vmatpush3.msra.mxu1 %v1625_v23  ;;  %2151 = vmatprep.subr.mxu0 %v1608_v25 }
  0x97   : > { %2195 = vmatprep.subr.mxu1 %v1624_v27  ;;  %2152 = vmatpush3.msra.mxu0 %v1608_v25 }
  0x98   : > { %2196 = vmatpush3.msra.mxu1 %v1624_v27  ;;  %2153 = vmatprep.subr.mxu0 %v1607_v28 }
  0x99   : > { %2197 = vmatprep.subr.mxu1 %v1623_v52  ;;  %2154 = vmatpush3.msra.mxu0 %v1607_v28 }
  0x9a   : > { %2198 = vmatpush3.msra.mxu1 %v1623_v52  ;;  %2155 = vmatprep.subr.mxu0 %v1606_v31 }
  0x9b   : > { %2199 = vmatprep.subr.mxu1 %v1622_v36  ;;  %2156 = vmatpush3.msra.mxu0 %v1606_v31 }
  0x9c   : > { %2200 = vmatpush3.msra.mxu1 %v1622_v36  ;;  %2157 = vmatprep.subr.mxu0 %v1605_v37 }
  0x9d   : > { %2201 = vmatprep.subr.mxu1 %v1621_v38  ;;  %2158 = vmatpush3.msra.mxu0 %v1605_v37 }
  0x9e   : > { %2202 = vmatpush3.msra.mxu1 %v1621_v38  ;;  %2159 = vmatprep.subr.mxu0 %v1604_v57 }
  0x9f   : > { %2203 = vmatprep.subr.mxu1 %v1620_v39  ;;  %2160 = vmatpush3.msra.mxu0 %v1604_v57 }
  0xa0   : > { %2204 = vmatpush3.msra.mxu1 %v1620_v39  ;;  %2161 = vmatprep.subr.mxu0 %v1603_v40 }
  0xa1   : > { %2205 = vmatprep.subr.mxu1 %v1619_v41  ;;  %2162 = vmatpush3.msra.mxu0 %v1603_v40 }
  0xa2   : > { %2206 = vmatpush3.msra.mxu1 %v1619_v41  ;;  %2163 = vmatprep.subr.mxu0 %v1602_v42 }
  0xa3   : > { %2207 = vmatprep.subr.mxu1 %v1618_v43  ;;  %2164 = vmatpush3.msra.mxu0 %v1602_v42 }
  0xa4   : > { %2165 = vmatprep.mubr.f32.mxu0 %v2453_v35  ;;  %2208 = vmatpush3.msra.mxu1 %v1618_v43  ;;  %v1647_v35 = vld [vmem:[%s3003_s1 + $0x468] sm:$0xff] }
  0xa5   : > { %2209 = vmatprep.mubr.f32.mxu1 %v2450_v34  ;;  %2166 = vmatmul.mubr.f32.vlgmr.msra.gmra.mxu0 %v2516_v55  ;;  %v1646_v34 = vld [vmem:[%s3003_s1 + $0x460] sm:$0xff]  ;;  %v1644_v55 = vld [vmem:[%s3003_s1 + $0x450] sm:$0xff] }
  0xa6   : > { %2210 = vmatmul.mubr.f32.vlgmr.msra.gmra.mxu1 %v2513_v54  ;;  %2221 = vmatprep.subr.mxu0 %v1649_v45  ;;  %v1645_v54 = vld [vmem:[%s3003_s1 + $0x458] sm:$0xff] }
  0xa7   : > { %2265 = vmatprep.subr.mxu1 %v1649_v45  ;;  %2222 = vmatpush3.msra.mxu0 %v1649_v45 }
  0xa8   : > { %2281 = vmatpush3.msra.mxu1 %v1649_v45  ;;  %2223 = vmatprep.subr.mxu0 %v1648_v47 }
  0xa9   : > { %2266 = vmatprep.subr.mxu1 %v1648_v47  ;;  %2168 = vmatprep.mubr.f32.mxu0 %v2528_v59  ;;  %v1642_v59 = vld [vmem:[%s3003_s1 + $0x440] sm:$0xff] }
  0xaa   : > { %2224 = vmatpush3.msra.mxu0 %v1648_v47  ;;  %2282 = vmatpush3.msra.mxu1 %v1648_v47 }
  0xab   : > { %2169 = vmatmul.mubr.f32.gmra.mxu0 %v2544_v63  ;;  %2225 = vmatprep.subr.mxu0 %v1647_v35  ;;  %v1641_v63 = vld [vmem:[%s3003_s1 + $0x438] sm:$0xff] }
  0xac   : > { %2267 = vmatprep.subr.mxu1 %v1647_v35  ;;  %2212 = vmatprep.mubr.f32.mxu1 %v2525_v58  ;;  %v1643_v58 = vld [vmem:[%s3003_s1 + $0x448] sm:$0xff] }
  0xad   : > { %2226 = vmatpush3.msra.mxu0 %v1647_v35  ;;  %2283 = vmatpush3.msra.mxu1 %v1647_v35 }
  0xae   : > { %2227 = vmatprep.subr.mxu0 %v1646_v34  ;;  %2213 = vmatmul.mubr.f32.gmra.mxu1 %v2541_v62  ;;  %v170_v62 = vld [vmem:[%s2437_s22 + $0x110] sm:$0xff] }
  0xaf   : > { %2268 = vmatprep.subr.mxu1 %v1646_v34  ;;  %2171 = vmatprep.mubr.f32.mxu0 %v2556_v3  ;;  %v1639_v3 = vld [vmem:[%s3003_s1 + $0x428] sm:$0xff] }
  0xb0   : > { %2228 = vmatpush3.msra.mxu0 %v1646_v34  ;;  %2284 = vmatpush3.msra.mxu1 %v1646_v34 }
  0xb1   : > { %2172 = vmatmul.mubr.f32.gmra.mxu0 %v2572_v7  ;;  %2229 = vmatprep.subr.mxu0 %v1645_v54  ;;  %v1637_v7 = vld [vmem:[%s3003_s1 + $0x418] sm:$0xff] }
  0xb2   : > { %2269 = vmatprep.subr.mxu1 %v1645_v54  ;;  %2215 = vmatprep.mubr.f32.mxu1 %v2553_v2  ;;  %v1640_v2 = vld [vmem:[%s3003_s1 + $0x430] sm:$0xff] }
  0xb3   : > { %2230 = vmatpush3.msra.mxu0 %v1645_v54  ;;  %2285 = vmatpush3.msra.mxu1 %v1645_v54 }
  0xb4   : > { %2231 = vmatprep.subr.mxu0 %v1644_v55  ;;  %2216 = vmatmul.mubr.f32.gmra.mxu1 %v2569_v6  ;;  %v1638_v6 = vld [vmem:[%s3003_s1 + $0x420] sm:$0xff] }
  0xb5   : > { %2270 = vmatprep.subr.mxu1 %v1644_v55  ;;  %2174 = vmatprep.mubr.f32.mxu0 %v2585_v12  ;;  %v1635_v12 = vld [vmem:[%s3003_s1 + $0x408] sm:$0xff] }
  0xb6   : > { %2232 = vmatpush3.msra.mxu0 %v1644_v55  ;;  %2286 = vmatpush3.msra.mxu1 %v1644_v55 }
  0xb7   : > { %2175 = vmatmul.mubr.f32.gmra.mxu0 %v2589_v14  ;;  %2233 = vmatprep.subr.mxu0 %v1643_v58  ;;  %v1634_v14 = vld [vmem:[%s3003_s1 + $0x400] sm:$0xff] }
  0xb8   : > { %2271 = vmatprep.subr.mxu1 %v1643_v58  ;;  %2218 = vmatprep.mubr.f32.mxu1 %v2582_v11  ;;  %v1636_v11 = vld [vmem:[%s3003_s1 + $0x410] sm:$0xff] }
  0xb9   : > { %2234 = vmatpush3.msra.mxu0 %v1643_v58  ;;  %2287 = vmatpush3.msra.mxu1 %v1643_v58 }
  0xba   : > { %2235 = vmatprep.subr.mxu0 %v1642_v59  ;;  %2219 = vmatmul.mubr.f32.gmra.mxu1 %v170_v62 }
  0xbb   : > { %2272 = vmatprep.subr.mxu1 %v1642_v59  ;;  %2236 = vmatpush3.msra.mxu0 %v1642_v59 }
  0xbc   : > { %2288 = vmatpush3.msra.mxu1 %v1642_v59  ;;  %2237 = vmatprep.subr.mxu0 %v1641_v63 }
  0xbd   : > { %2273 = vmatprep.subr.mxu1 %v1641_v63  ;;  %2238 = vmatpush3.msra.mxu0 %v1641_v63 }
  0xbe   : > { %2289 = vmatpush3.msra.mxu1 %v1641_v63  ;;  %2239 = vmatprep.subr.mxu0 %v1640_v2 }
  0xbf   : > { %2274 = vmatprep.subr.mxu1 %v1640_v2  ;;  %2240 = vmatpush3.msra.mxu0 %v1640_v2 }
  0xc0   : > { %2290 = vmatpush3.msra.mxu1 %v1640_v2  ;;  %2241 = vmatprep.subr.mxu0 %v1639_v3 }
  0xc1   : > { %2275 = vmatprep.subr.mxu1 %v1639_v3  ;;  %2242 = vmatpush3.msra.mxu0 %v1639_v3 }
  0xc2   : > { %2291 = vmatpush3.msra.mxu1 %v1639_v3  ;;  %2243 = vmatprep.subr.mxu0 %v1638_v6 }
  0xc3   : > { %2276 = vmatprep.subr.mxu1 %v1638_v6  ;;  %2244 = vmatpush3.msra.mxu0 %v1638_v6 }
  0xc4   : > { %2292 = vmatpush3.msra.mxu1 %v1638_v6  ;;  %2245 = vmatprep.subr.mxu0 %v1637_v7 }
  0xc5   : > { %2277 = vmatprep.subr.mxu1 %v1637_v7  ;;  %2246 = vmatpush3.msra.mxu0 %v1637_v7 }
  0xc6   : > { %2293 = vmatpush3.msra.mxu1 %v1637_v7  ;;  %2247 = vmatprep.subr.mxu0 %v1636_v11 }
  0xc7   : > { %2278 = vmatprep.subr.mxu1 %v1636_v11  ;;  %2248 = vmatpush3.msra.mxu0 %v1636_v11 }
  0xc8   : > { %2294 = vmatpush3.msra.mxu1 %v1636_v11  ;;  %2249 = vmatprep.subr.mxu0 %v1635_v12 }
  0xc9   : > { %2279 = vmatprep.subr.mxu1 %v1635_v12  ;;  %2250 = vmatpush3.msra.mxu0 %v1635_v12 }
  0xca   : > { %2295 = vmatpush3.msra.mxu1 %v1635_v12  ;;  %2251 = vmatprep.subr.mxu0 %v1634_v14 }
  0xcb   : > { %2280 = vmatprep.subr.mxu1 %v1634_v14  ;;  %2252 = vmatpush3.msra.mxu0 %v1634_v14 }
  0xcc   : > { %2296 = vmatpush3.msra.mxu1 %v1634_v14  ;;  %2253 = vmatprep.mubr.f32.mxu0 %v2622_v32 }
  0xcd   : > { %2259 = vmatprep.mubr.f32.mxu1 %v2680_v4  ;;  %2254 = vmatmul.mubr.f32.vlgmr.msra.gmra.mxu0 %v2645_v44 }
  0xce   : > { %2260 = vmatmul.mubr.f32.vlgmr.msra.gmra.mxu1 %v2707_v20  ;;  %2256 = vmatprep.mubr.f32.mxu0 %v2649_v46 }
  0xcf   : > { %2262 = vmatprep.mubr.f32.mxu1 %v2710_v21 }
  0xd1   : > { %2257 = vmatmul.mubr.f32.gmra.mxu0 %v2676_v0 }
  0xd2   : > { %2263 = vmatmul.mubr.f32.gmra.mxu1 %v2615_v29 }
  0xed   : > { %v1903_v48 = vpop.f32.mrf.mxu0 }
  0xee   : > { %v1947_v15 = vpop.f32.mrf.mxu1 }
  0xef   : > { %v294_v49 = vpop.f32.mrf.mxu0  ;;  %v405_v59 = vadd.f32 %v1947_v15, %v1903_v48 }
  0xf0   : > { %v399_v51 = vpop.f32.mrf.mxu1 }
  0xf1   : > { %v400_v63 = vadd.f32 %v399_v51, %v294_v49 }
 0x102   : > { %v1906_v50 = vpop.f32.mrf.mxu0 }
 0x103   : > { %v1950_v53 = vpop.f32.mrf.mxu1 }
 0x104   : > { %v304_v32 = vpop.f32.mrf.mxu0  ;;  %v415_v14 = vadd.f32 %v1950_v53, %v1906_v50 }
 0x105   : > { %v409_v18 = vpop.f32.mrf.mxu1 }
 0x108   : > { %v1909_v4 = vpop.f32.mrf.mxu0 }
 0x109   : > { %v1953_v56 = vpop.f32.mrf.mxu1 }
 0x10a   : > { %v314_v44 = vpop.f32.mrf.mxu0  ;;  %v425_v62 = vadd.f32 %v1953_v56, %v1909_v4 }
 0x10b   : > { %v419_v60 = vpop.f32.mrf.mxu1 }
 0x10c   : > { %v420_v6 = vadd.f32 %v419_v60, %v314_v44 }
 0x10e   : > { %v1912_v20 = vpop.f32.mrf.mxu0 }
 0x10f   : > { %v1956_v61 = vpop.f32.mrf.mxu1 }
 0x110   : > { %v324_v46 = vpop.f32.mrf.mxu0 }
 0x111   : > { %v429_v30 = vpop.f32.mrf.mxu1 }
 0x112   : > { %v430_v15 = vadd.f32 %v429_v30, %v324_v46 }
 0x115   : > { %v1991_v21 = vpop.f32.mrf.mxu0 }
 0x116   : > { %v2035_v1 = vpop.f32.mrf.mxu1  ;;  %v610_v7 = vadd.f32 %v1991_v21, %v405_v59 }
 0x117   : > { %v570_v0 = vpop.f32.mrf.mxu0 }
 0x118   : > { %v700_v5 = vpop.f32.mrf.mxu1  ;;  %v609_v12 = vadd.f32 %v570_v0, %v400_v63  ;;  %v740_v56 = vadd.f32 %v2035_v1, %v610_v7 }
 0x11a   : > { %v739_v44 = vadd.f32 %v700_v5, %v609_v12 }
 0x11b   : > { %v1994_v29 = vpop.f32.mrf.mxu0 }
 0x11c   : > { %v612_v49 = vadd.f32 %v1994_v29, %v415_v14 }
 0x11d   : > { %v580_v33 = vpop.f32.mrf.mxu0 }
 0x11e   : > { %v2038_v8 = vpop.f32.mrf.mxu1 }
 0x11f   : > { %v742_v53 = vadd.f32 %v2038_v8, %v612_v49 }
 0x120   : > { %v710_v10 = vpop.f32.mrf.mxu1 }
 0x121   : > { %v1997_v9 = vpop.f32.mrf.mxu0 }
 0x122   : > { %v614_v11 = vadd.f32 %v1997_v9, %v425_v62 }
 0x123   : > { %v590_v24 = vpop.f32.mrf.mxu0 }
 0x124   : > { %v2041_v13 = vpop.f32.mrf.mxu1 }
 0x125   : > { %v744_v51 = vadd.f32 %v2041_v13, %v614_v11 }
 0x126   : > { %v720_v26 = vpop.f32.mrf.mxu1 }
 0x127   : > { %v2000_v16 = vpop.f32.mrf.mxu0 }
 0x129   : > { %v600_v17 = vpop.f32.mrf.mxu0 }
 0x12a   : > { %v2044_v19 = vpop.f32.mrf.mxu1  ;;  %v615_v21 = vadd.f32 %v600_v17, %v430_v15 }
 0x12c   : > { %v730_v23 = vpop.f32.mrf.mxu1 }
 0x13d   : > { %v2079_v22 = vpop.f32.mrf.mxu0 }
 0x13e   : > { %v2123_v25 = vpop.f32.mrf.mxu1  ;;  %v870_v9 = vadd.f32 %v2079_v22, %v740_v56 }
 0x13f   : > { %v830_v27 = vpop.f32.mrf.mxu0 }
 0x140   : > { %v1008_v28 = vpop.f32.mrf.mxu1  ;;  %v869_v0 = vadd.f32 %v830_v27, %v739_v44  ;;  %v1048_v46 = vadd.f32 %v2123_v25, %v870_v9 }
 0x143   : > { %v2082_v52 = vpop.f32.mrf.mxu0 }
 0x144   : > { %v872_v30 = vadd.f32 %v2082_v52, %v742_v53 }
 0x145   : > { %v840_v36 = vpop.f32.mrf.mxu0 }
 0x146   : > { %v2983_v31 = vpop.f32.mrf.mxu1 }
 0x147   : > { %3005 = vst [vmem:[#allocation2_spill] sm:$0xff] %v2983_v31  ;;  %v613_v31 = vadd.f32 %v590_v24, %v420_v6  ;;  %v1047_v24 = vadd.f32 %v1008_v28, %v869_v0 }
 0x148   : > { %v2985_v37 = vpop.f32.mrf.mxu1 }
 0x149   : > { %3006 = vst [vmem:[#allocation3_spill] sm:$0xff] %v2985_v37  ;;  %v2085_v38 = vpop.f32.mrf.mxu0  ;;  %v435_v37 = vadd.f32 %v1956_v61, %v1912_v20  ;;  %v743_v59 = vadd.f32 %v720_v26, %v613_v31 }
 0x14a   : > { %v874_v62 = vadd.f32 %v2085_v38, %v744_v51 }
 0x14b   : > { %v850_v39 = vpop.f32.mrf.mxu0 }
 0x14c   : > { %v2129_v57 = vpop.f32.mrf.mxu1  ;;  %v873_v61 = vadd.f32 %v850_v39, %v743_v59 }
 0x14d   : > { %v1052_v1 = vadd.f32 %v2129_v57, %v874_v62 }
 0x14e   : > { %v1028_v40 = vpop.f32.mrf.mxu1  ;;  %v3009_v31 = vld [vmem:[#allocation2_spill] sm:$0xff] }
 0x14f   : > { %v2088_v41 = vpop.f32.mrf.mxu0  ;;  %v1051_v26 = vadd.f32 %v1028_v40, %v873_v61  ;;  %v1050_v8 = vadd.f32 %v3009_v31, %v872_v30 }
 0x151   : > { %v860_v43 = vpop.f32.mrf.mxu0 }
 0x152   : > { %v2132_v42 = vpop.f32.mrf.mxu1 }
 0x154   : > { %v1038_v45 = vpop.f32.mrf.mxu1 }
 0x165   : > { %v2167_v47 = vpop.f32.mrf.mxu0 }
 0x166   : > { %v2211_v35 = vpop.f32.mrf.mxu1  ;;  %v1178_v17 = vadd.f32 %v2167_v47, %v1048_v46 }
 0x167   : > { %v1138_v34 = vpop.f32.mrf.mxu0 }
 0x168   : > { %v1268_v54 = vpop.f32.mrf.mxu1  ;;  %v1177_v27 = vadd.f32 %v1138_v34, %v1047_v24  ;;  %v1308_v57 = vadd.f32 %v2211_v35, %v1178_v17 }
 0x16b   : > { %v2170_v55 = vpop.f32.mrf.mxu0 }
 0x16c   : > { %v1180_v28 = vadd.f32 %v2170_v55, %v1050_v8 }
 0x16d   : > { %v1148_v2 = vpop.f32.mrf.mxu0 }
 0x16e   : > { %v2987_v58 = vpop.f32.mrf.mxu1 }
 0x16f   : > { %3007 = vst [vmem:[#allocation4_spill] sm:$0xff] %v2987_v58  ;;  %v410_v58 = vadd.f32 %v409_v18, %v304_v32  ;;  %v745_v18 = vadd.f32 %v730_v23, %v615_v21 }
 0x170   : > { %v2989_v3 = vpop.f32.mrf.mxu1 }
 0x171   : > { %3008 = vst [vmem:[#allocation5_spill] sm:$0xff] %v2989_v3  ;;  %v2173_v48 = vpop.f32.mrf.mxu0  ;;  %v616_v3 = vadd.f32 %v2000_v16, %v435_v37  ;;  %v611_v60 = vadd.f32 %v580_v33, %v410_v58  ;;  %v875_v33 = vadd.f32 %v860_v43, %v745_v18 }
 0x172   : > { %v1182_v22 = vadd.f32 %v2173_v48, %v1052_v1 }
 0x173   : > { %v1158_v63 = vpop.f32.mrf.mxu0  ;;  %v746_v20 = vadd.f32 %v2044_v19, %v616_v3  ;;  %v741_v32 = vadd.f32 %v710_v10, %v611_v60  ;;  %v3010_v10 = vld [vmem:[#allocation3_spill] sm:$0xff]  ;;  %v1053_v25 = vadd.f32 %v1038_v45, %v875_v33 }
 0x174   : > { %v2217_v4 = vpop.f32.mrf.mxu1  ;;  %v1181_v37 = vadd.f32 %v1158_v63, %v1051_v26 }
 0x175   : > { %v876_v29 = vadd.f32 %v2088_v41, %v746_v20  ;;  %v871_v5 = vadd.f32 %v840_v36, %v741_v32  ;;  %v1312_v36 = vadd.f32 %v2217_v4, %v1182_v22  ;;  %v1307_v41 = vadd.f32 %v1268_v54, %v1177_v27 }
 0x176   : > { %v1288_v50 = vpop.f32.mrf.mxu1  ;;  %v3011_v7 = vld [vmem:[#allocation4_spill] sm:$0xff] }
 0x177   : > { %v2176_v13 = vpop.f32.mrf.mxu0  ;;  %v1054_v19 = vadd.f32 %v2132_v42, %v876_v29  ;;  %v1049_v23 = vadd.f32 %v3010_v10, %v871_v5  ;;  %v1311_v42 = vadd.f32 %v1288_v50, %v1181_v37  ;;  %v1310_v11 = vadd.f32 %v3011_v7, %v1180_v28 }
 0x178   : > { %v3012_v14 = vld [vmem:[#allocation5_spill] sm:$0xff] }
 0x179   : > { %v1168_v52 = vpop.f32.mrf.mxu0  ;;  %v1184_v39 = vadd.f32 %v2176_v13, %v1054_v19  ;;  %v1179_v43 = vadd.f32 %v1148_v2, %v1049_v23 }
 0x17a   : > { %v2220_v16 = vpop.f32.mrf.mxu1  ;;  %v1183_v34 = vadd.f32 %v1168_v52, %v1053_v25 }
 0x17b   : > { %v1314_v35 = vadd.f32 %v2220_v16, %v1184_v39  ;;  %v1309_v15 = vadd.f32 %v3012_v14, %v1179_v43 }
 0x17c   : > { %v1298_v38 = vpop.f32.mrf.mxu1 }
 0x17d   : > { %v1313_v48 = vadd.f32 %v1298_v38, %v1183_v34 }
 0x18d   : > { %v2255_v40 = vpop.f32.mrf.mxu0 }
 0x18e   : > { %v2261_v47 = vpop.f32.mrf.mxu1  ;;  %v1444_v58 = vadd.f32 %v2255_v40, %v1308_v57 }
 0x18f   : > { %v1448_v3 = vadd.f32 %v2261_v47, %v1312_v36  ;;  %v1404_v6 = vpop.f32.mrf.mxu0 }
 0x190   : > { %v1424_v45 = vpop.f32.mrf.mxu1  ;;  %1452 = vst [vmem:[%s143_s28 + $0x8] sm:$0xff] %v1444_v58  ;;  %v1443_v55 = vadd.f32 %v1404_v6, %v1307_v41 }
 0x191   : > { %1456 = vst [vmem:[%s143_s28 + $0x28] sm:$0xff] %v1448_v3  ;;  %v1447_v54 = vadd.f32 %v1424_v45, %v1311_v42  ;;  %v2258_v2 = vpop.f32.mrf.mxu0 }
 0x192   : > { %v2264_v12 = vpop.f32.mrf.mxu1  ;;  %1451 = vst [vmem:[%s143_s28] sm:$0xff] %v1443_v55  ;;  %v1446_v4 = vadd.f32 %v2258_v2, %v1310_v11 }
 0x193   : > { %1455 = vst [vmem:[%s143_s28 + $0x20] sm:$0xff] %v1447_v54  ;;  %v1450_v56 = vadd.f32 %v2264_v12, %v1314_v35  ;;  %v1414_v49 = vpop.f32.mrf.mxu0 }
 0x194   : > { %v1434_v51 = vpop.f32.mrf.mxu1  ;;  %1454 = vst [vmem:[%s143_s28 + $0x18] sm:$0xff] %v1446_v4  ;;  %v1445_v44 = vadd.f32 %v1414_v49, %v1309_v15 }
 0x195   : > { %1458 = vst [vmem:[%s143_s28 + $0x38] sm:$0xff] %v1450_v56  ;;  %v1449_v60 = vadd.f32 %v1434_v51, %v1313_v48 }
 0x196   : > { %1453 = vst [vmem:[%s143_s28 + $0x10] sm:$0xff] %v1445_v44 }
 0x197   : > { %1457 = vst [vmem:[%s143_s28 + $0x30] sm:$0xff] %v1449_v60 }
 0x198 PF: > { %s12_s9 = sadd.s32 1, %s2312_s9  }
 0x199   : > { %p9_p4 = scmp.ge.s32.totalorder %s12_s9, 4  }
 0x19b   :  { %11 = sbr.rel (!%p9_p4) target bundleno = 1 (0x1), region = 66 }

// kernel: preact_block_forward.13
= control target key start
LH: loop header
LB: loop body
LE: loop exit
PB: predicated region body
PF: predicated region fallthrough
CT: control target
= control target key end

     0   :  { %s2380_s12 = smov 0   ;;  %s3113_s0 = inlined_call_operand.vmem [shape: f32[2,10,10,128], index: 0, kind: input, shape index: {}]   ;;  %s3114_s1 = inlined_call_operand.vmem [shape: f32[3,3,128,128], index: 1, kind: input, shape index: {}]   ;;  %s3115_s2 = inlined_call_operand.vmem [shape: f32[2,8,8,128], index: 2, kind: input, shape index: {}]   ;;  %s3116_s3 = inlined_call_operand.vmem [shape: f32[2,8,8,128], index: 3, kind: output, shape index: {}]  }
   0x1 LB: > { %s1557_s13 = sadd.s32 4294967295, %s2358_s12   ;;  %p1561_p0 = scmp.ge.s32.totalorder %s2358_s12, 1  ;;  %s2358_s12 = sphi %s2380_s12, %s13_s12  }
   0x2   : > { %p147_p1 = scmp.lt.s32.totalorder %s2358_s12, 3 }
   0x4   : > { %p148_p2 = pnand %p1561_p0, %p147_p1 }
   0x6   : > { %151 = sbr.rel (%p148_p2) target bundleno = 410 (0x19a), region = 32 }
   0xb   : > { %v1582_v0 = vld [vmem:[%s3114_s1 + $0xf8] sm:$0xff]  ;;  %v1581_v2 = vld [vmem:[%s3114_s1 + $0xf0] sm:$0xff]  ;;  %v1580_v4 = vld [vmem:[%s3114_s1 + $0xe8] sm:$0xff]  ;;  %p176_p3 = scmp.lt.s32.totalorder %s1557_s13, 1  ;;  %vm243_vm0 = vcmask 1046528   ;;  %vm503_vm1 = vcmask 1045504  }
   0xc   : > { %v226_v1 = vld [vmem:[%s3114_s1 + $0x78] sm:$0xff]  ;;  %1915 = vmatprep.subr.mxu0 %v1582_v0  ;;  %v225_v3 = vld [vmem:[%s3114_s1 + $0x70] sm:$0xff]  ;;  %v224_v5 = vld [vmem:[%s3114_s1 + $0x68] sm:$0xff] }
   0xd   : > { %1959 = vmatprep.subr.mxu1 %v226_v1  ;;  %1916 = vmatpush3.msra.mxu0 %v1582_v0  ;;  %v1579_v6 = vld [vmem:[%s3114_s1 + $0xe0] sm:$0xff]  ;;  %v1578_v8 = vld [vmem:[%s3114_s1 + $0xd8] sm:$0xff]  ;;  %v1577_v10 = vld [vmem:[%s3114_s1 + $0xd0] sm:$0xff]  ;;  %s3130_s13 = smov (!%p176_p3, %s1557_s13), 1 }
   0xe   : > { %1960 = vmatpush3.msra.mxu1 %v226_v1  ;;  %1917 = vmatprep.subr.mxu0 %v1581_v2  ;;  %v223_v7 = vld [vmem:[%s3114_s1 + $0x60] sm:$0xff]  ;;  %v222_v9 = vld [vmem:[%s3114_s1 + $0x58] sm:$0xff]  ;;  %v221_v11 = vld [vmem:[%s3114_s1 + $0x50] sm:$0xff]  ;;  %s2343_s25 = smul.u32 160, %s3130_s13  ;;  %s1697_s6 = sshll.u32 %s3130_s13, 6 }
   0xf   : > { %1961 = vmatprep.subr.mxu1 %v225_v3  ;;  %1918 = vmatpush3.msra.mxu0 %v1581_v2  ;;  %v1576_v12 = vld [vmem:[%s3114_s1 + $0xc8] sm:$0xff]  ;;  %v1575_v14 = vld [vmem:[%s3114_s1 + $0xc0] sm:$0xff]  ;;  %v1574_v16 = vld [vmem:[%s3114_s1 + $0xb8] sm:$0xff]  ;;  %s3080_s8 = scalar_lea.vmem %s3115_s2, %s1697_s6  ;;  %s3093_s14 = scalar_lea.vmem %s3116_s3, %s1697_s6 }
  0x10   : > { %1962 = vmatpush3.msra.mxu1 %v225_v3  ;;  %1919 = vmatprep.subr.mxu0 %v1580_v4  ;;  %v220_v13 = vld [vmem:[%s3114_s1 + $0x48] sm:$0xff]  ;;  %v219_v15 = vld [vmem:[%s3114_s1 + $0x40] sm:$0xff]  ;;  %v218_v17 = vld [vmem:[%s3114_s1 + $0x38] sm:$0xff]  ;;  %s2464_s9 = scalar_lea.vmem %s3113_s0, %s2343_s25 }
  0x11   : > { %1963 = vmatprep.subr.mxu1 %v224_v5  ;;  %1920 = vmatpush3.msra.mxu0 %v1580_v4  ;;  %v1573_v18 = vld [vmem:[%s3114_s1 + $0xb0] sm:$0xff]  ;;  %v1572_v20 = vld [vmem:[%s3114_s1 + $0xa8] sm:$0xff]  ;;  %v1571_v22 = vld [vmem:[%s3114_s1 + $0xa0] sm:$0xff] }
  0x12   : > { %1964 = vmatpush3.msra.mxu1 %v224_v5  ;;  %1921 = vmatprep.subr.mxu0 %v1579_v6  ;;  %v217_v19 = vld [vmem:[%s3114_s1 + $0x30] sm:$0xff]  ;;  %v216_v21 = vld [vmem:[%s3114_s1 + $0x28] sm:$0xff]  ;;  %v215_v23 = vld [vmem:[%s3114_s1 + $0x20] sm:$0xff] }
  0x13   : > { %1965 = vmatprep.subr.mxu1 %v223_v7  ;;  %1922 = vmatpush3.msra.mxu0 %v1579_v6  ;;  %v1570_v24 = vld [vmem:[%s3114_s1 + $0x98] sm:$0xff]  ;;  %v2479_v26 = vld [vmem:[%s2464_s9] sm:$0xff]  ;;  %v2482_v27 = vld [vmem:[%s2464_s9 + $0x8] sm:$0x3] }
  0x14   : > { %1966 = vmatpush3.msra.mxu1 %v223_v7  ;;  %1923 = vmatprep.subr.mxu0 %v1578_v8  ;;  %v214_v25 = vld [vmem:[%s3114_s1 + $0x18] sm:$0xff]  ;;  %v1569_v28 = vld [vmem:[%s3114_s1 + $0x90] sm:$0xff]  ;;  %v244_v32 = vrot.slane %v2479_v26, 1  ;;  %v245_v33 = vrot.slane %v2482_v27, 1  ;;  %v1568_v34 = vld [vmem:[%s3114_s1 + $0x88] sm:$0xff] }
  0x15   : > { %1967 = vmatprep.subr.mxu1 %v222_v9  ;;  %1924 = vmatpush3.msra.mxu0 %v1578_v8  ;;  %v213_v29 = vld [vmem:[%s3114_s1 + $0x10] sm:$0xff]  ;;  %v2494_v31 = vld [vmem:[%s2464_s9 + $0x18] sm:$0x3]  ;;  %v212_v35 = vld [vmem:[%s3114_s1 + $0x8] sm:$0xff] }
  0x16   : > { %1968 = vmatpush3.msra.mxu1 %v222_v9  ;;  %1925 = vmatprep.subr.mxu0 %v1577_v10  ;;  %v2491_v30 = vld [vmem:[%s2464_s9 + $0x10] sm:$0xff]  ;;  %v248_v37 = vrot.slane %v2494_v31, 1  ;;  %v1567_v38 = vld [vmem:[%s3114_s1 + $0x80] sm:$0xff]  ;;  %v246_v40 = vsel %vm243_vm0, %v244_v32, %v245_v33  ;;  %v1598_v42 = vld [vmem:[%s3114_s1 + $0x178] sm:$0xff] }
  0x17   : > { %1969 = vmatprep.subr.mxu1 %v221_v11  ;;  %1926 = vmatpush3.msra.mxu0 %v1577_v10  ;;  %v247_v36 = vrot.slane %v2491_v30, 1  ;;  %v211_v39 = vld [vmem:[%s3114_s1] sm:$0xff]  ;;  %v1614_v43 = vld [vmem:[%s3114_s1 + $0x1f8] sm:$0xff]  ;;  %v1597_v44 = vld [vmem:[%s3114_s1 + $0x170] sm:$0xff] }
  0x18   : > { %1970 = vmatpush3.msra.mxu1 %v221_v11  ;;  %1927 = vmatprep.subr.mxu0 %v1576_v12  ;;  %v1613_v45 = vld [vmem:[%s3114_s1 + $0x1f0] sm:$0xff]  ;;  %v1596_v46 = vld [vmem:[%s3114_s1 + $0x168] sm:$0xff]  ;;  %v1595_v48 = vld [vmem:[%s3114_s1 + $0x160] sm:$0xff] }
  0x19   : > { %1971 = vmatprep.subr.mxu1 %v220_v13  ;;  %1928 = vmatpush3.msra.mxu0 %v1576_v12  ;;  %v2514_v41 = vsel %vm243_vm0, %v247_v36, %v248_v37  ;;  %v1612_v47 = vld [vmem:[%s3114_s1 + $0x1e8] sm:$0xff]  ;;  %v1611_v49 = vld [vmem:[%s3114_s1 + $0x1e0] sm:$0xff]  ;;  %v1594_v50 = vld [vmem:[%s3114_s1 + $0x158] sm:$0xff] }
  0x1a   : > { %1972 = vmatpush3.msra.mxu1 %v220_v13  ;;  %1929 = vmatprep.subr.mxu0 %v1575_v14  ;;  %v1610_v51 = vld [vmem:[%s3114_s1 + $0x1d8] sm:$0xff]  ;;  %v2550_v52 = vld [vmem:[%s2464_s9 + $0x80] sm:$0xff]  ;;  %v1593_v54 = vld [vmem:[%s3114_s1 + $0x150] sm:$0xff] }
  0x1b   : > { %1973 = vmatprep.subr.mxu1 %v219_v15  ;;  %1930 = vmatpush3.msra.mxu0 %v1575_v14  ;;  %v798_v53 = vrot.slane %v2550_v52, 1  ;;  %v1609_v55 = vld [vmem:[%s3114_s1 + $0x1d0] sm:$0xff]  ;;  %v2560_v56 = vld [vmem:[%s2464_s9 + $0x88] sm:$0x3]  ;;  %v2563_v57 = vld [vmem:[%s2464_s9 + $0x20] sm:$0xff] }
  0x1c   : > { %1974 = vmatpush3.msra.mxu1 %v219_v15  ;;  %1931 = vmatprep.subr.mxu0 %v1574_v16  ;;  %v2566_v58 = vld [vmem:[%s2464_s9 + $0x28] sm:$0x3]  ;;  %v799_v59 = vrot.slane %v2560_v56, 1  ;;  %v2576_v62 = vld [vmem:[%s2464_s9 + $0x30] sm:$0xff]  ;;  %v2579_v63 = vld [vmem:[%s2464_s9 + $0x38] sm:$0x3] }
  0x1d   : > { %1975 = vmatprep.subr.mxu1 %v218_v17  ;;  %1932 = vmatpush3.msra.mxu0 %v1574_v16  ;;  %v1592_v60 = vld [vmem:[%s3114_s1 + $0x148] sm:$0xff]  ;;  %v1591_v1 = vld [vmem:[%s3114_s1 + $0x140] sm:$0xff]  ;;  %v250_v3 = vrot.slane %v2563_v57, 1  ;;  %v251_v4 = vrot.slane %v2566_v58, 1  ;;  %v1590_v5 = vld [vmem:[%s3114_s1 + $0x138] sm:$0xff]  ;;  %v253_v7 = vrot.slane %v2576_v62, 1 }
  0x1e   : > { %1976 = vmatpush3.msra.mxu1 %v218_v17  ;;  %1933 = vmatprep.subr.mxu0 %v1573_v18  ;;  %v1608_v61 = vld [vmem:[%s3114_s1 + $0x1c8] sm:$0xff]  ;;  %v2582_v0 = vsel %vm243_vm0, %v798_v53, %v799_v59  ;;  %v1607_v2 = vld [vmem:[%s3114_s1 + $0x1c0] sm:$0xff]  ;;  %v1606_v6 = vld [vmem:[%s3114_s1 + $0x1b8] sm:$0xff]  ;;  %v254_v8 = vrot.slane %v2579_v63, 1  ;;  %v505_v53 = vrot.slane %v2482_v27, 2 }
  0x1f   : > { %1977 = vmatprep.subr.mxu1 %v217_v19  ;;  %1934 = vmatpush3.msra.mxu0 %v1573_v18  ;;  %v2601_v9 = vld [vmem:[%s2464_s9 + $0x40] sm:$0xff]  ;;  %v2604_v10 = vld [vmem:[%s2464_s9 + $0x48] sm:$0x3]  ;;  %v2607_v11 = vsel %vm243_vm0, %v250_v3, %v251_v4  ;;  %v1589_v12 = vld [vmem:[%s3114_s1 + $0x130] sm:$0xff]  ;;  %v510_v4 = vrot.slane %v2563_v57, 2 }
  0x20   : > { %1978 = vmatpush3.msra.mxu1 %v217_v19  ;;  %1935 = vmatprep.subr.mxu0 %v1572_v20  ;;  %v1605_v13 = vld [vmem:[%s3114_s1 + $0x1b0] sm:$0xff]  ;;  %v256_v15 = vrot.slane %v2601_v9, 1  ;;  %v2620_v16 = vld [vmem:[%s2464_s9 + $0x58] sm:$0x3]  ;;  %v2629_v19 = vsel %vm243_vm0, %v253_v7, %v254_v8  ;;  %v2650_v32 = vld [vmem:[%s2464_s9 + $0x60] sm:$0xff]  ;;  %v513_v8 = vrot.slane %v2576_v62, 2 }
  0x21   : > { %1979 = vmatprep.subr.mxu1 %v216_v21  ;;  %1936 = vmatpush3.msra.mxu0 %v1572_v20  ;;  %v2616_v14 = vld [vmem:[%s2464_s9 + $0x50] sm:$0xff]  ;;  %v2626_v18 = vld [vmem:[%s2464_s9 + $0x98] sm:$0x3]  ;;  %v257_v20 = vrot.slane %v2604_v10, 1  ;;  %v2653_v33 = vld [vmem:[%s2464_s9 + $0x68] sm:$0x3] }
  0x22   : > { %1980 = vmatpush3.msra.mxu1 %v216_v21  ;;  %1937 = vmatprep.subr.mxu0 %v1571_v22  ;;  %v2623_v17 = vld [vmem:[%s2464_s9 + $0x90] sm:$0xff]  ;;  %v1603_v36 = vld [vmem:[%s3114_s1 + $0x1a0] sm:$0xff]  ;;  %v1600_v59 = vld [vmem:[%s3114_s1 + $0x188] sm:$0xff]  ;;  %v1333_v27 = vrot.slane %v2626_v18, 2 }
  0x23   : > { %1981 = vmatprep.subr.mxu1 %v215_v23  ;;  %1938 = vmatpush3.msra.mxu0 %v1571_v22  ;;  %v1198_v21 = vrot.slane %v2623_v17, 1  ;;  %v1199_v22 = vrot.slane %v2626_v18, 1  ;;  %v2665_v37 = vld [vmem:[%s2464_s9 + $0x70] sm:$0xff]  ;;  %v1646_v7 = vld [vmem:[%s3114_s1 + $0x2f8] sm:$0xff]  ;;  %v1644_v18 = vld [vmem:[%s3114_s1 + $0x2e8] sm:$0xff] }
  0x24   : > { %1982 = vmatpush3.msra.mxu1 %v215_v23  ;;  %1939 = vmatprep.subr.mxu0 %v1570_v24  ;;  %v1588_v23 = vld [vmem:[%s3114_s1 + $0x128] sm:$0xff] }
  0x25   : > { %1983 = vmatprep.subr.mxu1 %v214_v25  ;;  %1940 = vmatpush3.msra.mxu0 %v1570_v24  ;;  %v1604_v24 = vld [vmem:[%s3114_s1 + $0x1a8] sm:$0xff] }
  0x26   : > { %1984 = vmatpush3.msra.mxu1 %v214_v25  ;;  %1941 = vmatprep.subr.mxu0 %v1569_v28  ;;  %v259_v25 = vrot.slane %v2616_v14, 1 }
  0x27   : > { %1985 = vmatprep.subr.mxu1 %v213_v29  ;;  %1942 = vmatpush3.msra.mxu0 %v1569_v28  ;;  %v260_v28 = vrot.slane %v2620_v16, 1 }
  0x28   : > { %1986 = vmatpush3.msra.mxu1 %v213_v29  ;;  %1943 = vmatprep.subr.mxu0 %v1568_v34  ;;  %v2645_v29 = vsel %vm243_vm0, %v1198_v21, %v1199_v22  ;;  %v517_v21 = vrot.slane %v2604_v10, 2  ;;  %v519_v22 = vrot.slane %v2616_v14, 2  ;;  %v1643_v10 = vld [vmem:[%s3114_s1 + $0x2e0] sm:$0xff] }
  0x29   : > { %1987 = vmatprep.subr.mxu1 %v212_v35  ;;  %1944 = vmatpush3.msra.mxu0 %v1568_v34  ;;  %v2656_v34 = vsel %vm243_vm0, %v256_v15, %v257_v20  ;;  %v516_v20 = vrot.slane %v2601_v9, 2 }
  0x2a   : > { %1988 = vmatpush3.msra.mxu1 %v212_v35  ;;  %1945 = vmatprep.subr.mxu0 %v1567_v38  ;;  %v1587_v35 = vld [vmem:[%s3114_s1 + $0x120] sm:$0xff] }
  0x2b   : > { %1989 = vmatprep.subr.mxu1 %v211_v39  ;;  %1946 = vmatpush3.msra.mxu0 %v1567_v38  ;;  %v2668_v38 = vld [vmem:[%s2464_s9 + $0x78] sm:$0x3] }
  0x2c   : > { %1947 = vmatprep.mubr.f32.mxu0 %v246_v40  ;;  %1990 = vmatpush3.msra.mxu1 %v211_v39  ;;  %v2671_v39 = vsel %vm243_vm0, %v259_v25, %v260_v28  ;;  %v262_v40 = vrot.slane %v2650_v32, 1  ;;  %v2773_v25 = vsel %vm503_vm1, %v516_v20, %v517_v21  ;;  %v1626_v28 = vld [vmem:[%s3114_s1 + $0x258] sm:$0xff]  ;;  %v1659_v20 = vld [vmem:[%s3114_s1 + $0x360] sm:$0xff] }
  0x2d   : > { %1991 = vmatprep.mubr.f32.mxu1 %v2479_v26  ;;  %1948 = vmatmul.mubr.f32.vlgmr.msra.gmra.mxu0 %v2514_v41  ;;  %v1675_v21 = vld [vmem:[%s3114_s1 + $0x3e0] sm:$0xff] }
  0x2e   : > { %1992 = vmatmul.mubr.f32.vlgmr.msra.gmra.mxu1 %v2491_v30  ;;  %2003 = vmatprep.subr.mxu0 %v1598_v42 }
  0x2f   : > { %2047 = vmatprep.subr.mxu1 %v1614_v43  ;;  %2004 = vmatpush3.msra.mxu0 %v1598_v42  ;;  %v263_v42 = vrot.slane %v2653_v33, 1 }
  0x30   : > { %2048 = vmatpush3.msra.mxu1 %v1614_v43  ;;  %2005 = vmatprep.subr.mxu0 %v1597_v44  ;;  %v1586_v43 = vld [vmem:[%s3114_s1 + $0x118] sm:$0xff] }
  0x31   : > { %2049 = vmatprep.subr.mxu1 %v1613_v45  ;;  %2006 = vmatpush3.msra.mxu0 %v1597_v44  ;;  %v1602_v44 = vld [vmem:[%s3114_s1 + $0x198] sm:$0xff] }
  0x32   : > { %2050 = vmatpush3.msra.mxu1 %v1613_v45  ;;  %2007 = vmatprep.subr.mxu0 %v1596_v46  ;;  %v265_v45 = vrot.slane %v2665_v37, 1 }
  0x33   : > { %2051 = vmatprep.subr.mxu1 %v1612_v47  ;;  %2008 = vmatpush3.msra.mxu0 %v1596_v46  ;;  %v266_v46 = vrot.slane %v2668_v38, 1 }
  0x34   : > { %2052 = vmatpush3.msra.mxu1 %v1612_v47  ;;  %2009 = vmatprep.subr.mxu0 %v1595_v48  ;;  %v2688_v47 = vsel %vm243_vm0, %v262_v40, %v263_v42  ;;  %v523_v40 = vrot.slane %v2653_v33, 2  ;;  %v525_v42 = vrot.slane %v2665_v37, 2  ;;  %v1641_v33 = vld [vmem:[%s3114_s1 + $0x2d0] sm:$0xff] }
  0x35   : > { %2053 = vmatprep.subr.mxu1 %v1611_v49  ;;  %2010 = vmatpush3.msra.mxu0 %v1595_v48  ;;  %v1585_v48 = vld [vmem:[%s3114_s1 + $0x110] sm:$0xff] }
  0x36   : > { %2054 = vmatpush3.msra.mxu1 %v1611_v49  ;;  %2011 = vmatprep.subr.mxu0 %v1594_v50  ;;  %v1601_v49 = vld [vmem:[%s3114_s1 + $0x190] sm:$0xff] }
  0x37   : > { %2055 = vmatprep.subr.mxu1 %v1610_v51  ;;  %2012 = vmatpush3.msra.mxu0 %v1594_v50  ;;  %v2697_v50 = vsel %vm243_vm0, %v265_v45, %v266_v46  ;;  %v1624_v46 = vld [vmem:[%s3114_s1 + $0x248] sm:$0xff] }
  0x38   : > { %2056 = vmatpush3.msra.mxu1 %v1610_v51  ;;  %2013 = vmatprep.subr.mxu0 %v1593_v54  ;;  %v504_v51 = vrot.slane %v2479_v26, 2  ;;  %v507_v26 = vrot.slane %v2491_v30, 2 }
  0x39   : > { %2057 = vmatprep.subr.mxu1 %v1609_v55  ;;  %2014 = vmatpush3.msra.mxu0 %v1593_v54  ;;  %v1332_v54 = vrot.slane %v2623_v17, 2 }
  0x3a   : > { %2058 = vmatpush3.msra.mxu1 %v1609_v55  ;;  %2015 = vmatprep.subr.mxu0 %v1592_v60  ;;  %v1584_v55 = vld [vmem:[%s3114_s1 + $0x108] sm:$0xff] }
  0x3b   : > { %2059 = vmatprep.subr.mxu1 %v1608_v61  ;;  %2016 = vmatpush3.msra.mxu0 %v1592_v60  ;;  %v508_v60 = vrot.slane %v2494_v31, 2  ;;  %v506_v31 = vsel %vm503_vm1, %v504_v51, %v505_v53  ;;  %v1639_v51 = vld [vmem:[%s3114_s1 + $0x2c0] sm:$0xff]  ;;  %v1622_v53 = vld [vmem:[%s3114_s1 + $0x238] sm:$0xff] }
  0x3c   : > { %2060 = vmatpush3.msra.mxu1 %v1608_v61  ;;  %2017 = vmatprep.subr.mxu0 %v1591_v1  ;;  %v1583_v61 = vld [vmem:[%s3114_s1 + $0x100] sm:$0xff] }
  0x3d   : > { %2061 = vmatprep.subr.mxu1 %v1607_v2  ;;  %2018 = vmatpush3.msra.mxu0 %v1591_v1  ;;  %v1599_v1 = vld [vmem:[%s3114_s1 + $0x180] sm:$0xff]  ;;  %v2726_v3 = vsel %vm503_vm1, %v507_v26, %v508_v60  ;;  %v1620_v60 = vld [vmem:[%s3114_s1 + $0x228] sm:$0xff] }
  0x3e   : > { %2062 = vmatpush3.msra.mxu1 %v1607_v2  ;;  %2019 = vmatprep.subr.mxu0 %v1590_v5  ;;  %v2723_v2 = vsel %vm503_vm1, %v1332_v54, %v1333_v27  ;;  %v1638_v54 = vld [vmem:[%s3114_s1 + $0x2b8] sm:$0xff]  ;;  %v1636_v26 = vld [vmem:[%s3114_s1 + $0x2a8] sm:$0xff]  ;;  %v1619_v27 = vld [vmem:[%s3114_s1 + $0x220] sm:$0xff] }
  0x3f   : > { %2063 = vmatprep.subr.mxu1 %v1606_v6  ;;  %2020 = vmatpush3.msra.mxu0 %v1590_v5  ;;  %v511_v5 = vrot.slane %v2566_v58, 2  ;;  %v1629_v58 = vld [vmem:[%s3114_s1 + $0x270] sm:$0xff] }
  0x40   : > { %2064 = vmatpush3.msra.mxu1 %v1606_v6  ;;  %1950 = vmatprep.mubr.f32.mxu0 %v2607_v11  ;;  %v1630_v6 = vld [vmem:[%s3114_s1 + $0x278] sm:$0xff] }
  0x41   : > { %1994 = vmatprep.mubr.f32.mxu1 %v2563_v57  ;;  %2021 = vmatprep.subr.mxu0 %v1589_v12  ;;  %v2748_v15 = vsel %vm503_vm1, %v510_v4, %v511_v5  ;;  %v1617_v4 = vld [vmem:[%s3114_s1 + $0x210] sm:$0xff] }
  0x42   : > { %2065 = vmatprep.subr.mxu1 %v1605_v13  ;;  %1951 = vmatmul.mubr.f32.gmra.mxu0 %v2629_v19  ;;  %v1633_v5 = vld [vmem:[%s3114_s1 + $0x290] sm:$0xff] }
  0x43   : > { %1995 = vmatmul.mubr.f32.gmra.mxu1 %v2576_v62  ;;  %2022 = vmatpush3.msra.mxu0 %v1589_v12  ;;  %v514_v12 = vrot.slane %v2579_v63, 2  ;;  %v1628_v63 = vld [vmem:[%s3114_s1 + $0x268] sm:$0xff] }
  0x44   : > { %2066 = vmatpush3.msra.mxu1 %v1605_v13  ;;  %2023 = vmatprep.subr.mxu0 %v1588_v23  ;;  %v1645_v13 = vld [vmem:[%s3114_s1 + $0x2f0] sm:$0xff] }
  0x45   : > { %2067 = vmatprep.subr.mxu1 %v1604_v24  ;;  %2024 = vmatpush3.msra.mxu0 %v1588_v23  ;;  %v520_v23 = vrot.slane %v2620_v16, 2 }
  0x46   : > { %2068 = vmatpush3.msra.mxu1 %v1604_v24  ;;  %1953 = vmatprep.mubr.f32.mxu0 %v2656_v34  ;;  %v1627_v24 = vld [vmem:[%s3114_s1 + $0x260] sm:$0xff] }
  0x47   : > { %1997 = vmatprep.mubr.f32.mxu1 %v2601_v9  ;;  %2025 = vmatprep.subr.mxu0 %v1587_v35  ;;  %v2776_v16 = vsel %vm503_vm1, %v519_v22, %v520_v23  ;;  %v1658_v22 = vld [vmem:[%s3114_s1 + $0x358] sm:$0xff] }
  0x48   : > { %2069 = vmatprep.subr.mxu1 %v1603_v36  ;;  %1954 = vmatmul.mubr.f32.gmra.mxu0 %v2671_v39  ;;  %v1674_v23 = vld [vmem:[%s3114_s1 + $0x3d8] sm:$0xff] }
  0x49   : > { %1998 = vmatmul.mubr.f32.gmra.mxu1 %v2616_v14  ;;  %2026 = vmatpush3.msra.mxu0 %v1587_v35  ;;  %v1642_v35 = vld [vmem:[%s3114_s1 + $0x2d8] sm:$0xff] }
  0x4a   : > { %2070 = vmatpush3.msra.mxu1 %v1603_v36  ;;  %2027 = vmatprep.subr.mxu0 %v1586_v43  ;;  %v522_v36 = vrot.slane %v2650_v32, 2 }
  0x4b   : > { %2071 = vmatprep.subr.mxu1 %v1602_v44  ;;  %2028 = vmatpush3.msra.mxu0 %v1586_v43  ;;  %v526_v43 = vrot.slane %v2668_v38, 2 }
  0x4c   : > { %2072 = vmatpush3.msra.mxu1 %v1602_v44  ;;  %1956 = vmatprep.mubr.f32.mxu0 %v2688_v47  ;;  %v1625_v44 = vld [vmem:[%s3114_s1 + $0x250] sm:$0xff]  ;;  %v2799_v45 = vsel %vm503_vm1, %v522_v36, %v523_v40  ;;  %v1656_v36 = vld [vmem:[%s3114_s1 + $0x348] sm:$0xff] }
  0x4d   : > { %2000 = vmatprep.mubr.f32.mxu1 %v2650_v32  ;;  %2029 = vmatprep.subr.mxu0 %v1585_v48  ;;  %v2802_v38 = vsel %vm503_vm1, %v525_v42, %v526_v43  ;;  %v1672_v40 = vld [vmem:[%s3114_s1 + $0x3c8] sm:$0xff]  ;;  %v1671_v43 = vld [vmem:[%s3114_s1 + $0x3c0] sm:$0xff] }
  0x4e   : > { %2073 = vmatprep.subr.mxu1 %v1601_v49  ;;  %1957 = vmatmul.mubr.f32.gmra.mxu0 %v2697_v50 }
  0x4f   : > { %2001 = vmatmul.mubr.f32.gmra.mxu1 %v2665_v37  ;;  %2030 = vmatpush3.msra.mxu0 %v1585_v48  ;;  %v1640_v48 = vld [vmem:[%s3114_s1 + $0x2c8] sm:$0xff] }
  0x50   : > { %2074 = vmatpush3.msra.mxu1 %v1601_v49  ;;  %2031 = vmatprep.subr.mxu0 %v1584_v55  ;;  %v1623_v49 = vld [vmem:[%s3114_s1 + $0x240] sm:$0xff] }
  0x51   : > { %2075 = vmatprep.subr.mxu1 %v1600_v59  ;;  %2032 = vmatpush3.msra.mxu0 %v1584_v55  ;;  %v1621_v55 = vld [vmem:[%s3114_s1 + $0x230] sm:$0xff] }
  0x52   : > { %2076 = vmatpush3.msra.mxu1 %v1600_v59  ;;  %2033 = vmatprep.subr.mxu0 %v1583_v61  ;;  %v1637_v59 = vld [vmem:[%s3114_s1 + $0x2b0] sm:$0xff] }
  0x53   : > { %2077 = vmatprep.subr.mxu1 %v1599_v1  ;;  %2034 = vmatpush3.msra.mxu0 %v1583_v61  ;;  %v1635_v61 = vld [vmem:[%s3114_s1 + $0x2a0] sm:$0xff] }
  0x54   : > { %2035 = vmatprep.mubr.f32.mxu0 %v506_v31  ;;  %2078 = vmatpush3.msra.mxu1 %v1599_v1  ;;  %v1618_v1 = vld [vmem:[%s3114_s1 + $0x218] sm:$0xff] }
  0x55   : > { %2079 = vmatprep.mubr.f32.mxu1 %v2491_v30  ;;  %2036 = vmatmul.mubr.f32.vlgmr.msra.gmra.mxu0 %v2726_v3  ;;  %v2751_v30 = vsel %vm503_vm1, %v513_v8, %v514_v12  ;;  %v1634_v31 = vld [vmem:[%s3114_s1 + $0x298] sm:$0xff]  ;;  %v1615_v8 = vld [vmem:[%s3114_s1 + $0x200] sm:$0xff] }
  0x56   : > { %2080 = vmatmul.mubr.f32.vlgmr.msra.gmra.mxu1 %v2563_v57  ;;  %2091 = vmatprep.subr.mxu0 %v1630_v6  ;;  %v1631_v12 = vld [vmem:[%s3114_s1 + $0x280] sm:$0xff] }
  0x57   : > { %2135 = vmatprep.subr.mxu1 %v1646_v7  ;;  %2092 = vmatpush3.msra.mxu0 %v1630_v6  ;;  %v1616_v6 = vld [vmem:[%s3114_s1 + $0x208] sm:$0xff] }
  0x58   : > { %2136 = vmatpush3.msra.mxu1 %v1646_v7  ;;  %2093 = vmatprep.subr.mxu0 %v1629_v58  ;;  %v1632_v7 = vld [vmem:[%s3114_s1 + $0x288] sm:$0xff] }
  0x59   : > { %2137 = vmatprep.subr.mxu1 %v1645_v13  ;;  %2038 = vmatprep.mubr.f32.mxu0 %v2748_v15 }
  0x5a   : > { %2094 = vmatpush3.msra.mxu0 %v1629_v58  ;;  %2138 = vmatpush3.msra.mxu1 %v1645_v13  ;;  %v1662_v58 = vld [vmem:[%s3114_s1 + $0x378] sm:$0xff] }
  0x5b   : > { %2039 = vmatmul.mubr.f32.gmra.mxu0 %v2751_v30  ;;  %2095 = vmatprep.subr.mxu0 %v1628_v63  ;;  %v1678_v13 = vld [vmem:[%s3114_s1 + $0x3f8] sm:$0xff] }
  0x5c   : > { %2139 = vmatprep.subr.mxu1 %v1644_v18  ;;  %2082 = vmatprep.mubr.f32.mxu1 %v2576_v62 }
  0x5d   : > { %2096 = vmatpush3.msra.mxu0 %v1628_v63  ;;  %2140 = vmatpush3.msra.mxu1 %v1644_v18  ;;  %v1661_v63 = vld [vmem:[%s3114_s1 + $0x370] sm:$0xff]  ;;  %v1676_v18 = vld [vmem:[%s3114_s1 + $0x3e8] sm:$0xff] }
  0x5e   : > { %2097 = vmatprep.subr.mxu0 %v1627_v24  ;;  %2083 = vmatmul.mubr.f32.gmra.mxu1 %v2601_v9 }
  0x5f   : > { %2141 = vmatprep.subr.mxu1 %v1643_v10  ;;  %2041 = vmatprep.mubr.f32.mxu0 %v2773_v25 }
  0x60   : > { %2098 = vmatpush3.msra.mxu0 %v1627_v24  ;;  %2142 = vmatpush3.msra.mxu1 %v1643_v10  ;;  %v1657_v24 = vld [vmem:[%s3114_s1 + $0x350] sm:$0xff] }
  0x61   : > { %2042 = vmatmul.mubr.f32.gmra.mxu0 %v2776_v16  ;;  %2099 = vmatprep.subr.mxu0 %v1626_v28  ;;  %v1673_v10 = vld [vmem:[%s3114_s1 + $0x3d0] sm:$0xff] }
  0x62   : > { %2143 = vmatprep.subr.mxu1 %v1642_v35  ;;  %2085 = vmatprep.mubr.f32.mxu1 %v2616_v14 }
  0x63   : > { %2100 = vmatpush3.msra.mxu0 %v1626_v28  ;;  %2144 = vmatpush3.msra.mxu1 %v1642_v35  ;;  %v932_v28 = vrot.slane %v2550_v52, 2  ;;  %v933_v35 = vrot.slane %v2560_v56, 2  ;;  %v1655_v56 = vld [vmem:[%s3114_s1 + $0x340] sm:$0xff] }
  0x64   : > { %2101 = vmatprep.subr.mxu0 %v1625_v44  ;;  %2086 = vmatmul.mubr.f32.gmra.mxu1 %v2650_v32 }
  0x65   : > { %2145 = vmatprep.subr.mxu1 %v1641_v33  ;;  %2044 = vmatprep.mubr.f32.mxu0 %v2799_v45  ;;  %v2931_v42 = vsel %vm503_vm1, %v932_v28, %v933_v35 }
  0x66   : > { %2102 = vmatpush3.msra.mxu0 %v1625_v44  ;;  %2146 = vmatpush3.msra.mxu1 %v1641_v33  ;;  %v1654_v44 = vld [vmem:[%s3114_s1 + $0x338] sm:$0xff] }
  0x67   : > { %2045 = vmatmul.mubr.f32.gmra.mxu0 %v2802_v38  ;;  %2103 = vmatprep.subr.mxu0 %v1624_v46  ;;  %v1670_v33 = vld [vmem:[%s3114_s1 + $0x3b8] sm:$0xff] }
  0x68   : > { %2147 = vmatprep.subr.mxu1 %v1640_v48  ;;  %2088 = vmatprep.mubr.f32.mxu1 %v2665_v37 }
  0x69   : > { %2104 = vmatpush3.msra.mxu0 %v1624_v46  ;;  %2148 = vmatpush3.msra.mxu1 %v1640_v48  ;;  %v1653_v46 = vld [vmem:[%s3114_s1 + $0x330] sm:$0xff] }
  0x6a   : > { %2105 = vmatprep.subr.mxu0 %v1623_v49  ;;  %2089 = vmatmul.mubr.f32.gmra.mxu1 %v2550_v52  ;;  %v1669_v48 = vld [vmem:[%s3114_s1 + $0x3b0] sm:$0xff] }
  0x6b   : > { %2149 = vmatprep.subr.mxu1 %v1639_v51  ;;  %2106 = vmatpush3.msra.mxu0 %v1623_v49  ;;  %v1652_v49 = vld [vmem:[%s3114_s1 + $0x328] sm:$0xff] }
  0x6c   : > { %2150 = vmatpush3.msra.mxu1 %v1639_v51  ;;  %2107 = vmatprep.subr.mxu0 %v1622_v53  ;;  %v1668_v51 = vld [vmem:[%s3114_s1 + $0x3a8] sm:$0xff] }
  0x6d   : > { %2151 = vmatprep.subr.mxu1 %v1638_v54  ;;  %2108 = vmatpush3.msra.mxu0 %v1622_v53  ;;  %v1651_v53 = vld [vmem:[%s3114_s1 + $0x320] sm:$0xff] }
  0x6e   : > { %2152 = vmatpush3.msra.mxu1 %v1638_v54  ;;  %2109 = vmatprep.subr.mxu0 %v1621_v55  ;;  %v1667_v54 = vld [vmem:[%s3114_s1 + $0x3a0] sm:$0xff] }
  0x6f   : > { %2153 = vmatprep.subr.mxu1 %v1637_v59  ;;  %2110 = vmatpush3.msra.mxu0 %v1621_v55  ;;  %v1650_v55 = vld [vmem:[%s3114_s1 + $0x318] sm:$0xff] }
  0x70   : > { %2154 = vmatpush3.msra.mxu1 %v1637_v59  ;;  %2111 = vmatprep.subr.mxu0 %v1620_v60  ;;  %v1666_v59 = vld [vmem:[%s3114_s1 + $0x398] sm:$0xff] }
  0x71   : > { %2155 = vmatprep.subr.mxu1 %v1636_v26  ;;  %2112 = vmatpush3.msra.mxu0 %v1620_v60  ;;  %v1649_v60 = vld [vmem:[%s3114_s1 + $0x310] sm:$0xff] }
  0x72   : > { %2156 = vmatpush3.msra.mxu1 %v1636_v26  ;;  %2113 = vmatprep.subr.mxu0 %v1619_v27  ;;  %v1665_v26 = vld [vmem:[%s3114_s1 + $0x390] sm:$0xff] }
  0x73   : > { %2157 = vmatprep.subr.mxu1 %v1635_v61  ;;  %2114 = vmatpush3.msra.mxu0 %v1619_v27  ;;  %v1648_v27 = vld [vmem:[%s3114_s1 + $0x308] sm:$0xff] }
  0x74   : > { %2158 = vmatpush3.msra.mxu1 %v1635_v61  ;;  %2115 = vmatprep.subr.mxu0 %v1618_v1  ;;  %v1664_v61 = vld [vmem:[%s3114_s1 + $0x388] sm:$0xff] }
  0x75   : > { %2159 = vmatprep.subr.mxu1 %v1634_v31  ;;  %2116 = vmatpush3.msra.mxu0 %v1618_v1  ;;  %v1647_v1 = vld [vmem:[%s3114_s1 + $0x300] sm:$0xff] }
  0x76   : > { %2160 = vmatpush3.msra.mxu1 %v1634_v31  ;;  %2117 = vmatprep.subr.mxu0 %v1617_v4  ;;  %v1663_v31 = vld [vmem:[%s3114_s1 + $0x380] sm:$0xff] }
  0x77   : > { %2161 = vmatprep.subr.mxu1 %v1633_v5  ;;  %2118 = vmatpush3.msra.mxu0 %v1617_v4  ;;  %v1694_v4 = vld [vmem:[%s3114_s1 + $0x478] sm:$0xff] }
  0x78   : > { %2162 = vmatpush3.msra.mxu1 %v1633_v5  ;;  %2119 = vmatprep.subr.mxu0 %v1616_v6  ;;  %v1693_v5 = vld [vmem:[%s3114_s1 + $0x470] sm:$0xff] }
  0x79   : > { %2163 = vmatprep.subr.mxu1 %v1632_v7  ;;  %2120 = vmatpush3.msra.mxu0 %v1616_v6 }
  0x7a   : > { %2164 = vmatpush3.msra.mxu1 %v1632_v7  ;;  %2121 = vmatprep.subr.mxu0 %v1615_v8 }
  0x7b   : > { %2165 = vmatprep.subr.mxu1 %v1631_v12  ;;  %2122 = vmatpush3.msra.mxu0 %v1615_v8 }
  0x7c   : > { %2123 = vmatprep.mubr.f32.mxu0 %v2514_v41  ;;  %2166 = vmatpush3.msra.mxu1 %v1631_v12  ;;  %v1677_v41 = vld [vmem:[%s3114_s1 + $0x3f0] sm:$0xff] }
  0x7d   : > { %2167 = vmatprep.mubr.f32.mxu1 %v2726_v3  ;;  %2124 = vmatmul.mubr.f32.vlgmr.msra.gmra.mxu0 %v2607_v11  ;;  %v1660_v3 = vld [vmem:[%s3114_s1 + $0x368] sm:$0xff] }
  0x7e   : > { %2168 = vmatmul.mubr.f32.vlgmr.msra.gmra.mxu1 %v2748_v15  ;;  %2179 = vmatprep.subr.mxu0 %v1662_v58 }
  0x7f   : > { %2223 = vmatprep.subr.mxu1 %v1678_v13  ;;  %2180 = vmatpush3.msra.mxu0 %v1662_v58 }
  0x80   : > { %2224 = vmatpush3.msra.mxu1 %v1678_v13  ;;  %2181 = vmatprep.subr.mxu0 %v1661_v63 }
  0x81   : > { %2225 = vmatprep.subr.mxu1 %v1677_v41  ;;  %2126 = vmatprep.mubr.f32.mxu0 %v2629_v19 }
  0x82   : > { %2182 = vmatpush3.msra.mxu0 %v1661_v63  ;;  %2226 = vmatpush3.msra.mxu1 %v1677_v41 }
  0x83   : > { %2127 = vmatmul.mubr.f32.gmra.mxu0 %v2656_v34  ;;  %2183 = vmatprep.subr.mxu0 %v1660_v3 }
  0x84   : > { %2227 = vmatprep.subr.mxu1 %v1676_v18  ;;  %2170 = vmatprep.mubr.f32.mxu1 %v2751_v30 }
  0x85   : > { %2184 = vmatpush3.msra.mxu0 %v1660_v3  ;;  %2228 = vmatpush3.msra.mxu1 %v1676_v18 }
  0x86   : > { %2185 = vmatprep.subr.mxu0 %v1659_v20  ;;  %2171 = vmatmul.mubr.f32.gmra.mxu1 %v2773_v25 }
  0x87   : > { %2229 = vmatprep.subr.mxu1 %v1675_v21  ;;  %2129 = vmatprep.mubr.f32.mxu0 %v2671_v39 }
  0x88   : > { %2186 = vmatpush3.msra.mxu0 %v1659_v20  ;;  %2230 = vmatpush3.msra.mxu1 %v1675_v21 }
  0x89   : > { %2130 = vmatmul.mubr.f32.gmra.mxu0 %v2688_v47  ;;  %2187 = vmatprep.subr.mxu0 %v1658_v22 }
  0x8a   : > { %2231 = vmatprep.subr.mxu1 %v1674_v23  ;;  %2173 = vmatprep.mubr.f32.mxu1 %v2776_v16 }
  0x8b   : > { %2188 = vmatpush3.msra.mxu0 %v1658_v22  ;;  %2232 = vmatpush3.msra.mxu1 %v1674_v23 }
  0x8c   : > { %2189 = vmatprep.subr.mxu0 %v1657_v24  ;;  %2174 = vmatmul.mubr.f32.gmra.mxu1 %v2799_v45 }
  0x8d   : > { %2233 = vmatprep.subr.mxu1 %v1673_v10  ;;  %2132 = vmatprep.mubr.f32.mxu0 %v2697_v50 }
  0x8e   : > { %2190 = vmatpush3.msra.mxu0 %v1657_v24  ;;  %2234 = vmatpush3.msra.mxu1 %v1673_v10 }
  0x8f   : > { %2133 = vmatmul.mubr.f32.gmra.mxu0 %v2582_v0  ;;  %2191 = vmatprep.subr.mxu0 %v1656_v36 }
  0x90   : > { %2235 = vmatprep.subr.mxu1 %v1672_v40  ;;  %2176 = vmatprep.mubr.f32.mxu1 %v2802_v38 }
  0x91   : > { %2192 = vmatpush3.msra.mxu0 %v1656_v36  ;;  %2236 = vmatpush3.msra.mxu1 %v1672_v40 }
  0x92   : > { %2193 = vmatprep.subr.mxu0 %v1655_v56  ;;  %2177 = vmatmul.mubr.f32.gmra.mxu1 %v2931_v42 }
  0x93   : > { %2237 = vmatprep.subr.mxu1 %v1671_v43  ;;  %2194 = vmatpush3.msra.mxu0 %v1655_v56 }
  0x94   : > { %2238 = vmatpush3.msra.mxu1 %v1671_v43  ;;  %2195 = vmatprep.subr.mxu0 %v1654_v44 }
  0x95   : > { %2239 = vmatprep.subr.mxu1 %v1670_v33  ;;  %2196 = vmatpush3.msra.mxu0 %v1654_v44 }
  0x96   : > { %2240 = vmatpush3.msra.mxu1 %v1670_v33  ;;  %2197 = vmatprep.subr.mxu0 %v1653_v46 }
  0x97   : > { %2241 = vmatprep.subr.mxu1 %v1669_v48  ;;  %2198 = vmatpush3.msra.mxu0 %v1653_v46 }
  0x98   : > { %2242 = vmatpush3.msra.mxu1 %v1669_v48  ;;  %2199 = vmatprep.subr.mxu0 %v1652_v49 }
  0x99   : > { %2243 = vmatprep.subr.mxu1 %v1668_v51  ;;  %2200 = vmatpush3.msra.mxu0 %v1652_v49 }
  0x9a   : > { %2244 = vmatpush3.msra.mxu1 %v1668_v51  ;;  %2201 = vmatprep.subr.mxu0 %v1651_v53 }
  0x9b   : > { %2245 = vmatprep.subr.mxu1 %v1667_v54  ;;  %2202 = vmatpush3.msra.mxu0 %v1651_v53 }
  0x9c   : > { %2246 = vmatpush3.msra.mxu1 %v1667_v54  ;;  %2203 = vmatprep.subr.mxu0 %v1650_v55 }
  0x9d   : > { %2247 = vmatprep.subr.mxu1 %v1666_v59  ;;  %2204 = vmatpush3.msra.mxu0 %v1650_v55 }
  0x9e   : > { %2248 = vmatpush3.msra.mxu1 %v1666_v59  ;;  %2205 = vmatprep.subr.mxu0 %v1649_v60 }
  0x9f   : > { %2249 = vmatprep.subr.mxu1 %v1665_v26  ;;  %2206 = vmatpush3.msra.mxu0 %v1649_v60 }
  0xa0   : > { %2250 = vmatpush3.msra.mxu1 %v1665_v26  ;;  %2207 = vmatprep.subr.mxu0 %v1648_v27 }
  0xa1   : > { %2251 = vmatprep.subr.mxu1 %v1664_v61  ;;  %2208 = vmatpush3.msra.mxu0 %v1648_v27 }
  0xa2   : > { %2252 = vmatpush3.msra.mxu1 %v1664_v61  ;;  %2209 = vmatprep.subr.mxu0 %v1647_v1 }
  0xa3   : > { %2253 = vmatprep.subr.mxu1 %v1663_v31  ;;  %2210 = vmatpush3.msra.mxu0 %v1647_v1 }
  0xa4   : > { %2211 = vmatprep.mubr.f32.mxu0 %v2563_v57  ;;  %2254 = vmatpush3.msra.mxu1 %v1663_v31  ;;  %v1692_v57 = vld [vmem:[%s3114_s1 + $0x468] sm:$0xff] }
  0xa5   : > { %2255 = vmatprep.mubr.f32.mxu1 %v2607_v11  ;;  %2212 = vmatmul.mubr.f32.vlgmr.msra.gmra.mxu0 %v2576_v62  ;;  %v1691_v62 = vld [vmem:[%s3114_s1 + $0x460] sm:$0xff]  ;;  %v1689_v11 = vld [vmem:[%s3114_s1 + $0x450] sm:$0xff] }
  0xa6   : > { %2256 = vmatmul.mubr.f32.vlgmr.msra.gmra.mxu1 %v2629_v19  ;;  %2267 = vmatprep.subr.mxu0 %v1694_v4  ;;  %v1687_v19 = vld [vmem:[%s3114_s1 + $0x440] sm:$0xff] }
  0xa7   : > { %2311 = vmatprep.subr.mxu1 %v1694_v4  ;;  %2268 = vmatpush3.msra.mxu0 %v1694_v4 }
  0xa8   : > { %2327 = vmatpush3.msra.mxu1 %v1694_v4  ;;  %2269 = vmatprep.subr.mxu0 %v1693_v5 }
  0xa9   : > { %2312 = vmatprep.subr.mxu1 %v1693_v5  ;;  %2214 = vmatprep.mubr.f32.mxu0 %v2601_v9  ;;  %v1690_v9 = vld [vmem:[%s3114_s1 + $0x458] sm:$0xff] }
  0xaa   : > { %2270 = vmatpush3.msra.mxu0 %v1693_v5  ;;  %2328 = vmatpush3.msra.mxu1 %v1693_v5 }
  0xab   : > { %2215 = vmatmul.mubr.f32.gmra.mxu0 %v2616_v14  ;;  %2271 = vmatprep.subr.mxu0 %v1692_v57  ;;  %v1688_v14 = vld [vmem:[%s3114_s1 + $0x448] sm:$0xff] }
  0xac   : > { %2313 = vmatprep.subr.mxu1 %v1692_v57  ;;  %2258 = vmatprep.mubr.f32.mxu1 %v2656_v34  ;;  %v1681_v34 = vld [vmem:[%s3114_s1 + $0x410] sm:$0xff] }
  0xad   : > { %2272 = vmatpush3.msra.mxu0 %v1692_v57  ;;  %2329 = vmatpush3.msra.mxu1 %v1692_v57 }
  0xae   : > { %2273 = vmatprep.subr.mxu0 %v1691_v62  ;;  %2259 = vmatmul.mubr.f32.gmra.mxu1 %v2671_v39  ;;  %v1679_v39 = vld [vmem:[%s3114_s1 + $0x400] sm:$0xff] }
  0xaf   : > { %2314 = vmatprep.subr.mxu1 %v1691_v62  ;;  %2217 = vmatprep.mubr.f32.mxu0 %v2650_v32  ;;  %v1686_v32 = vld [vmem:[%s3114_s1 + $0x438] sm:$0xff] }
  0xb0   : > { %2274 = vmatpush3.msra.mxu0 %v1691_v62  ;;  %2330 = vmatpush3.msra.mxu1 %v1691_v62 }
  0xb1   : > { %2218 = vmatmul.mubr.f32.gmra.mxu0 %v2665_v37  ;;  %2275 = vmatprep.subr.mxu0 %v1690_v9  ;;  %v1680_v37 = vld [vmem:[%s3114_s1 + $0x408] sm:$0xff] }
  0xb2   : > { %2315 = vmatprep.subr.mxu1 %v1690_v9  ;;  %2261 = vmatprep.mubr.f32.mxu1 %v2688_v47 }
  0xb3   : > { %2276 = vmatpush3.msra.mxu0 %v1690_v9  ;;  %2331 = vmatpush3.msra.mxu1 %v1690_v9 }
  0xb4   : > { %2277 = vmatprep.subr.mxu0 %v1689_v11  ;;  %2262 = vmatmul.mubr.f32.gmra.mxu1 %v2697_v50 }
  0xb5   : > { %2316 = vmatprep.subr.mxu1 %v1689_v11  ;;  %2220 = vmatprep.mubr.f32.mxu0 %v2550_v52  ;;  %v1685_v52 = vld [vmem:[%s3114_s1 + $0x430] sm:$0xff] }
  0xb6   : > { %2278 = vmatpush3.msra.mxu0 %v1689_v11  ;;  %2332 = vmatpush3.msra.mxu1 %v1689_v11 }
  0xb7   : > { %2221 = vmatmul.mubr.f32.gmra.mxu0 %v2623_v17  ;;  %2279 = vmatprep.subr.mxu0 %v1688_v14  ;;  %v1683_v17 = vld [vmem:[%s3114_s1 + $0x420] sm:$0xff] }
  0xb8   : > { %2317 = vmatprep.subr.mxu1 %v1688_v14  ;;  %2264 = vmatprep.mubr.f32.mxu1 %v2582_v0  ;;  %v1684_v0 = vld [vmem:[%s3114_s1 + $0x428] sm:$0xff] }
  0xb9   : > { %2280 = vmatpush3.msra.mxu0 %v1688_v14  ;;  %2333 = vmatpush3.msra.mxu1 %v1688_v14 }
  0xba   : > { %2281 = vmatprep.subr.mxu0 %v1687_v19  ;;  %2265 = vmatmul.mubr.f32.gmra.mxu1 %v2645_v29  ;;  %v1682_v29 = vld [vmem:[%s3114_s1 + $0x418] sm:$0xff] }
  0xbb   : > { %2318 = vmatprep.subr.mxu1 %v1687_v19  ;;  %2282 = vmatpush3.msra.mxu0 %v1687_v19 }
  0xbc   : > { %2334 = vmatpush3.msra.mxu1 %v1687_v19  ;;  %2283 = vmatprep.subr.mxu0 %v1686_v32 }
  0xbd   : > { %2319 = vmatprep.subr.mxu1 %v1686_v32  ;;  %2284 = vmatpush3.msra.mxu0 %v1686_v32 }
  0xbe   : > { %2335 = vmatpush3.msra.mxu1 %v1686_v32  ;;  %2285 = vmatprep.subr.mxu0 %v1685_v52 }
  0xbf   : > { %2320 = vmatprep.subr.mxu1 %v1685_v52  ;;  %2286 = vmatpush3.msra.mxu0 %v1685_v52 }
  0xc0   : > { %2336 = vmatpush3.msra.mxu1 %v1685_v52  ;;  %2287 = vmatprep.subr.mxu0 %v1684_v0 }
  0xc1   : > { %2321 = vmatprep.subr.mxu1 %v1684_v0  ;;  %2288 = vmatpush3.msra.mxu0 %v1684_v0 }
  0xc2   : > { %2337 = vmatpush3.msra.mxu1 %v1684_v0  ;;  %2289 = vmatprep.subr.mxu0 %v1683_v17 }
  0xc3   : > { %2322 = vmatprep.subr.mxu1 %v1683_v17  ;;  %2290 = vmatpush3.msra.mxu0 %v1683_v17 }
  0xc4   : > { %2338 = vmatpush3.msra.mxu1 %v1683_v17  ;;  %2291 = vmatprep.subr.mxu0 %v1682_v29 }
  0xc5   : > { %2323 = vmatprep.subr.mxu1 %v1682_v29  ;;  %2292 = vmatpush3.msra.mxu0 %v1682_v29 }
  0xc6   : > { %2339 = vmatpush3.msra.mxu1 %v1682_v29  ;;  %2293 = vmatprep.subr.mxu0 %v1681_v34 }
  0xc7   : > { %2324 = vmatprep.subr.mxu1 %v1681_v34  ;;  %2294 = vmatpush3.msra.mxu0 %v1681_v34 }
  0xc8   : > { %2340 = vmatpush3.msra.mxu1 %v1681_v34  ;;  %2295 = vmatprep.subr.mxu0 %v1680_v37 }
  0xc9   : > { %2325 = vmatprep.subr.mxu1 %v1680_v37  ;;  %2296 = vmatpush3.msra.mxu0 %v1680_v37 }
  0xca   : > { %2341 = vmatpush3.msra.mxu1 %v1680_v37  ;;  %2297 = vmatprep.subr.mxu0 %v1679_v39 }
  0xcb   : > { %2326 = vmatprep.subr.mxu1 %v1679_v39  ;;  %2298 = vmatpush3.msra.mxu0 %v1679_v39 }
  0xcc   : > { %2342 = vmatpush3.msra.mxu1 %v1679_v39  ;;  %2299 = vmatprep.mubr.f32.mxu0 %v2748_v15 }
  0xcd   : > { %2305 = vmatprep.mubr.f32.mxu1 %v2799_v45  ;;  %2300 = vmatmul.mubr.f32.vlgmr.msra.gmra.mxu0 %v2751_v30 }
  0xce   : > { %2306 = vmatmul.mubr.f32.vlgmr.msra.gmra.mxu1 %v2802_v38  ;;  %2302 = vmatprep.mubr.f32.mxu0 %v2773_v25 }
  0xcf   : > { %2308 = vmatprep.mubr.f32.mxu1 %v2931_v42 }
  0xd1   : > { %2303 = vmatmul.mubr.f32.gmra.mxu0 %v2776_v16 }
  0xd2   : > { %2309 = vmatmul.mubr.f32.gmra.mxu1 %v2723_v2 }
  0xed   : > { %v1949_v47 = vpop.f32.mrf.mxu0 }
  0xee   : > { %v1993_v7 = vpop.f32.mrf.mxu1 }
  0xef   : > { %v359_v50 = vpop.f32.mrf.mxu0  ;;  %v470_v14 = vadd.f32 %v1993_v7, %v1949_v47 }
  0xf0   : > { %v464_v15 = vpop.f32.mrf.mxu1 }
  0xf1   : > { %v465_v0 = vadd.f32 %v464_v15, %v359_v50 }
 0x102   : > { %v1952_v6 = vpop.f32.mrf.mxu0 }
 0x103   : > { %v1996_v45 = vpop.f32.mrf.mxu1 }
 0x104   : > { %v3058_v8 = vpop.f32.mrf.mxu0  ;;  %v480_v37 = vadd.f32 %v1996_v45, %v1952_v6 }
 0x105   : > { %v474_v30 = vpop.f32.mrf.mxu1 }
 0x108   : > { %v1955_v12 = vpop.f32.mrf.mxu0 }
 0x109   : > { %v1999_v38 = vpop.f32.mrf.mxu1 }
 0x10a   : > { %v379_v58 = vpop.f32.mrf.mxu0  ;;  %v490_v19 = vadd.f32 %v1999_v38, %v1955_v12 }
 0x10b   : > { %v484_v25 = vpop.f32.mrf.mxu1 }
 0x10c   : > { %v485_v17 = vadd.f32 %v484_v25, %v379_v58 }
 0x10e   : > { %v1958_v13 = vpop.f32.mrf.mxu0 }
 0x10f   : > { %v2002_v41 = vpop.f32.mrf.mxu1 }
 0x110   : > { %v389_v63 = vpop.f32.mrf.mxu0  ;;  %v500_v39 = vadd.f32 %v2002_v41, %v1958_v13 }
 0x111   : > { %v494_v16 = vpop.f32.mrf.mxu1 }
 0x115   : > { %v2037_v3 = vpop.f32.mrf.mxu0 }
 0x116   : > { %v2081_v2 = vpop.f32.mrf.mxu1  ;;  %v659_v29 = vadd.f32 %v2037_v3, %v470_v14 }
 0x117   : > { %v619_v18 = vpop.f32.mrf.mxu0 }
 0x118   : > { %v749_v21 = vpop.f32.mrf.mxu1  ;;  %v789_v38 = vadd.f32 %v2081_v2, %v659_v29  ;;  %v1466_v29 = vld [vmem:[%s3080_s8] sm:$0xff] }
 0x11b   : > { %v2040_v20 = vpop.f32.mrf.mxu0 }
 0x11c   : > { %v661_v7 = vadd.f32 %v2040_v20, %v480_v37  ;;  %v1470_v37 = vld [vmem:[%s3080_s8 + $0x20] sm:$0xff] }
 0x11d   : > { %v629_v22 = vpop.f32.mrf.mxu0 }
 0x11e   : > { %v2084_v23 = vpop.f32.mrf.mxu1 }
 0x11f   : > { %v791_v6 = vadd.f32 %v2084_v23, %v661_v7 }
 0x120   : > { %v759_v10 = vpop.f32.mrf.mxu1 }
 0x121   : > { %v2043_v24 = vpop.f32.mrf.mxu0 }
 0x122   : > { %v663_v34 = vadd.f32 %v2043_v24, %v490_v19 }
 0x123   : > { %v639_v28 = vpop.f32.mrf.mxu0 }
 0x124   : > { %v2087_v35 = vpop.f32.mrf.mxu1 }
 0x126   : > { %v769_v40 = vpop.f32.mrf.mxu1 }
 0x127   : > { %v2046_v36 = vpop.f32.mrf.mxu0 }
 0x128   : > { %v665_v47 = vadd.f32 %v2046_v36, %v500_v39 }
 0x129   : > { %v649_v56 = vpop.f32.mrf.mxu0 }
 0x12a   : > { %v2090_v42 = vpop.f32.mrf.mxu1 }
 0x12b   : > { %v795_v45 = vadd.f32 %v2090_v42, %v665_v47 }
 0x12c   : > { %v779_v44 = vpop.f32.mrf.mxu1 }
 0x13d   : > { %v2125_v43 = vpop.f32.mrf.mxu0 }
 0x13e   : > { %v2169_v46 = vpop.f32.mrf.mxu1  ;;  %v925_v3 = vadd.f32 %v2125_v43, %v789_v38 }
 0x13f   : > { %v885_v33 = vpop.f32.mrf.mxu0 }
 0x140   : > { %v1019_v49 = vpop.f32.mrf.mxu1  ;;  %v1059_v20 = vadd.f32 %v2169_v46, %v925_v3 }
 0x143   : > { %v2128_v48 = vpop.f32.mrf.mxu0 }
 0x145   : > { %v895_v53 = vpop.f32.mrf.mxu0 }
 0x146   : > { %v3060_v51 = vpop.f32.mrf.mxu1 }
 0x147   : > { %3117 = vst [vmem:[#allocation2_spill] sm:$0xff] %v3060_v51  ;;  %v662_v51 = vadd.f32 %v639_v28, %v485_v17 }
 0x148   : > { %v3062_v54 = vpop.f32.mrf.mxu1 }
 0x149   : > { %3118 = vst [vmem:[#allocation3_spill] sm:$0xff] %v3062_v54  ;;  %v2131_v55 = vpop.f32.mrf.mxu0  ;;  %v658_v54 = vadd.f32 %v619_v18, %v465_v0  ;;  %v792_v58 = vadd.f32 %v769_v40, %v662_v51 }
 0x14b   : > { %v905_v60 = vpop.f32.mrf.mxu0  ;;  %v788_v25 = vadd.f32 %v749_v21, %v658_v54 }
 0x14c   : > { %v2175_v59 = vpop.f32.mrf.mxu1  ;;  %v928_v18 = vadd.f32 %v905_v60, %v792_v58  ;;  %v1469_v58 = vld [vmem:[%s3080_s8 + $0x18] sm:$0xff] }
 0x14d   : > { %v924_v41 = vadd.f32 %v885_v33, %v788_v25 }
 0x14e   : > { %v1039_v26 = vpop.f32.mrf.mxu1  ;;  %v3123_v42 = vld [vmem:[#allocation2_spill] sm:$0xff] }
 0x14f   : > { %v2134_v27 = vpop.f32.mrf.mxu0  ;;  %v1058_v36 = vadd.f32 %v1019_v49, %v924_v41  ;;  %v1062_v40 = vadd.f32 %v1039_v26, %v928_v18  ;;  %v1468_v18 = vld [vmem:[%s3080_s8 + $0x10] sm:$0xff] }
 0x150   : > { %v3124_v46 = vld [vmem:[#allocation3_spill] sm:$0xff] }
 0x151   : > { %v915_v1 = vpop.f32.mrf.mxu0 }
 0x152   : > { %v2178_v61 = vpop.f32.mrf.mxu1 }
 0x154   : > { %v1049_v4 = vpop.f32.mrf.mxu1 }
 0x165   : > { %v2213_v31 = vpop.f32.mrf.mxu0 }
 0x166   : > { %v3064_v5 = vpop.f32.mrf.mxu1 }
 0x167   : > { %3119 = vst [vmem:[#allocation4_spill] sm:$0xff] %v3064_v5  ;;  %v1149_v57 = vpop.f32.mrf.mxu0 }
 0x168   : > { %v3066_v62 = vpop.f32.mrf.mxu1  ;;  %v1188_v51 = vadd.f32 %v1149_v57, %v1058_v36  ;;  %v1471_v57 = vld [vmem:[%s3080_s8 + $0x28] sm:$0xff] }
 0x169   : > { %3120 = vst [vmem:[#allocation5_spill] sm:$0xff] %v3066_v62  ;;  %v475_v62 = vadd.f32 %v474_v30, %v3058_v8 }
 0x16b   : > { %v2216_v9 = vpop.f32.mrf.mxu0  ;;  %v660_v15 = vadd.f32 %v629_v22, %v475_v62 }
 0x16d   : > { %v1159_v32 = vpop.f32.mrf.mxu0  ;;  %v790_v8 = vadd.f32 %v759_v10, %v660_v15 }
 0x16e   : > { %v3068_v11 = vpop.f32.mrf.mxu1 }
 0x16f   : > { %3121 = vst [vmem:[#allocation6_spill] sm:$0xff] %v3068_v11  ;;  %v495_v11 = vadd.f32 %v494_v16, %v389_v63  ;;  %v927_v63 = vadd.f32 %v2128_v48, %v791_v6  ;;  %v931_v16 = vadd.f32 %v2134_v27, %v795_v45  ;;  %v926_v28 = vadd.f32 %v895_v53, %v790_v8 }
 0x170   : > { %v3070_v52 = vpop.f32.mrf.mxu1  ;;  %v3126_v62 = vld [vmem:[#allocation5_spill] sm:$0xff] }
 0x171   : > { %3122 = vst [vmem:[#allocation7_spill] sm:$0xff] %v3070_v52  ;;  %v2219_v5 = vpop.f32.mrf.mxu0  ;;  %v793_v52 = vadd.f32 %v2087_v35, %v663_v34  ;;  %v664_v50 = vadd.f32 %v649_v56, %v495_v11  ;;  %v1189_v56 = vadd.f32 %v2213_v31, %v1059_v20  ;;  %v1061_v43 = vadd.f32 %v3123_v42, %v927_v63  ;;  %v1467_v31 = vld [vmem:[%s3080_s8 + $0x8] sm:$0xff] }
 0x172   : > { %v1065_v33 = vadd.f32 %v2178_v61, %v931_v16  ;;  %v1060_v48 = vadd.f32 %v3124_v46, %v926_v28  ;;  %v1324_v11 = vadd.f32 %v3126_v62, %v1188_v51 }
 0x173   : > { %v929_v14 = vadd.f32 %v2131_v55, %v793_v52  ;;  %v1169_v24 = vpop.f32.mrf.mxu0  ;;  %v794_v30 = vadd.f32 %v779_v44, %v664_v50  ;;  %v1191_v53 = vadd.f32 %v2216_v9, %v1061_v43 }
 0x174   : > { %v2263_v12 = vpop.f32.mrf.mxu1  ;;  %v1192_v10 = vadd.f32 %v1169_v24, %v1062_v40  ;;  %v1190_v27 = vadd.f32 %v1159_v32, %v1060_v48 }
 0x175   : > { %v1063_v2 = vadd.f32 %v2175_v59, %v929_v14  ;;  %v930_v21 = vadd.f32 %v915_v1, %v794_v30  ;;  %v3125_v59 = vld [vmem:[#allocation4_spill] sm:$0xff]  ;;  %v1473_v14 = vld [vmem:[%s3080_s8 + $0x38] sm:$0xff] }
 0x176   : > { %v1305_v13 = vpop.f32.mrf.mxu1  ;;  %v1325_v60 = vadd.f32 %v3125_v59, %v1189_v56  ;;  %v3127_v9 = vld [vmem:[#allocation6_spill] sm:$0xff]  ;;  %v1472_v30 = vld [vmem:[%s3080_s8 + $0x30] sm:$0xff] }
 0x177   : > { %v2222_v22 = vpop.f32.mrf.mxu0  ;;  %v1193_v23 = vadd.f32 %v2219_v5, %v1063_v2  ;;  %v1064_v49 = vadd.f32 %v1049_v4, %v930_v21  ;;  %v1328_v19 = vadd.f32 %v1305_v13, %v1192_v10  ;;  %v1327_v0 = vadd.f32 %v3127_v9, %v1191_v53 }
 0x178   : > { %v1195_v54 = vadd.f32 %v2222_v22, %v1065_v33  ;;  %v3128_v38 = vld [vmem:[#allocation7_spill] sm:$0xff] }
 0x179   : > { %v1179_v44 = vpop.f32.mrf.mxu0  ;;  %v1329_v26 = vadd.f32 %v2263_v12, %v1193_v23  ;;  %v1326_v15 = vadd.f32 %v3128_v38, %v1190_v27 }
 0x17a   : > { %v2266_v35 = vpop.f32.mrf.mxu1  ;;  %v1194_v61 = vadd.f32 %v1179_v44, %v1064_v49 }
 0x17b   : > { %v1331_v17 = vadd.f32 %v2266_v35, %v1195_v54 }
 0x17c   : > { %v1315_v55 = vpop.f32.mrf.mxu1 }
 0x17d   : > { %v1330_v50 = vadd.f32 %v1315_v55, %v1194_v61 }
 0x18d   : > { %v2301_v1 = vpop.f32.mrf.mxu0 }
 0x18e   : > { %v2307_v5 = vpop.f32.mrf.mxu1  ;;  %v1459_v52 = vadd.f32 %v2301_v1, %v1325_v60 }
 0x18f   : > { %v1463_v4 = vadd.f32 %v2307_v5, %v1329_v26  ;;  %v1419_v32 = vpop.f32.mrf.mxu0 }
 0x190   : > { %v1439_v34 = vpop.f32.mrf.mxu1  ;;  %v1475_v39 = vadd.f32 %v1467_v31, %v1459_v52  ;;  %v1458_v47 = vadd.f32 %v1419_v32, %v1324_v11 }
 0x191   : > { %v1479_v7 = vadd.f32 %v1471_v57, %v1463_v4  ;;  %v1462_v12 = vadd.f32 %v1439_v34, %v1328_v19  ;;  %v2304_v25 = vpop.f32.mrf.mxu0 }
 0x192   : > { %v2310_v3 = vpop.f32.mrf.mxu1  ;;  %1483 = vst [vmem:[%s3093_s14 + $0x8] sm:$0xff] %v1475_v39  ;;  %v1474_v24 = vadd.f32 %v1466_v29, %v1458_v47  ;;  %v1461_v45 = vadd.f32 %v2304_v25, %v1327_v0 }
 0x193   : > { %1487 = vst [vmem:[%s3093_s14 + $0x28] sm:$0xff] %v1479_v7  ;;  %v1478_v6 = vadd.f32 %v1470_v37, %v1462_v12  ;;  %v1465_v13 = vadd.f32 %v2310_v3, %v1331_v17  ;;  %v1429_v41 = vpop.f32.mrf.mxu0 }
 0x194   : > { %v1449_v8 = vpop.f32.mrf.mxu1  ;;  %1482 = vst [vmem:[%s3093_s14] sm:$0xff] %v1474_v24  ;;  %v1477_v63 = vadd.f32 %v1469_v58, %v1461_v45  ;;  %v1460_v20 = vadd.f32 %v1429_v41, %v1326_v15 }
 0x195   : > { %1486 = vst [vmem:[%s3093_s14 + $0x20] sm:$0xff] %v1478_v6  ;;  %v1481_v16 = vadd.f32 %v1473_v14, %v1465_v13  ;;  %v1464_v2 = vadd.f32 %v1449_v8, %v1330_v50 }
 0x196   : > { %1485 = vst [vmem:[%s3093_s14 + $0x18] sm:$0xff] %v1477_v63  ;;  %v1476_v22 = vadd.f32 %v1468_v18, %v1460_v20 }
 0x197   : > { %1489 = vst [vmem:[%s3093_s14 + $0x38] sm:$0xff] %v1481_v16  ;;  %v1480_v28 = vadd.f32 %v1472_v30, %v1464_v2 }
 0x198   : > { %1484 = vst [vmem:[%s3093_s14 + $0x10] sm:$0xff] %v1476_v22 }
 0x199   : > { %1488 = vst [vmem:[%s3093_s14 + $0x30] sm:$0xff] %v1480_v28 }
 0x19a PF: > { %s13_s12 = sadd.s32 1, %s2358_s12  }
 0x19b   : > { %p10_p4 = scmp.ge.s32.totalorder %s13_s12, 4  }
 0x19d   :  { %12 = sbr.rel (!%p10_p4) target bundleno = 1 (0x1), region = 73 }

</bundles_post_ra>
